<compile_context>
chip_gen: v5e
topology: v5e:2x2
jax: 0.10.0
libtpu: 0.0.40
codegen_flags: <defaults>
</compile_context>

<pallas_src>
import jax
import jax.numpy as jnp
from jax.experimental import pallas as pl
from jax.experimental.pallas import tpu as pltpu

LANES = 128                       # keep the matmul N dimension lane-dense
MAX_TILE_M = 512                  # ~85% of HBM roofline per reference data
VMEM_LIMIT = 32 * 1024 * 1024     # safe scoped-VMEM budget on v5e/v6e/v7x
BN_EPS = 1e-5


def _round_up(x, m):
    return (x + m - 1) // m * m


# ----------------------------------------------------------------------------
# Pallas kernels
# ----------------------------------------------------------------------------
def _matmul_stats_kernel(x_ref, w_ref, y_ref, stats_ref):
    """One M-tile: y = x @ w (bf16 in, f32 acc) + per-tile BN partial stats.

    stats rows: row 0 = per-channel sum, row 1 = per-channel sum of squares,
    rows 2..7 are zero padding so the stats block stays (8, Cp) aligned.
    """
    y = jnp.dot(x_ref[...], w_ref[...], preferred_element_type=jnp.float32)
    y_ref[...] = y
    s1 = jnp.sum(y, axis=0, keepdims=True)        # (1, Cp)
    s2 = jnp.sum(y * y, axis=0, keepdims=True)    # (1, Cp)
    row = jax.lax.broadcasted_iota(jnp.int32, (8, y.shape[1]), 0)
    stats_ref[...] = jnp.where(row == 0, s1, jnp.where(row == 1, s2, 0.0))


def _bn_relu_kernel(y_ref, scale_ref, shift_ref, o_ref):
    """Second sweep: per-channel affine (folded BN) + ReLU, cast to bf16."""
    o_ref[...] = jnp.maximum(
        y_ref[...] * scale_ref[...] + shift_ref[...], 0.0
    ).astype(o_ref.dtype)


def _matmul_bias_tanh_kernel(x_ref, w_ref, b_ref, o_ref):
    """Final layer: matmul + bias + tanh (no BatchNorm)."""
    y = jnp.dot(x_ref[...], w_ref[...], preferred_element_type=jnp.float32)
    o_ref[...] = jnp.tanh(y + b_ref[...]).astype(o_ref.dtype)


# ----------------------------------------------------------------------------
# Tiled pallas_call wrappers (one fused layer)
# ----------------------------------------------------------------------------
def _compiler_params():
    return pltpu.CompilerParams(
        dimension_semantics=("parallel",),     # shard M tiles across TCs (v7x)
        vmem_limit_bytes=VMEM_LIMIT,
    )


def fused_deconv_layer(patches, layer, m_real, mode):
    """patches: (M, Kp) bf16.  Returns (M_pad, Cp) activation (bf16 or f32)."""
    m, kp = patches.shape
    cp = layer["Cp"]

    m_pad0 = _round_up(m, LANES)
    tile_m = min(MAX_TILE_M, m_pad0)
    m_pad = _round_up(m, tile_m)
    n_tiles = m_pad // tile_m
    if m_pad != m:
        patches = jnp.pad(patches, ((0, m_pad - m), (0, 0)))  # zero rows

    if mode == "bn_relu":
        # Pass 1: tiled matmul + per-tile partial statistics.
        y, stats = pl.pallas_call(
            _matmul_stats_kernel,
            out_shape=(
                jax.ShapeDtypeStruct((m_pad, cp), jnp.float32),
                jax.ShapeDtypeStruct((n_tiles * 8, cp), jnp.float32),
            ),
            grid=(n_tiles,),
            in_specs=[
                pl.BlockSpec((tile_m, kp), lambda i: (i, 0)),
                pl.BlockSpec((kp, cp), lambda i: (0, 0)),
            ],
            out_specs=(
                pl.BlockSpec((tile_m, cp), lambda i: (i, 0)),
                pl.BlockSpec((8, cp), lambda i: (i, 0)),
            ),
            compiler_params=_compiler_params(),
        )(patches, layer["W"])

        # Fold BN (training-mode, biased variance, eps=1e-5) into scale/shift.
        # Zero-padded rows/columns contribute nothing; divide by the real M.
        stats = stats.reshape(n_tiles, 8, cp)
        s1 = jnp.sum(stats[:, 0, :], axis=0)
        s2 = jnp.sum(stats[:, 1, :], axis=0)
        mean = s1 / m_real
        var = jnp.maximum(s2 / m_real - mean * mean, 0.0)
        inv = jax.lax.rsqrt(var + BN_EPS)
        scale = (layer["gamma"] * inv).reshape(1, cp).astype(jnp.float32)
        shift = (layer["beta"] - mean * layer["gamma"] * inv).reshape(1, cp)
        shift = shift.astype(jnp.float32)

        # Pass 2: tiled normalize + ReLU, emit bf16 for the next layer.
        out = pl.pallas_call(
            _bn_relu_kernel,
            out_shape=jax.ShapeDtypeStruct((m_pad, cp), jnp.bfloat16),
            grid=(n_tiles,),
            in_specs=[
                pl.BlockSpec((tile_m, cp), lambda i: (i, 0)),
                pl.BlockSpec((1, cp), lambda i: (0, 0)),
                pl.BlockSpec((1, cp), lambda i: (0, 0)),
            ],
            out_specs=pl.BlockSpec((tile_m, cp), lambda i: (i, 0)),
            compiler_params=_compiler_params(),
        )(y, scale, shift)
        return out

    # mode == "tanh": fused matmul + bias + tanh.
    out = pl.pallas_call(
        _matmul_bias_tanh_kernel,
        out_shape=jax.ShapeDtypeStruct((m_pad, cp), jnp.float32),
        grid=(n_tiles,),
        in_specs=[
            pl.BlockSpec((tile_m, kp), lambda i: (i, 0)),
            pl.BlockSpec((kp, cp), lambda i: (0, 0)),
            pl.BlockSpec((1, cp), lambda i: (0, 0)),
        ],
        out_specs=pl.BlockSpec((tile_m, cp), lambda i: (i, 0)),
        compiler_params=_compiler_params(),
    )(patches, layer["W"], layer["b"])
    return out


# ----------------------------------------------------------------------------
# Plain-JAX glue: ConvTranspose2d as (zero-insert + pad + im2col), channels-last
# ----------------------------------------------------------------------------
def deconv_im2col_nhwc(x, k, stride, pad):
    """x: (N, Hin, Win, Cin) -> patches (N*Hout*Wout, k*k*Cin), Hout, Wout."""
    n, hin, win, cin = x.shape
    hout = (hin - 1) * stride - 2 * pad + k
    wout = (win - 1) * stride - 2 * pad + k
    ep = k - 1 - pad                     # edge pad of the equivalent direct conv
    hu = (hin - 1) * stride + 1 + 2 * ep
    wu = (win - 1) * stride + 1 + 2 * ep
    x_up = jnp.zeros((n, hu, wu, cin), x.dtype)
    x_up = x_up.at[
        :,
        ep: ep + (hin - 1) * stride + 1: stride,
        ep: ep + (win - 1) * stride + 1: stride,
        :,
    ].set(x)
    cols = []
    for kh in range(k):
        for kw in range(k):
            cols.append(x_up[:, kh: kh + hout, kw: kw + wout, :])
    patches = jnp.stack(cols, axis=3)                 # (N, Ho, Wo, k*k, Cin)
    return patches.reshape(n * hout * wout, k * k * cin), hout, wout


# ----------------------------------------------------------------------------
# Parameter prep (one-time): flip/transpose/pad weights, bf16 cast, pad channels
# ----------------------------------------------------------------------------
LAYER_CFG = [
    # (name, kernel, stride, pad, post-op)
    ("deconv1", 4, 1, 0, "bn_relu"),
    ("deconv2", 4, 2, 1, "bn_relu"),
    ("deconv3", 4, 2, 1, "bn_relu"),
    ("deconv4", 4, 2, 1, "tanh"),
]


def prep_params(raw_params):
    prepped = {}
    for name, k, _, _, _ in LAYER_CFG:
        w, b, gamma, beta = raw_params[name]          # PyTorch layouts
        cin, cout = w.shape[0], w.shape[1]
        cin_pad = _round_up(cin, 8)                   # keeps K = 16*Cin_pad % 128 == 0
        cp = _round_up(cout, LANES)
        wflip = w[:, :, ::-1, ::-1]                   # direct-conv uses flipped kernel
        wm = jnp.transpose(wflip, (2, 3, 0, 1))       # (k, k, Cin, Cout)
        wm = jnp.pad(wm, ((0, 0), (0, 0), (0, cin_pad - cin), (0, cp - cout)))
        wm = wm.reshape(k * k * cin_pad, cp).astype(jnp.bfloat16)
        prepped[name] = dict(
            W=wm,
            b=jnp.pad(b, (0, cp - cout)).reshape(1, cp).astype(jnp.float32),
            gamma=jnp.pad(gamma, (0, cp - cout), constant_values=1.0).astype(jnp.float32),
            beta=jnp.pad(beta, (0, cp - cout)).astype(jnp.float32),
            Cin=cin, Cin_pad=cin_pad, Cout=cout, Cp=cp,
        )
    return prepped


def make_generator(raw_params):
    prepped = prep_params(raw_params)

    def forward(z, label):
        x = jnp.concatenate([z, label], axis=1)               # (N, C0, 1, 1) NCHW
        x = jnp.transpose(x, (0, 2, 3, 1)).astype(jnp.bfloat16)  # NHWC once
        for name, k, s, p, mode in LAYER_CFG:
            layer = prepped[name]
            n, hin, win, cin = x.shape
            if layer["Cin_pad"] != cin:                        # lane/K alignment
                x = jnp.pad(x, ((0, 0), (0, 0), (0, 0), (0, layer["Cin_pad"] - cin)))
            patches, hout, wout = deconv_im2col_nhwc(x, k, s, p)
            m = n * hout * wout
            y2d = fused_deconv_layer(patches, layer, m, mode)  # (M_pad, Cp)
            y2d = y2d[:m, : layer["Cout"]]
            x = y2d.reshape(n, hout, wout, layer["Cout"])
        return jnp.transpose(x, (0, 3, 1, 2))                  # back to NCHW, f32

    return jax.jit(forward)


def init_params(key, z_dim, cond_num, d, pic_dim, std=0.02):
    """normal_init(mean=0, std=0.02), bias=0, BatchNorm default gamma=1, beta=0."""
    shapes = {
        "deconv1": (z_dim + cond_num, d * 4, 4, 4),
        "deconv2": (d * 4, d * 2, 4, 4),
        "deconv3": (d * 2, d, 4, 4),
        "deconv4": (d, pic_dim, 4, 4),
    }
    params = {}
    for name, shp in shapes.items():
        key, sub = jax.random.split(key)
        cout = shp[1]
        w = jax.random.normal(sub, shp, dtype=jnp.float32) * std
        params[name] = (
            w,
            jnp.zeros((cout,), jnp.float32),   # conv bias
            jnp.ones((cout,), jnp.float32),    # BN weight (unused for deconv4)
            jnp.zeros((cout,), jnp.float32),   # BN bias   (unused for deconv4)
        )
    return params


if __name__ == "__main__":
    # Small, module-consistent shapes: z (N, z_dim, 1, 1), label (N, cond_num, 1, 1)
    N, z_dim, cond_num, d, pic_dim = 2, 16, 4, 16, 3

    key = jax.random.PRNGKey(0)
    kz, kl, kp = jax.random.split(key, 3)
    z = jax.random.normal(kz, (N, z_dim, 1, 1), dtype=jnp.float32)
    label = jax.random.normal(kl, (N, cond_num, 1, 1), dtype=jnp.float32)
    params = init_params(kp, z_dim, cond_num, d, pic_dim)

    generator = make_generator(params)
    out = generator(z, label)
    out = jax.block_until_ready(out)

    assert out.shape == (N, pic_dim, 32, 32), out.shape
    assert bool(jnp.all(jnp.isfinite(out)))
    assert bool(jnp.all(jnp.abs(out) <= 1.0 + 1e-6))  # tanh output range
    print("KERNEL_OK")
</pallas_src>

<mosaic_0001>
module attributes {stable_mosaic.version = 11 : i64} {
  func.func @_bn_relu_kernel(%arg0: i32, %arg1: memref<128x128xf32, #tpu.memory_space<vmem>>, %arg2: memref<1x128xf32, #tpu.memory_space<vmem>>, %arg3: memref<1x128xf32, #tpu.memory_space<vmem>>, %arg4: memref<128x128xbf16, #tpu.memory_space<vmem>>) attributes {dimension_semantics = [#tpu.dimension_semantics<parallel>], iteration_bounds = array<i64: 1>, scalar_prefetch = 0 : i64, scratch_operands = 0 : i64, tpu.core_type = #tpu.core_type<tc>, window_params = [{transform_indices = @transform_0, window_bounds = array<i64: 128, 128>}, {pipeline_mode = #tpu.pipeline_mode<synchronous>, transform_indices = @transform_1, window_bounds = array<i64: 1, 128>}, {pipeline_mode = #tpu.pipeline_mode<synchronous>, transform_indices = @transform_2, window_bounds = array<i64: 1, 128>}, {transform_indices = @transform_3, window_bounds = array<i64: 128, 128>}]} {
    %c0 = arith.constant 0 : index
    %c0_0 = arith.constant 0 : index
    %0 = vector.load %arg1[%c0, %c0_0] : memref<128x128xf32, #tpu.memory_space<vmem>>, vector<128x128xf32>
    %c0_1 = arith.constant 0 : index
    %c0_2 = arith.constant 0 : index
    %1 = vector.load %arg2[%c0_1, %c0_2] : memref<1x128xf32, #tpu.memory_space<vmem>>, vector<1x128xf32>
    %2 = vector.broadcast %1 : vector<1x128xf32> to vector<128x128xf32>
    %3 = arith.mulf %0, %2 : vector<128x128xf32>
    %c0_3 = arith.constant 0 : index
    %c0_4 = arith.constant 0 : index
    %4 = vector.load %arg3[%c0_3, %c0_4] : memref<1x128xf32, #tpu.memory_space<vmem>>, vector<1x128xf32>
    %5 = vector.broadcast %4 : vector<1x128xf32> to vector<128x128xf32>
    %6 = arith.addf %3, %5 : vector<128x128xf32>
    %cst = arith.constant 0.000000e+00 : f32
    %7 = vector.broadcast %cst : f32 to vector<128x128xf32>
    %8 = arith.maximumf %6, %7 : vector<128x128xf32>
    %9 = arith.truncf %8 : vector<128x128xf32> to vector<128x128xbf16>
    %c0_5 = arith.constant 0 : index
    %c0_6 = arith.constant 0 : index
    %10 = vector.load %arg4[%c0_5, %c0_6] : memref<128x128xbf16, #tpu.memory_space<vmem>>, vector<128x128xbf16>
    tpu.vector_store %arg4[%c0_5, %c0_6], %9 {strides = array<i32>} : memref<128x128xbf16, #tpu.memory_space<vmem>>, vector<128x128xbf16>,
    return
  }
  func.func @transform_0(%arg0: i32) -> (i32, i32) {
    %c0_i32 = arith.constant 0 : i32
    %c0_i32_0 = arith.constant 0 : i32
    return %arg0, %c0_i32 : i32, i32
  }
  func.func @transform_1(%arg0: i32) -> (i32, i32) {
    %c0_i32 = arith.constant 0 : i32
    %c0_i32_0 = arith.constant 0 : i32
    %c0_i32_1 = arith.constant 0 : i32
    return %c0_i32, %c0_i32_0 : i32, i32
  }
  func.func @transform_2(%arg0: i32) -> (i32, i32) {
    %c0_i32 = arith.constant 0 : i32
    %c0_i32_0 = arith.constant 0 : i32
    %c0_i32_1 = arith.constant 0 : i32
    return %c0_i32, %c0_i32_0 : i32, i32
  }
  func.func @transform_3(%arg0: i32) -> (i32, i32) {
    %c0_i32 = arith.constant 0 : i32
    %c0_i32_0 = arith.constant 0 : i32
    return %arg0, %c0_i32 : i32, i32
  }
}

module attributes {stable_mosaic.version = 11 : i64} {
  func.func @_matmul_stats_kernel(%arg0: i32, %arg1: memref<128x384xbf16, #tpu.memory_space<vmem>>, %arg2: memref<384x128xbf16, #tpu.memory_space<vmem>>, %arg3: memref<128x128xf32, #tpu.memory_space<vmem>>, %arg4: memref<8x128xf32, #tpu.memory_space<vmem>>) attributes {dimension_semantics = [#tpu.dimension_semantics<parallel>], iteration_bounds = array<i64: 1>, scalar_prefetch = 0 : i64, scratch_operands = 0 : i64, tpu.core_type = #tpu.core_type<tc>, window_params = [{transform_indices = @transform_0, window_bounds = array<i64: 128, 384>}, {pipeline_mode = #tpu.pipeline_mode<synchronous>, transform_indices = @transform_1, window_bounds = array<i64: 384, 128>}, {transform_indices = @transform_2, window_bounds = array<i64: 128, 128>}, {transform_indices = @transform_3, window_bounds = array<i64: 8, 128>}]} {
    %c0 = arith.constant 0 : index
    %c0_0 = arith.constant 0 : index
    %0 = vector.load %arg1[%c0, %c0_0] : memref<128x384xbf16, #tpu.memory_space<vmem>>, vector<128x384xbf16>
    %c0_1 = arith.constant 0 : index
    %c0_2 = arith.constant 0 : index
    %1 = vector.load %arg2[%c0_1, %c0_2] : memref<384x128xbf16, #tpu.memory_space<vmem>>, vector<384x128xbf16>
    %cst = arith.constant dense<0.000000e+00> : vector<128x128xf32>
    %2 = tpu.matmul %0, %1, %cst {dimension_numbers = #tpu.dot_dimension_numbers<[1], [0], [0], [1], [0, 0, 1, 1], [], []>} : vector<128x384xbf16>, vector<384x128xbf16>, vector<128x128xf32> -> vector<128x128xf32>
    %c0_3 = arith.constant 0 : index
    %c0_4 = arith.constant 0 : index
    %3 = vector.load %arg3[%c0_3, %c0_4] : memref<128x128xf32, #tpu.memory_space<vmem>>, vector<128x128xf32>
    tpu.vector_store %arg3[%c0_3, %c0_4], %2 {strides = array<i32>} : memref<128x128xf32, #tpu.memory_space<vmem>>, vector<128x128xf32>,
    %cst_5 = arith.constant dense<0.000000e+00> : vector<128xf32>
    %4 = vector.multi_reduction <add>, %2, %cst_5 [0] : vector<128x128xf32> to vector<128xf32>
    %5 = vector.shape_cast %4 : vector<128xf32> to vector<1x128xf32>
    %6 = arith.mulf %2, %2 : vector<128x128xf32>
    %cst_6 = arith.constant dense<0.000000e+00> : vector<128xf32>
    %7 = vector.multi_reduction <add>, %6, %cst_6 [0] : vector<128x128xf32> to vector<128xf32>
    %8 = vector.shape_cast %7 : vector<128xf32> to vector<1x128xf32>
    %9 = tpu.iota {dimensions = array<i32: 0>} : vector<8x128xi32>
    %c0_i32 = arith.constant 0 : i32
    %10 = vector.broadcast %c0_i32 : i32 to vector<8x128xi32>
    %11 = arith.cmpi eq, %9, %10 : vector<8x128xi32>
    %c1_i32 = arith.constant 1 : i32
    %12 = vector.broadcast %c1_i32 : i32 to vector<8x128xi32>
    %13 = arith.cmpi eq, %9, %12 : vector<8x128xi32>
    %cst_7 = arith.constant 0.000000e+00 : f32
    %14 = vector.shape_cast %8 : vector<1x128xf32> to vector<1x128xf32>
    %15 = vector.broadcast %14 : vector<1x128xf32> to vector<8x128xf32>
    %16 = vector.broadcast %cst_7 : f32 to vector<8x128xf32>
    %17 = arith.select %13, %15, %16 : vector<8x128xi1>, vector<8x128xf32>
    %18 = vector.shape_cast %5 : vector<1x128xf32> to vector<1x128xf32>
    %19 = vector.broadcast %18 : vector<1x128xf32> to vector<8x128xf32>
    %20 = arith.select %11, %19, %17 : vector<8x128xi1>, vector<8x128xf32>
    %c0_8 = arith.constant 0 : index
    %c0_9 = arith.constant 0 : index
    %21 = vector.load %arg4[%c0_8, %c0_9] : memref<8x128xf32, #tpu.memory_space<vmem>>, vector<8x128xf32>
    tpu.vector_store %arg4[%c0_8, %c0_9], %20 {strides = array<i32>} : memref<8x128xf32, #tpu.memory_space<vmem>>, vector<8x128xf32>,
    return
  }
  func.func @transform_0(%arg0: i32) -> (i32, i32) {
    %c0_i32 = arith.constant 0 : i32
    %c0_i32_0 = arith.constant 0 : i32
    return %arg0, %c0_i32 : i32, i32
  }
  func.func @transform_1(%arg0: i32) -> (i32, i32) {
    %c0_i32 = arith.constant 0 : i32
    %c0_i32_0 = arith.constant 0 : i32
    %c0_i32_1 = arith.constant 0 : i32
    return %c0_i32, %c0_i32_0 : i32, i32
  }
  func.func @transform_2(%arg0: i32) -> (i32, i32) {
    %c0_i32 = arith.constant 0 : i32
    %c0_i32_0 = arith.constant 0 : i32
    return %arg0, %c0_i32 : i32, i32
  }
  func.func @transform_3(%arg0: i32) -> (i32, i32) {
    %c0_i32 = arith.constant 0 : i32
    %c0_i32_0 = arith.constant 0 : i32
    return %arg0, %c0_i32 : i32, i32
  }
}

module attributes {stable_mosaic.version = 11 : i64} {
  func.func @_matmul_stats_kernel(%arg0: i32, %arg1: memref<128x1024xbf16, #tpu.memory_space<vmem>>, %arg2: memref<1024x128xbf16, #tpu.memory_space<vmem>>, %arg3: memref<128x128xf32, #tpu.memory_space<vmem>>, %arg4: memref<8x128xf32, #tpu.memory_space<vmem>>) attributes {dimension_semantics = [#tpu.dimension_semantics<parallel>], iteration_bounds = array<i64: 1>, scalar_prefetch = 0 : i64, scratch_operands = 0 : i64, tpu.core_type = #tpu.core_type<tc>, window_params = [{transform_indices = @transform_0, window_bounds = array<i64: 128, 1024>}, {pipeline_mode = #tpu.pipeline_mode<synchronous>, transform_indices = @transform_1, window_bounds = array<i64: 1024, 128>}, {transform_indices = @transform_2, window_bounds = array<i64: 128, 128>}, {transform_indices = @transform_3, window_bounds = array<i64: 8, 128>}]} {
    %c0 = arith.constant 0 : index
    %c0_0 = arith.constant 0 : index
    %0 = vector.load %arg1[%c0, %c0_0] : memref<128x1024xbf16, #tpu.memory_space<vmem>>, vector<128x1024xbf16>
    %c0_1 = arith.constant 0 : index
    %c0_2 = arith.constant 0 : index
    %1 = vector.load %arg2[%c0_1, %c0_2] : memref<1024x128xbf16, #tpu.memory_space<vmem>>, vector<1024x128xbf16>
    %cst = arith.constant dense<0.000000e+00> : vector<128x128xf32>
    %2 = tpu.matmul %0, %1, %cst {dimension_numbers = #tpu.dot_dimension_numbers<[1], [0], [0], [1], [0, 0, 1, 1], [], []>} : vector<128x1024xbf16>, vector<1024x128xbf16>, vector<128x128xf32> -> vector<128x128xf32>
    %c0_3 = arith.constant 0 : index
    %c0_4 = arith.constant 0 : index
    %3 = vector.load %arg3[%c0_3, %c0_4] : memref<128x128xf32, #tpu.memory_space<vmem>>, vector<128x128xf32>
    tpu.vector_store %arg3[%c0_3, %c0_4], %2 {strides = array<i32>} : memref<128x128xf32, #tpu.memory_space<vmem>>, vector<128x128xf32>,
    %cst_5 = arith.constant dense<0.000000e+00> : vector<128xf32>
    %4 = vector.multi_reduction <add>, %2, %cst_5 [0] : vector<128x128xf32> to vector<128xf32>
    %5 = vector.shape_cast %4 : vector<128xf32> to vector<1x128xf32>
    %6 = arith.mulf %2, %2 : vector<128x128xf32>
    %cst_6 = arith.constant dense<0.000000e+00> : vector<128xf32>
    %7 = vector.multi_reduction <add>, %6, %cst_6 [0] : vector<128x128xf32> to vector<128xf32>
    %8 = vector.shape_cast %7 : vector<128xf32> to vector<1x128xf32>
    %9 = tpu.iota {dimensions = array<i32: 0>} : vector<8x128xi32>
    %c0_i32 = arith.constant 0 : i32
    %10 = vector.broadcast %c0_i32 : i32 to vector<8x128xi32>
    %11 = arith.cmpi eq, %9, %10 : vector<8x128xi32>
    %c1_i32 = arith.constant 1 : i32
    %12 = vector.broadcast %c1_i32 : i32 to vector<8x128xi32>
    %13 = arith.cmpi eq, %9, %12 : vector<8x128xi32>
    %cst_7 = arith.constant 0.000000e+00 : f32
    %14 = vector.shape_cast %8 : vector<1x128xf32> to vector<1x128xf32>
    %15 = vector.broadcast %14 : vector<1x128xf32> to vector<8x128xf32>
    %16 = vector.broadcast %cst_7 : f32 to vector<8x128xf32>
    %17 = arith.select %13, %15, %16 : vector<8x128xi1>, vector<8x128xf32>
    %18 = vector.shape_cast %5 : vector<1x128xf32> to vector<1x128xf32>
    %19 = vector.broadcast %18 : vector<1x128xf32> to vector<8x128xf32>
    %20 = arith.select %11, %19, %17 : vector<8x128xi1>, vector<8x128xf32>
    %c0_8 = arith.constant 0 : index
    %c0_9 = arith.constant 0 : index
    %21 = vector.load %arg4[%c0_8, %c0_9] : memref<8x128xf32, #tpu.memory_space<vmem>>, vector<8x128xf32>
    tpu.vector_store %arg4[%c0_8, %c0_9], %20 {strides = array<i32>} : memref<8x128xf32, #tpu.memory_space<vmem>>, vector<8x128xf32>,
    return
  }
  func.func @transform_0(%arg0: i32) -> (i32, i32) {
    %c0_i32 = arith.constant 0 : i32
    %c0_i32_0 = arith.constant 0 : i32
    return %arg0, %c0_i32 : i32, i32
  }
  func.func @transform_1(%arg0: i32) -> (i32, i32) {
    %c0_i32 = arith.constant 0 : i32
    %c0_i32_0 = arith.constant 0 : i32
    %c0_i32_1 = arith.constant 0 : i32
    return %c0_i32, %c0_i32_0 : i32, i32
  }
  func.func @transform_2(%arg0: i32) -> (i32, i32) {
    %c0_i32 = arith.constant 0 : i32
    %c0_i32_0 = arith.constant 0 : i32
    return %arg0, %c0_i32 : i32, i32
  }
  func.func @transform_3(%arg0: i32) -> (i32, i32) {
    %c0_i32 = arith.constant 0 : i32
    %c0_i32_0 = arith.constant 0 : i32
    return %arg0, %c0_i32 : i32, i32
  }
}

module attributes {stable_mosaic.version = 11 : i64} {
  func.func @_matmul_stats_kernel(%arg0: i32, %arg1: memref<512x512xbf16, #tpu.memory_space<vmem>>, %arg2: memref<512x128xbf16, #tpu.memory_space<vmem>>, %arg3: memref<512x128xf32, #tpu.memory_space<vmem>>, %arg4: memref<8x128xf32, #tpu.memory_space<vmem>>) attributes {dimension_semantics = [#tpu.dimension_semantics<parallel>], iteration_bounds = array<i64: 1>, scalar_prefetch = 0 : i64, scratch_operands = 0 : i64, tpu.core_type = #tpu.core_type<tc>, window_params = [{transform_indices = @transform_0, window_bounds = array<i64: 512, 512>}, {pipeline_mode = #tpu.pipeline_mode<synchronous>, transform_indices = @transform_1, window_bounds = array<i64: 512, 128>}, {transform_indices = @transform_2, window_bounds = array<i64: 512, 128>}, {transform_indices = @transform_3, window_bounds = array<i64: 8, 128>}]} {
    %c0 = arith.constant 0 : index
    %c0_0 = arith.constant 0 : index
    %0 = vector.load %arg1[%c0, %c0_0] : memref<512x512xbf16, #tpu.memory_space<vmem>>, vector<512x512xbf16>
    %c0_1 = arith.constant 0 : index
    %c0_2 = arith.constant 0 : index
    %1 = vector.load %arg2[%c0_1, %c0_2] : memref<512x128xbf16, #tpu.memory_space<vmem>>, vector<512x128xbf16>
    %cst = arith.constant dense<0.000000e+00> : vector<512x128xf32>
    %2 = tpu.matmul %0, %1, %cst {dimension_numbers = #tpu.dot_dimension_numbers<[1], [0], [0], [1], [0, 0, 1, 1], [], []>} : vector<512x512xbf16>, vector<512x128xbf16>, vector<512x128xf32> -> vector<512x128xf32>
    %c0_3 = arith.constant 0 : index
    %c0_4 = arith.constant 0 : index
    %3 = vector.load %arg3[%c0_3, %c0_4] : memref<512x128xf32, #tpu.memory_space<vmem>>, vector<512x128xf32>
    tpu.vector_store %arg3[%c0_3, %c0_4], %2 {strides = array<i32>} : memref<512x128xf32, #tpu.memory_space<vmem>>, vector<512x128xf32>,
    %cst_5 = arith.constant dense<0.000000e+00> : vector<128xf32>
    %4 = vector.multi_reduction <add>, %2, %cst_5 [0] : vector<512x128xf32> to vector<128xf32>
    %5 = vector.shape_cast %4 : vector<128xf32> to vector<1x128xf32>
    %6 = arith.mulf %2, %2 : vector<512x128xf32>
    %cst_6 = arith.constant dense<0.000000e+00> : vector<128xf32>
    %7 = vector.multi_reduction <add>, %6, %cst_6 [0] : vector<512x128xf32> to vector<128xf32>
    %8 = vector.shape_cast %7 : vector<128xf32> to vector<1x128xf32>
    %9 = tpu.iota {dimensions = array<i32: 0>} : vector<8x128xi32>
    %c0_i32 = arith.constant 0 : i32
    %10 = vector.broadcast %c0_i32 : i32 to vector<8x128xi32>
    %11 = arith.cmpi eq, %9, %10 : vector<8x128xi32>
    %c1_i32 = arith.constant 1 : i32
    %12 = vector.broadcast %c1_i32 : i32 to vector<8x128xi32>
    %13 = arith.cmpi eq, %9, %12 : vector<8x128xi32>
    %cst_7 = arith.constant 0.000000e+00 : f32
    %14 = vector.shape_cast %8 : vector<1x128xf32> to vector<1x128xf32>
    %15 = vector.broadcast %14 : vector<1x128xf32> to vector<8x128xf32>
    %16 = vector.broadcast %cst_7 : f32 to vector<8x128xf32>
    %17 = arith.select %13, %15, %16 : vector<8x128xi1>, vector<8x128xf32>
    %18 = vector.shape_cast %5 : vector<1x128xf32> to vector<1x128xf32>
    %19 = vector.broadcast %18 : vector<1x128xf32> to vector<8x128xf32>
    %20 = arith.select %11, %19, %17 : vector<8x128xi1>, vector<8x128xf32>
    %c0_8 = arith.constant 0 : index
    %c0_9 = arith.constant 0 : index
    %21 = vector.load %arg4[%c0_8, %c0_9] : memref<8x128xf32, #tpu.memory_space<vmem>>, vector<8x128xf32>
    tpu.vector_store %arg4[%c0_8, %c0_9], %20 {strides = array<i32>} : memref<8x128xf32, #tpu.memory_space<vmem>>, vector<8x128xf32>,
    return
  }
  func.func @transform_0(%arg0: i32) -> (i32, i32) {
    %c0_i32 = arith.constant 0 : i32
    %c0_i32_0 = arith.constant 0 : i32
    return %arg0, %c0_i32 : i32, i32
  }
  func.func @transform_1(%arg0: i32) -> (i32, i32) {
    %c0_i32 = arith.constant 0 : i32
    %c0_i32_0 = arith.constant 0 : i32
    %c0_i32_1 = arith.constant 0 : i32
    return %c0_i32, %c0_i32_0 : i32, i32
  }
  func.func @transform_2(%arg0: i32) -> (i32, i32) {
    %c0_i32 = arith.constant 0 : i32
    %c0_i32_0 = arith.constant 0 : i32
    return %arg0, %c0_i32 : i32, i32
  }
  func.func @transform_3(%arg0: i32) -> (i32, i32) {
    %c0_i32 = arith.constant 0 : i32
    %c0_i32_0 = arith.constant 0 : i32
    return %arg0, %c0_i32 : i32, i32
  }
}

module attributes {stable_mosaic.version = 11 : i64} {
  func.func @_bn_relu_kernel(%arg0: i32, %arg1: memref<512x128xf32, #tpu.memory_space<vmem>>, %arg2: memref<1x128xf32, #tpu.memory_space<vmem>>, %arg3: memref<1x128xf32, #tpu.memory_space<vmem>>, %arg4: memref<512x128xbf16, #tpu.memory_space<vmem>>) attributes {dimension_semantics = [#tpu.dimension_semantics<parallel>], iteration_bounds = array<i64: 1>, scalar_prefetch = 0 : i64, scratch_operands = 0 : i64, tpu.core_type = #tpu.core_type<tc>, window_params = [{transform_indices = @transform_0, window_bounds = array<i64: 512, 128>}, {pipeline_mode = #tpu.pipeline_mode<synchronous>, transform_indices = @transform_1, window_bounds = array<i64: 1, 128>}, {pipeline_mode = #tpu.pipeline_mode<synchronous>, transform_indices = @transform_2, window_bounds = array<i64: 1, 128>}, {transform_indices = @transform_3, window_bounds = array<i64: 512, 128>}]} {
    %c0 = arith.constant 0 : index
    %c0_0 = arith.constant 0 : index
    %0 = vector.load %arg1[%c0, %c0_0] : memref<512x128xf32, #tpu.memory_space<vmem>>, vector<512x128xf32>
    %c0_1 = arith.constant 0 : index
    %c0_2 = arith.constant 0 : index
    %1 = vector.load %arg2[%c0_1, %c0_2] : memref<1x128xf32, #tpu.memory_space<vmem>>, vector<1x128xf32>
    %2 = vector.broadcast %1 : vector<1x128xf32> to vector<512x128xf32>
    %3 = arith.mulf %0, %2 : vector<512x128xf32>
    %c0_3 = arith.constant 0 : index
    %c0_4 = arith.constant 0 : index
    %4 = vector.load %arg3[%c0_3, %c0_4] : memref<1x128xf32, #tpu.memory_space<vmem>>, vector<1x128xf32>
    %5 = vector.broadcast %4 : vector<1x128xf32> to vector<512x128xf32>
    %6 = arith.addf %3, %5 : vector<512x128xf32>
    %cst = arith.constant 0.000000e+00 : f32
    %7 = vector.broadcast %cst : f32 to vector<512x128xf32>
    %8 = arith.maximumf %6, %7 : vector<512x128xf32>
    %9 = arith.truncf %8 : vector<512x128xf32> to vector<512x128xbf16>
    %c0_5 = arith.constant 0 : index
    %c0_6 = arith.constant 0 : index
    %10 = vector.load %arg4[%c0_5, %c0_6] : memref<512x128xbf16, #tpu.memory_space<vmem>>, vector<512x128xbf16>
    tpu.vector_store %arg4[%c0_5, %c0_6], %9 {strides = array<i32>} : memref<512x128xbf16, #tpu.memory_space<vmem>>, vector<512x128xbf16>,
    return
  }
  func.func @transform_0(%arg0: i32) -> (i32, i32) {
    %c0_i32 = arith.constant 0 : i32
    %c0_i32_0 = arith.constant 0 : i32
    return %arg0, %c0_i32 : i32, i32
  }
  func.func @transform_1(%arg0: i32) -> (i32, i32) {
    %c0_i32 = arith.constant 0 : i32
    %c0_i32_0 = arith.constant 0 : i32
    %c0_i32_1 = arith.constant 0 : i32
    return %c0_i32, %c0_i32_0 : i32, i32
  }
  func.func @transform_2(%arg0: i32) -> (i32, i32) {
    %c0_i32 = arith.constant 0 : i32
    %c0_i32_0 = arith.constant 0 : i32
    %c0_i32_1 = arith.constant 0 : i32
    return %c0_i32, %c0_i32_0 : i32, i32
  }
  func.func @transform_3(%arg0: i32) -> (i32, i32) {
    %c0_i32 = arith.constant 0 : i32
    %c0_i32_0 = arith.constant 0 : i32
    return %arg0, %c0_i32 : i32, i32
  }
}

module attributes {stable_mosaic.version = 11 : i64} {
  func.func @_matmul_bias_tanh_kernel(%arg0: i32, %arg1: memref<512x256xbf16, #tpu.memory_space<vmem>>, %arg2: memref<256x128xbf16, #tpu.memory_space<vmem>>, %arg3: memref<1x128xf32, #tpu.memory_space<vmem>>, %arg4: memref<512x128xf32, #tpu.memory_space<vmem>>) attributes {dimension_semantics = [#tpu.dimension_semantics<parallel>], iteration_bounds = array<i64: 4>, scalar_prefetch = 0 : i64, scratch_operands = 0 : i64, tpu.core_type = #tpu.core_type<tc>, window_params = [{transform_indices = @transform_0, window_bounds = array<i64: 512, 256>}, {pipeline_mode = #tpu.pipeline_mode<synchronous>, transform_indices = @transform_1, window_bounds = array<i64: 256, 128>}, {pipeline_mode = #tpu.pipeline_mode<synchronous>, transform_indices = @transform_2, window_bounds = array<i64: 1, 128>}, {transform_indices = @transform_3, window_bounds = array<i64: 512, 128>}]} {
    %c0 = arith.constant 0 : index
    %c0_0 = arith.constant 0 : index
    %0 = vector.load %arg1[%c0, %c0_0] : memref<512x256xbf16, #tpu.memory_space<vmem>>, vector<512x256xbf16>
    %c0_1 = arith.constant 0 : index
    %c0_2 = arith.constant 0 : index
    %1 = vector.load %arg2[%c0_1, %c0_2] : memref<256x128xbf16, #tpu.memory_space<vmem>>, vector<256x128xbf16>
    %cst = arith.constant dense<0.000000e+00> : vector<512x128xf32>
    %2 = tpu.matmul %0, %1, %cst {dimension_numbers = #tpu.dot_dimension_numbers<[1], [0], [0], [1], [0, 0, 1, 1], [], []>} : vector<512x256xbf16>, vector<256x128xbf16>, vector<512x128xf32> -> vector<512x128xf32>
    %c0_3 = arith.constant 0 : index
    %c0_4 = arith.constant 0 : index
    %3 = vector.load %arg3[%c0_3, %c0_4] : memref<1x128xf32, #tpu.memory_space<vmem>>, vector<1x128xf32>
    %4 = vector.broadcast %3 : vector<1x128xf32> to vector<512x128xf32>
    %5 = arith.addf %2, %4 : vector<512x128xf32>
    %6 = math.tanh %5 : vector<512x128xf32>
    %c0_5 = arith.constant 0 : index
    %c0_6 = arith.constant 0 : index
    %7 = vector.load %arg4[%c0_5, %c0_6] : memref<512x128xf32, #tpu.memory_space<vmem>>, vector<512x128xf32>
    tpu.vector_store %arg4[%c0_5, %c0_6], %6 {strides = array<i32>} : memref<512x128xf32, #tpu.memory_space<vmem>>, vector<512x128xf32>,
    return
  }
  func.func @transform_0(%arg0: i32) -> (i32, i32) {
    %c0_i32 = arith.constant 0 : i32
    %c0_i32_0 = arith.constant 0 : i32
    return %arg0, %c0_i32 : i32, i32
  }
  func.func @transform_1(%arg0: i32) -> (i32, i32) {
    %c0_i32 = arith.constant 0 : i32
    %c0_i32_0 = arith.constant 0 : i32
    %c0_i32_1 = arith.constant 0 : i32
    return %c0_i32, %c0_i32_0 : i32, i32
  }
  func.func @transform_2(%arg0: i32) -> (i32, i32) {
    %c0_i32 = arith.constant 0 : i32
    %c0_i32_0 = arith.constant 0 : i32
    %c0_i32_1 = arith.constant 0 : i32
    return %c0_i32, %c0_i32_0 : i32, i32
  }
  func.func @transform_3(%arg0: i32) -> (i32, i32) {
    %c0_i32 = arith.constant 0 : i32
    %c0_i32_0 = arith.constant 0 : i32
    return %arg0, %c0_i32 : i32, i32
  }
}

</mosaic_0001>

<bundles_post_ra>
// kernel: forward.8
= control target key start
LH: loop header
LB: loop body
LE: loop exit
PB: predicated region body
PF: predicated region fallthrough
CT: control target
= control target key end

     0   :  { %s287_s0 = inlined_call_operand.vmem [shape: f32[128,128], index: 0, kind: input, shape index: {}]   ;;  %s288_s1 = inlined_call_operand.vmem [shape: f32[1,128], index: 1, kind: input, shape index: {}]   ;;  %s289_s2 = inlined_call_operand.vmem [shape: f32[1,128], index: 2, kind: input, shape index: {}]   ;;  %s290_s3 = inlined_call_operand.vmem [shape: bf16[128,128], index: 3, kind: output, shape index: {}]  }
   0x1   :  { %v14_v0 = vld [vmem:[%s287_s0] sm:$0xff]  ;;  %v15_v1 = vld [vmem:[%s287_s0 + $0x8] sm:$0xff]  ;;  %v16_v4 = vld [vmem:[%s287_s0 + $0x10] sm:$0xff] }
   0x2   :  { %v169_v2 = vld [vmem:[%s288_s1] ss:$0 sm:$0xff]  ;;  %v17_v5 = vld [vmem:[%s287_s0 + $0x18] sm:$0xff]  ;;  %v19_v11 = vld [vmem:[%s287_s0 + $0x28] sm:$0xff] }
   0x3   :  { %v203_v3 = vld [vmem:[%s289_s2] ss:$0 sm:$0xff]  ;;  %v34_v7 = vmul.f32 %v169_v2, %v14_v0  ;;  %v35_v8 = vmul.f32 %v169_v2, %v15_v1  ;;  %v36_v9 = vmul.f32 %v169_v2, %v16_v4  ;;  %v37_v10 = vmul.f32 %v169_v2, %v17_v5  ;;  %v20_v12 = vld [vmem:[%s287_s0 + $0x30] sm:$0xff]  ;;  %v21_v13 = vld [vmem:[%s287_s0 + $0x38] sm:$0xff] }
   0x4   :  { %v18_v6 = vld [vmem:[%s287_s0 + $0x20] sm:$0xff]  ;;  %v39_v15 = vmul.f32 %v169_v2, %v19_v11  ;;  %v40_v16 = vmul.f32 %v169_v2, %v20_v12  ;;  %v41_v17 = vmul.f32 %v169_v2, %v21_v13  ;;  %v23_v27 = vld [vmem:[%s287_s0 + $0x48] sm:$0xff]  ;;  %v24_v32 = vld [vmem:[%s287_s0 + $0x50] sm:$0xff] }
   0x5   :  { %v38_v14 = vmul.f32 %v169_v2, %v18_v6  ;;  %v54_v18 = vadd.f32 %v203_v3, %v34_v7  ;;  %v55_v19 = vadd.f32 %v203_v3, %v35_v8  ;;  %v56_v20 = vadd.f32 %v203_v3, %v36_v9  ;;  %v22_v26 = vld [vmem:[%s287_s0 + $0x40] sm:$0xff]  ;;  %v25_v33 = vld [vmem:[%s287_s0 + $0x58] sm:$0xff]  ;;  %v27_v39 = vld [vmem:[%s287_s0 + $0x68] sm:$0xff] }
   0x6   :  { %v57_v21 = vadd.f32 %v203_v3, %v37_v10  ;;  %v59_v23 = vadd.f32 %v203_v3, %v39_v15  ;;  %v60_v24 = vadd.f32 %v203_v3, %v40_v16  ;;  %v61_v25 = vadd.f32 %v203_v3, %v41_v17  ;;  %v26_v38 = vld [vmem:[%s287_s0 + $0x60] sm:$0xff]  ;;  %v28_v44 = vld [vmem:[%s287_s0 + $0x70] sm:$0xff]  ;;  %v29_v45 = vld [vmem:[%s287_s0 + $0x78] sm:$0xff] }
   0x7   :  { %v58_v22 = vadd.f32 %v203_v3, %v38_v14  ;;  %v70_v28 = vmax.f32 %v54_v18, 0.0  ;;  %v71_v29 = vmax.f32 %v55_v19, 0.0  ;;  %v72_v30 = vmax.f32 %v56_v20, 0.0 }
   0x8   :  { %v73_v31 = vmax.f32 %v57_v21, 0.0  ;;  %v75_v35 = vmax.f32 %v59_v23, 0.0  ;;  %v76_v36 = vmax.f32 %v60_v24, 0.0  ;;  %v77_v37 = vmax.f32 %v61_v25, 0.0 }
   0x9   :  { %v74_v34 = vmax.f32 %v58_v22, 0.0  ;;  %v125_v40 = vpack.c.bf16 %v71_v29, %v70_v28  ;;  %v42_v42 = vmul.f32 %v169_v2, %v22_v26  ;;  %v43_v43 = vmul.f32 %v169_v2, %v23_v27 }
   0xa   :  { %v130_v41 = vpack.c.bf16 %v73_v31, %v72_v30  ;;  %v140_v47 = vpack.c.bf16 %v77_v37, %v76_v36  ;;  %v44_v48 = vmul.f32 %v169_v2, %v24_v32  ;;  %v45_v49 = vmul.f32 %v169_v2, %v25_v33 }
   0xb   :  { %v135_v46 = vpack.c.bf16 %v75_v35, %v74_v34  ;;  %126 = vst [vmem:[%s290_s3] sm:$0xff] %v125_v40   ;;  %v62_v50 = vadd.f32 %v203_v3, %v42_v42  ;;  %v63_v51 = vadd.f32 %v203_v3, %v43_v43  ;;  %v46_v52 = vmul.f32 %v169_v2, %v26_v38 }
   0xc   :  { %v47_v53 = vmul.f32 %v169_v2, %v27_v39  ;;  %162 = vst [vmem:[%s290_s3 + $0x8] sm:$0xff] %v130_v41   ;;  %v64_v54 = vadd.f32 %v203_v3, %v44_v48  ;;  %v65_v55 = vadd.f32 %v203_v3, %v45_v49  ;;  %v48_v56 = vmul.f32 %v169_v2, %v28_v44 }
   0xd   :  { %v49_v57 = vmul.f32 %v169_v2, %v29_v45  ;;  %163 = vst [vmem:[%s290_s3 + $0x10] sm:$0xff] %v135_v46   ;;  %v78_v58 = vmax.f32 %v62_v50, 0.0  ;;  %v79_v59 = vmax.f32 %v63_v51, 0.0  ;;  %v66_v60 = vadd.f32 %v203_v3, %v46_v52 }
   0xe   :  { %v67_v61 = vadd.f32 %v203_v3, %v47_v53  ;;  %164 = vst [vmem:[%s290_s3 + $0x18] sm:$0xff] %v140_v47   ;;  %v80_v62 = vmax.f32 %v64_v54, 0.0  ;;  %v81_v63 = vmax.f32 %v65_v55, 0.0  ;;  %v68_v0 = vadd.f32 %v203_v3, %v48_v56 }
   0xf   :  { %v69_v1 = vadd.f32 %v203_v3, %v49_v57  ;;  %v145_v2 = vpack.c.bf16 %v79_v59, %v78_v58  ;;  %v82_v4 = vmax.f32 %v66_v60, 0.0 }
  0x10   :  { %v83_v5 = vmax.f32 %v67_v61, 0.0  ;;  %v150_v6 = vpack.c.bf16 %v81_v63, %v80_v62  ;;  %v84_v7 = vmax.f32 %v68_v0, 0.0 }
  0x11   :  { %v85_v8 = vmax.f32 %v69_v1, 0.0  ;;  %165 = vst [vmem:[%s290_s3 + $0x20] sm:$0xff] %v145_v2  }
  0x12   :  { %v155_v9 = vpack.c.bf16 %v83_v5, %v82_v4  ;;  %166 = vst [vmem:[%s290_s3 + $0x28] sm:$0xff] %v150_v6  }
  0x13   :  { %v160_v10 = vpack.c.bf16 %v85_v8, %v84_v7 }
  0x14   :  { %167 = vst [vmem:[%s290_s3 + $0x30] sm:$0xff] %v155_v9  }
  0x15   :  { %168 = vst [vmem:[%s290_s3 + $0x38] sm:$0xff] %v160_v10  }

// kernel: forward.7
= control target key start
LH: loop header
LB: loop body
LE: loop exit
PB: predicated region body
PF: predicated region fallthrough
CT: control target
= control target key end

     0   :  { %9 = vsyncpa [#allocation3], 0  ;;  %s911_s15 = smov [#allocation2]   ;;  %s912_s17 = smov 64   ;;  %s1190_s0 = inlined_call_operand.vmem [shape: bf16[128,384], index: 0, kind: input, shape index: {}]   ;;  %s1191_s1 = inlined_call_operand.hbm [shape: bf16[384,128], index: 1, kind: input, shape index: {}]   ;;  %s1192_s2 = inlined_call_operand.vmem [shape: f32[128,128], index: 2, kind: output, shape index: {0}]   ;;  %s1193_s3 = inlined_call_operand.vmem [shape: f32[8,128], index: 3, kind: output, shape index: {1}]  }
   0x1   :  { %s16_s14 = sshll.u32 %s1191_s1, 4  ;;  %s18_s16 = sshll.u32 %s911_s15, 4  ;;  %s17_s14 = int_to_ptr.hbm [resolvable:$true] %s16_s14  ;;  %s19_s16 = int_to_ptr.vmem [resolvable:$true] %s18_s16 }
   0x2   :  { %s913_s18 = smov 4  }
   0x3   :  { %24 = dma.hbm_to_vmem [thread:$0]  %s17_s14, 3072, %s19_s16, [#allocation3], %s912_s17, %s912_s17, %s913_s18  }
   0x4   :  { %909 = dma.done.wait [#allocation3], 3072  }
   0x5   :  { %910 = vsyncadd [#allocation3], 4294964224  ;;  %v841_v0 = vld [vmem:[#allocation2 + $0x38] sm:$0xff]  ;;  %v840_v3 = vld [vmem:[#allocation2 + $0x30] sm:$0xff] }
   0x6   :  { %v937_v1 = vld [vmem:[#allocation2 + $0x78] sm:$0xff]  ;;  %381 = vmatpush.bf16.msra.mxu0 %v841_v0  ;;  %858 = vmatpush.bf16.msra.mxu3 %v841_v0  ;;  %v943_v4 = vld [vmem:[#allocation2 + $0x70] sm:$0xff]  ;;  %v839_v6 = vld [vmem:[#allocation2 + $0x28] sm:$0xff] }
   0x7   :  { %v939_v2 = vld [vmem:[#allocation2 + $0xb8] sm:$0xff]  ;;  %430 = vmatpush.bf16.msra.mxu1 %v937_v1  ;;  %v945_v5 = vld [vmem:[#allocation2 + $0xb0] sm:$0xff]  ;;  %v847_v7 = vld [vmem:[#allocation2 + $0x68] sm:$0xff] }
   0x8   :  { %479 = vmatpush.bf16.msra.mxu2 %v939_v2  ;;  %v949_v8 = vld [vmem:[#allocation2 + $0xa8] sm:$0xff]  ;;  %v838_v9 = vld [vmem:[#allocation2 + $0x20] sm:$0xff]  ;;  %v837_v12 = vld [vmem:[#allocation2 + $0x18] sm:$0xff] }
   0x9   :  { %v846_v10 = vld [vmem:[#allocation2 + $0x60] sm:$0xff]  ;;  %v845_v13 = vld [vmem:[#allocation2 + $0x58] sm:$0xff]  ;;  %v836_v15 = vld [vmem:[#allocation2 + $0x10] sm:$0xff] }
   0xa   :  { %382 = vmatpush.bf16.msra.mxu0 %v840_v3  ;;  %859 = vmatpush.bf16.msra.mxu3 %v840_v3  ;;  %v952_v11 = vld [vmem:[#allocation2 + $0xa0] sm:$0xff]  ;;  %v955_v14 = vld [vmem:[#allocation2 + $0x98] sm:$0xff]  ;;  %v844_v16 = vld [vmem:[#allocation2 + $0x50] sm:$0xff] }
   0xb   :  { %431 = vmatpush.bf16.msra.mxu1 %v943_v4  ;;  %v958_v17 = vld [vmem:[#allocation2 + $0x90] sm:$0xff]  ;;  %v835_v18 = vld [vmem:[#allocation2 + $0x8] sm:$0xff]  ;;  %v834_v21 = vld [vmem:[#allocation2] sm:$0xff] }
   0xc   :  { %480 = vmatpush.bf16.msra.mxu2 %v945_v5  ;;  %v843_v19 = vld [vmem:[#allocation2 + $0x48] sm:$0xff]  ;;  %v842_v22 = vld [vmem:[#allocation2 + $0x40] sm:$0xff]  ;;  %v692_v26 = vld [vmem:[%s1190_s0 + $0x90] sm:$0xf] }
   0xd   :  { %v961_v20 = vld [vmem:[#allocation2 + $0x88] sm:$0xff]  ;;  %v963_v23 = vld [vmem:[#allocation2 + $0x80] sm:$0xff]  ;;  %v829_v27 = vld [vmem:[%s1190_s0 + $0x98] sm:$0xf0] }
   0xe   :  { %383 = vmatpush.bf16.msra.mxu0 %v839_v6  ;;  %860 = vmatpush.bf16.msra.mxu3 %v839_v6  ;;  %v620_v24 = vld [vmem:[%s1190_s0] sm:$0xf]  ;;  %v811_v25 = vld [vmem:[%s1190_s0 + $0x8] sm:$0xf0]  ;;  %v810_v28 = vld [vmem:[%s1190_s0 + $0x4] sm:$0xf]  ;;  %v693_v33 = vor.u32 %v829_v27, %v692_v26 }
   0xf   :  { %432 = vmatpush.bf16.msra.mxu1 %v847_v7  ;;  %v622_v29 = vld [vmem:[%s1190_s0 + $0xc] sm:$0xf0]  ;;  %v628_v30 = vld [vmem:[%s1190_s0 + $0x8] sm:$0xf]  ;;  %v812_v31 = vld [vmem:[%s1190_s0 + $0x10] sm:$0xf0]  ;;  %v621_v32 = vor.u32 %v811_v25, %v620_v24 }
  0x10   :  { %481 = vmatpush.bf16.msra.mxu2 %v949_v8  ;;  %v625_v34 = vor.u32 %v810_v28, %v622_v29  ;;  %v629_v35 = vor.u32 %v812_v31, %v628_v30  ;;  %v632_v36 = vld [vmem:[%s1190_s0 + $0x18] sm:$0xf]  ;;  %v814_v37 = vld [vmem:[%s1190_s0 + $0x20] sm:$0xf0]  ;;  %v704_v38 = vld [vmem:[%s1190_s0 + $0xa8] sm:$0xf] }
  0x11   :  { %v832_v39 = vld [vmem:[%s1190_s0 + $0xb0] sm:$0xf0]  ;;  %v813_v40 = vld [vmem:[%s1190_s0 + $0x1c] sm:$0xf]  ;;  %v634_v41 = vld [vmem:[%s1190_s0 + $0x24] sm:$0xf0]  ;;  %v633_v44 = vor.u32 %v814_v37, %v632_v36 }
  0x12   :  { %384 = vmatpush.bf16.msra.mxu0 %v838_v9  ;;  %861 = vmatpush.bf16.msra.mxu3 %v838_v9  ;;  %v640_v42 = vld [vmem:[%s1190_s0 + $0x20] sm:$0xf]  ;;  %v815_v43 = vld [vmem:[%s1190_s0 + $0x28] sm:$0xf0]  ;;  %v705_v45 = vor.u32 %v832_v39, %v704_v38  ;;  %v637_v46 = vor.u32 %v813_v40, %v634_v41  ;;  %v644_v48 = vld [vmem:[%s1190_s0 + $0x30] sm:$0xf] }
  0x13   :  { %433 = vmatpush.bf16.msra.mxu1 %v846_v10  ;;  %v641_v47 = vor.u32 %v815_v43, %v640_v42  ;;  %v817_v49 = vld [vmem:[%s1190_s0 + $0x38] sm:$0xf0]  ;;  %v816_v50 = vld [vmem:[%s1190_s0 + $0x34] sm:$0xf]  ;;  %v694_v52 = vld [vmem:[%s1190_s0 + $0x9c] sm:$0xf0] }
  0x14   :  { %482 = vmatpush.bf16.msra.mxu2 %v952_v11  ;;  %v828_v51 = vld [vmem:[%s1190_s0 + $0x94] sm:$0xf]  ;;  %v646_v53 = vld [vmem:[%s1190_s0 + $0x3c] sm:$0xf0]  ;;  %v652_v54 = vld [vmem:[%s1190_s0 + $0x38] sm:$0xf]  ;;  %v645_v56 = vor.u32 %v817_v49, %v644_v48 }
  0x15   :  { %v818_v55 = vld [vmem:[%s1190_s0 + $0x40] sm:$0xf0]  ;;  %v697_v57 = vor.u32 %v828_v51, %v694_v52  ;;  %v649_v58 = vor.u32 %v816_v50, %v646_v53  ;;  %v656_v60 = vld [vmem:[%s1190_s0 + $0x48] sm:$0xf]  ;;  %v820_v61 = vld [vmem:[%s1190_s0 + $0x50] sm:$0xf0] }
  0x16   :  { %385 = vmatpush.bf16.msra.mxu0 %v837_v12  ;;  %862 = vmatpush.bf16.msra.mxu3 %v837_v12  ;;  %v653_v59 = vor.u32 %v818_v55, %v652_v54  ;;  %v819_v62 = vld [vmem:[%s1190_s0 + $0x4c] sm:$0xf]  ;;  %v706_v0 = vld [vmem:[%s1190_s0 + $0xb4] sm:$0xf0]  ;;  %v821_v3 = vld [vmem:[%s1190_s0 + $0x58] sm:$0xf0] }
  0x17   :  { %434 = vmatpush.bf16.msra.mxu1 %v845_v13  ;;  %v831_v63 = vld [vmem:[%s1190_s0 + $0xac] sm:$0xf]  ;;  %v830_v12 = vld [vmem:[%s1190_s0 + $0xa0] sm:$0xf0]  ;;  %v833_v24 = vld [vmem:[%s1190_s0 + $0xb8] sm:$0xf0] }
  0x18   :  { %483 = vmatpush.bf16.msra.mxu2 %v955_v14  ;;  %v823_v9 = vld [vmem:[%s1190_s0 + $0x68] sm:$0xf0]  ;;  %v682_v25 = vld [vmem:[%s1190_s0 + $0x84] sm:$0xf0]  ;;  %v688_v26 = vld [vmem:[%s1190_s0 + $0x80] sm:$0xf] }
  0x19   :  { %v827_v27 = vld [vmem:[%s1190_s0 + $0x88] sm:$0xf0] }
  0x1a   :  { %386 = vmatpush.bf16.msra.mxu0 %v836_v15  ;;  %863 = vmatpush.bf16.msra.mxu3 %v836_v15  ;;  %v824_v15 = vld [vmem:[%s1190_s0 + $0x70] sm:$0xf0]  ;;  %v689_v31 = vor.u32 %v827_v27, %v688_v26 }
  0x1b   :  { %435 = vmatpush.bf16.msra.mxu1 %v844_v16 }
  0x1c   :  { %484 = vmatpush.bf16.msra.mxu2 %v958_v17 }
  0x1e   :  { %387 = vmatpush.bf16.msra.mxu0 %v835_v18  ;;  %864 = vmatpush.bf16.msra.mxu3 %v835_v18 }
  0x1f   :  { %436 = vmatpush.bf16.msra.mxu1 %v843_v19 }
  0x20   :  { %485 = vmatpush.bf16.msra.mxu2 %v961_v20 }
  0x22   :  { %388 = vmatpush.bf16.msra.mxu0 %v834_v21  ;;  %865 = vmatpush.bf16.msra.mxu3 %v834_v21  ;;  %v826_v21 = vld [vmem:[%s1190_s0 + $0x80] sm:$0xf0] }
  0x23   :  { %437 = vmatpush.bf16.msra.mxu1 %v842_v22 }
  0x24   :  { %486 = vmatpush.bf16.msra.mxu2 %v963_v23 }
  0x25   :  { %389 = vmatmul.bf16.vlgmr.msra.gmra.mxu0 %v621_v32  ;;  %419 = vmatmul.bf16.vlgmr.msra.gmra.mxu3 %v693_v33 }
  0x26   :  { %866 = vmatpush.bf16.msrb.mxu3 %v937_v1  ;;  %438 = vmatmul.bf16.vlgmr.msra.gmra.mxu1 %v625_v34  ;;  %v658_v1 = vld [vmem:[%s1190_s0 + $0x54] sm:$0xf0] }
  0x27   :  { %487 = vmatmul.bf16.vlgmr.msra.gmra.mxu2 %v629_v35  ;;  %v661_v6 = vor.u32 %v819_v62, %v658_v1 }
  0x2a   :  { %867 = vmatpush.bf16.msrb.mxu3 %v943_v4  ;;  %v657_v4 = vor.u32 %v820_v61, %v656_v60 }
  0x2e   :  { %868 = vmatpush.bf16.msrb.mxu3 %v847_v7 }
  0x32   :  { %869 = vmatpush.bf16.msrb.mxu3 %v846_v10  ;;  %v822_v10 = vld [vmem:[%s1190_s0 + $0x64] sm:$0xf] }
  0x35   :  { %394 = vmatmul.bf16.gmra.mxu0 %v633_v44  ;;  %424 = vmatmul.bf16.gmra.mxu3 %v705_v45 }
  0x36   :  { %870 = vmatpush.bf16.msrb.mxu3 %v845_v13  ;;  %443 = vmatmul.bf16.gmra.mxu1 %v637_v46  ;;  %v670_v13 = vld [vmem:[%s1190_s0 + $0x6c] sm:$0xf0] }
  0x37   :  { %492 = vmatmul.bf16.gmra.mxu2 %v641_v47  ;;  %v673_v18 = vor.u32 %v822_v10, %v670_v13 }
  0x3a   :  { %871 = vmatpush.bf16.msrb.mxu3 %v844_v16 }
  0x3e   :  { %872 = vmatpush.bf16.msrb.mxu3 %v843_v19 }
  0x42   :  { %873 = vmatpush.bf16.msrb.mxu3 %v842_v22  ;;  %v825_v22 = vld [vmem:[%s1190_s0 + $0x7c] sm:$0xf] }
  0x43   :  { %v685_v30 = vor.u32 %v825_v22, %v682_v25 }
  0x45   :  { %399 = vmatmul.bf16.gmra.mxu0 %v645_v56  ;;  %468 = vmatmul.bf16.vlgmr.msrb.gmra.mxu3 %v697_v57 }
  0x46   :  { %874 = vmatpush.bf16.msra.mxu3 %v939_v2  ;;  %448 = vmatmul.bf16.gmra.mxu1 %v649_v58  ;;  %v664_v2 = vld [vmem:[%s1190_s0 + $0x50] sm:$0xf] }
  0x47   :  { %497 = vmatmul.bf16.gmra.mxu2 %v653_v59  ;;  %v665_v7 = vor.u32 %v821_v3, %v664_v2 }
  0x4a   :  { %875 = vmatpush.bf16.msra.mxu3 %v945_v5  ;;  %v709_v5 = vor.u32 %v831_v63, %v706_v0 }
  0x4e   :  { %876 = vmatpush.bf16.msra.mxu3 %v949_v8  ;;  %v668_v8 = vld [vmem:[%s1190_s0 + $0x60] sm:$0xf] }
  0x4f   :  { %v669_v16 = vor.u32 %v823_v9, %v668_v8 }
  0x52   :  { %877 = vmatpush.bf16.msra.mxu3 %v952_v11  ;;  %v700_v11 = vld [vmem:[%s1190_s0 + $0x98] sm:$0xf] }
  0x55   :  { %404 = vmatmul.bf16.gmra.mxu0 %v657_v4  ;;  %473 = vmatmul.bf16.gmra.mxu3 %v709_v5 }
  0x56   :  { %878 = vmatpush.bf16.msra.mxu3 %v955_v14  ;;  %453 = vmatmul.bf16.gmra.mxu1 %v661_v6  ;;  %v676_v14 = vld [vmem:[%s1190_s0 + $0x68] sm:$0xf] }
  0x57   :  { %502 = vmatmul.bf16.gmra.mxu2 %v665_v7  ;;  %v677_v19 = vor.u32 %v824_v15, %v676_v14 }
  0x5a   :  { %879 = vmatpush.bf16.msra.mxu3 %v958_v17  ;;  %v701_v17 = vor.u32 %v830_v12, %v700_v11 }
  0x5e   :  { %880 = vmatpush.bf16.msra.mxu3 %v961_v20  ;;  %v680_v20 = vld [vmem:[%s1190_s0 + $0x78] sm:$0xf] }
  0x5f   :  { %v681_v28 = vor.u32 %v826_v21, %v680_v20 }
  0x62   :  { %881 = vmatpush.bf16.msra.mxu3 %v963_v23  ;;  %v712_v23 = vld [vmem:[%s1190_s0 + $0xb0] sm:$0xf] }
  0x63   :  { %v713_v29 = vor.u32 %v833_v24, %v712_v23 }
  0x65   :  { %409 = vmatmul.bf16.gmra.mxu0 %v669_v16  ;;  %517 = vmatmul.bf16.vlgmr.msra.gmra.mxu3 %v701_v17 }
  0x66   :  { %458 = vmatmul.bf16.gmra.mxu1 %v673_v18 }
  0x67   :  { %507 = vmatmul.bf16.gmra.mxu2 %v677_v19 }
  0x75   :  { %414 = vmatmul.bf16.gmra.mxu0 %v681_v28  ;;  %522 = vmatmul.bf16.gmra.mxu3 %v713_v29 }
  0x76   :  { %463 = vmatmul.bf16.gmra.mxu1 %v685_v30 }
  0x77   :  { %512 = vmatmul.bf16.gmra.mxu2 %v689_v31 }
  0xa2   :  { %v390_v32 = vpop.f32.mrf.mxu0 }
  0xa3   :  { %v439_v33 = vpop.f32.mrf.mxu1 }
  0xa4   :  { %v440_v34 = vadd.f32 %v439_v33, %v390_v32 }
  0xa8   :  { %v420_v35 = vpop.f32.mrf.mxu3 }
  0xaa   :  { %v488_v36 = vpop.f32.mrf.mxu2  ;;  %v392_v38 = vpop.f32.mrf.mxu0 }
  0xab   :  { %v1121_v37 = vadd.f32 %v488_v36, %v440_v34  ;;  %v441_v39 = vpop.f32.mrf.mxu1 }
  0xac   :  { %v442_v40 = vadd.f32 %v441_v39, %v392_v38 }
  0xad   :  { %528 = vst [vmem:[%s1192_s2] sm:$0xff] %v1121_v37  ;;  %v565_v29 = vmul.f32 %v1121_v37, %v1121_v37 }
  0xb0   :  { %v422_v41 = vpop.f32.mrf.mxu3 }
  0xb2   :  { %v490_v42 = vpop.f32.mrf.mxu2  ;;  %v395_v44 = vpop.f32.mrf.mxu0 }
  0xb3   :  { %v491_v43 = vadd.f32 %v490_v42, %v442_v40  ;;  %v444_v45 = vpop.f32.mrf.mxu1 }
  0xb4   :  { %v445_v47 = vadd.f32 %v444_v45, %v395_v44 }
  0xb5   :  { %529 = vst [vmem:[%s1192_s2 + $0x8] sm:$0xff] %v491_v43  ;;  %v544_v46 = vadd.f32 %v491_v43, %v1121_v37  ;;  %v566_v27 = vmul.f32 %v491_v43, %v491_v43 }
  0xb8   :  { %v1131_v48 = vpop.f32.mrf.mxu3 }
  0xba   :  { %v493_v49 = vpop.f32.mrf.mxu2  ;;  %v397_v51 = vpop.f32.mrf.mxu0 }
  0xbb   :  { %v494_v50 = vadd.f32 %v493_v49, %v445_v47  ;;  %v446_v52 = vpop.f32.mrf.mxu1 }
  0xbc   :  { %v447_v53 = vadd.f32 %v446_v52, %v397_v51 }
  0xbd   :  { %530 = vst [vmem:[%s1192_s2 + $0x10] sm:$0xff] %v494_v50  ;;  %v567_v30 = vmul.f32 %v494_v50, %v494_v50  ;;  %v545_v36 = vadd.f32 %v544_v46, %v494_v50 }
  0xc0   :  { %v1136_v54 = vpop.f32.mrf.mxu3 }
  0xc2   :  { %v495_v55 = vpop.f32.mrf.mxu2  ;;  %v400_v57 = vpop.f32.mrf.mxu0 }
  0xc3   :  { %v496_v56 = vadd.f32 %v495_v55, %v447_v53  ;;  %v449_v58 = vpop.f32.mrf.mxu1 }
  0xc4   :  { %v450_v59 = vadd.f32 %v449_v58, %v400_v57 }
  0xc5   :  { %531 = vst [vmem:[%s1192_s2 + $0x18] sm:$0xff] %v496_v56  ;;  %v568_v38 = vmul.f32 %v496_v56, %v496_v56 }
  0xc8   :  { %v469_v60 = vpop.f32.mrf.mxu3 }
  0xc9   :  { %v470_v20 = vadd.f32 %v469_v60, %v420_v35  ;;  %v581_v35 = vadd.f32 %v566_v27, %v565_v29 }
  0xca   :  { %v498_v61 = vpop.f32.mrf.mxu2  ;;  %v402_v63 = vpop.f32.mrf.mxu0 }
  0xcb   :  { %v499_v62 = vadd.f32 %v498_v61, %v450_v59  ;;  %v451_v0 = vpop.f32.mrf.mxu1  ;;  %v582_v43 = vadd.f32 %v581_v35, %v567_v30  ;;  %v602_v35 = vlaneseq }
  0xcc   :  { %v452_v1 = vadd.f32 %v451_v0, %v402_v63 }
  0xcd   :  { %532 = vst [vmem:[%s1192_s2 + $0x20] sm:$0xff] %v499_v62  ;;  %v569_v44 = vmul.f32 %v499_v62, %v499_v62  ;;  %v583_v37 = vadd.f32 %v582_v43, %v568_v38 }
  0xcf   :  { %v584_v50 = vadd.f32 %v583_v37, %v569_v44 }
  0xd0   :  { %v471_v2 = vpop.f32.mrf.mxu3 }
  0xd1   :  { %v472_v28 = vadd.f32 %v471_v2, %v422_v41  ;;  %v546_v41 = vadd.f32 %v545_v36, %v496_v56 }
  0xd2   :  { %v500_v3 = vpop.f32.mrf.mxu2  ;;  %v405_v5 = vpop.f32.mrf.mxu0 }
  0xd3   :  { %v501_v4 = vadd.f32 %v500_v3, %v452_v1  ;;  %v454_v6 = vpop.f32.mrf.mxu1  ;;  %v547_v45 = vadd.f32 %v546_v41, %v499_v62 }
  0xd4   :  { %v455_v7 = vadd.f32 %v454_v6, %v405_v5 }
  0xd5   :  { %533 = vst [vmem:[%s1192_s2 + $0x28] sm:$0xff] %v501_v4  ;;  %v570_v47 = vmul.f32 %v501_v4, %v501_v4  ;;  %v548_v51 = vadd.f32 %v547_v45, %v501_v4 }
  0xd7   :  { %v585_v58 = vadd.f32 %v584_v50, %v570_v47 }
  0xd8   :  { %v474_v8 = vpop.f32.mrf.mxu3 }
  0xd9   :  { %v475_v46 = vadd.f32 %v474_v8, %v1131_v48 }
  0xda   :  { %v503_v9 = vpop.f32.mrf.mxu2  ;;  %v407_v11 = vpop.f32.mrf.mxu0 }
  0xdb   :  { %v504_v10 = vadd.f32 %v503_v9, %v455_v7  ;;  %v456_v12 = vpop.f32.mrf.mxu1 }
  0xdc   :  { %v457_v13 = vadd.f32 %v456_v12, %v407_v11 }
  0xdd   :  { %534 = vst [vmem:[%s1192_s2 + $0x30] sm:$0xff] %v504_v10  ;;  %v571_v52 = vmul.f32 %v504_v10, %v504_v10  ;;  %v549_v59 = vadd.f32 %v548_v51, %v504_v10 }
  0xdf   :  { %v586_v61 = vadd.f32 %v585_v58, %v571_v52 }
  0xe0   :  { %v476_v14 = vpop.f32.mrf.mxu3 }
  0xe1   :  { %v477_v4 = vadd.f32 %v476_v14, %v1136_v54 }
  0xe2   :  { %v505_v15 = vpop.f32.mrf.mxu2  ;;  %v410_v17 = vpop.f32.mrf.mxu0 }
  0xe3   :  { %v506_v16 = vadd.f32 %v505_v15, %v457_v13  ;;  %v459_v18 = vpop.f32.mrf.mxu1 }
  0xe4   :  { %v460_v19 = vadd.f32 %v459_v18, %v410_v17 }
  0xe5   :  { %535 = vst [vmem:[%s1192_s2 + $0x38] sm:$0xff] %v506_v16  ;;  %v572_v56 = vmul.f32 %v506_v16, %v506_v16  ;;  %v550_v62 = vadd.f32 %v549_v59, %v506_v16 }
  0xe7   :  { %v587_v1 = vadd.f32 %v586_v61, %v572_v56 }
  0xe8   :  { %v518_v21 = vpop.f32.mrf.mxu3 }
  0xe9   :  { %v1153_v23 = vadd.f32 %v518_v21, %v470_v20 }
  0xea   :  { %v508_v22 = vpop.f32.mrf.mxu2  ;;  %v412_v25 = vpop.f32.mrf.mxu0 }
  0xeb   :  { %v509_v24 = vadd.f32 %v508_v22, %v460_v19  ;;  %540 = vst [vmem:[%s1192_s2 + $0x60] sm:$0xff] %v1153_v23  ;;  %v461_v26 = vpop.f32.mrf.mxu1  ;;  %v577_v17 = vmul.f32 %v1153_v23, %v1153_v23 }
  0xec   :  { %v462_v31 = vadd.f32 %v461_v26, %v412_v25 }
  0xed   :  { %536 = vst [vmem:[%s1192_s2 + $0x40] sm:$0xff] %v509_v24  ;;  %v573_v63 = vmul.f32 %v509_v24, %v509_v24  ;;  %v551_v2 = vadd.f32 %v550_v62, %v509_v24 }
  0xef   :  { %v588_v5 = vadd.f32 %v587_v1, %v573_v63 }
  0xf0   :  { %v520_v32 = vpop.f32.mrf.mxu3 }
  0xf1   :  { %v521_v34 = vadd.f32 %v520_v32, %v472_v28 }
  0xf2   :  { %v510_v33 = vpop.f32.mrf.mxu2  ;;  %v415_v40 = vpop.f32.mrf.mxu0 }
  0xf3   :  { %v511_v39 = vadd.f32 %v510_v33, %v462_v31  ;;  %541 = vst [vmem:[%s1192_s2 + $0x68] sm:$0xff] %v521_v34  ;;  %v464_v42 = vpop.f32.mrf.mxu1  ;;  %v578_v20 = vmul.f32 %v521_v34, %v521_v34 }
  0xf4   :  { %v465_v49 = vadd.f32 %v464_v42, %v415_v40 }
  0xf5   :  { %537 = vst [vmem:[%s1192_s2 + $0x48] sm:$0xff] %v511_v39  ;;  %v574_v3 = vmul.f32 %v511_v39, %v511_v39  ;;  %v552_v6 = vadd.f32 %v551_v2, %v511_v39 }
  0xf7   :  { %v589_v12 = vadd.f32 %v588_v5, %v574_v3 }
  0xf8   :  { %v523_v53 = vpop.f32.mrf.mxu3 }
  0xf9   :  { %v524_v57 = vadd.f32 %v523_v53, %v475_v46 }
  0xfa   :  { %v513_v55 = vpop.f32.mrf.mxu2  ;;  %v417_v48 = vpop.f32.mrf.mxu0 }
  0xfb   :  { %v514_v60 = vadd.f32 %v513_v55, %v465_v49  ;;  %542 = vst [vmem:[%s1192_s2 + $0x70] sm:$0xff] %v524_v57  ;;  %v466_v0 = vpop.f32.mrf.mxu1  ;;  %v579_v24 = vmul.f32 %v524_v57, %v524_v57 }
  0xfc   :  { %v467_v8 = vadd.f32 %v466_v0, %v417_v48 }
  0xfd   :  { %538 = vst [vmem:[%s1192_s2 + $0x50] sm:$0xff] %v514_v60  ;;  %v575_v7 = vmul.f32 %v514_v60, %v514_v60  ;;  %v553_v13 = vadd.f32 %v552_v6, %v514_v60 }
  0xff   :  { %v590_v16 = vadd.f32 %v589_v12, %v575_v7 }
 0x100   :  { %v525_v9 = vpop.f32.mrf.mxu3 }
 0x101   :  { %v526_v11 = vadd.f32 %v525_v9, %v477_v4 }
 0x102   :  { %v515_v10 = vpop.f32.mrf.mxu2 }
 0x103   :  { %v516_v15 = vadd.f32 %v515_v10, %v467_v8  ;;  %543 = vst [vmem:[%s1192_s2 + $0x78] sm:$0xff] %v526_v11  ;;  %v580_v28 = vmul.f32 %v526_v11, %v526_v11 }
 0x105   :  { %539 = vst [vmem:[%s1192_s2 + $0x58] sm:$0xff] %v516_v15  ;;  %v554_v54 = vadd.f32 %v553_v13, %v516_v15  ;;  %v576_v14 = vmul.f32 %v516_v15, %v516_v15 }
 0x107   :  { %v555_v18 = vadd.f32 %v554_v54, %v1153_v23  ;;  %v591_v19 = vadd.f32 %v590_v16, %v576_v14  ;;  %v603_v23 = vshrl.u32 %v602_v35, 7 }
 0x109   :  { %v592_v21 = vadd.f32 %v591_v19, %v577_v17  ;;  %v556_v22 = vadd.f32 %v555_v18, %v521_v34  ;;  %vm605_vm0 = vcmp.eq.s32.totalorder %v603_v23, 1  ;;  %vm604_vm1 = vcmp.eq.s32.totalorder %v603_v23, 0 }
 0x10b   :  { %v557_v25 = vadd.f32 %v556_v22, %v524_v57  ;;  %v593_v26 = vadd.f32 %v592_v21, %v578_v20 }
 0x10d   :  { %v558_v27 = vadd.f32 %v557_v25, %v526_v11  ;;  %v594_v29 = vadd.f32 %v593_v26, %v579_v24 }
 0x10f   :  { %v559_v30 = vrot.slane %v558_v27, 4  ;;  %v595_v31 = vadd.f32 %v594_v29, %v580_v28 }
 0x111   :  { %v560_v32 = vadd.f32 %v559_v30, %v558_v27  ;;  %v596_v33 = vrot.slane %v595_v31, 4 }
 0x113   :  { %v561_v36 = vrot.slane %v560_v32, 2  ;;  %v597_v38 = vadd.f32 %v596_v33, %v595_v31 }
 0x115   :  { %v562_v39 = vadd.f32 %v561_v36, %v560_v32  ;;  %v598_v40 = vrot.slane %v597_v38, 2 }
 0x117   :  { %v599_v42 = vadd.f32 %v598_v40, %v597_v38  ;;  %v563_v43 = vrot.slane %v562_v39, 1 }
 0x119   :  { %v600_v41 = vrot.slane %v599_v42, 1  ;;  %v564_v44 = vadd.f32 %v563_v43, %v562_v39 }
 0x11b   :  { %v601_v34 = vadd.f32 %v600_v41, %v599_v42 }
 0x11d   :  { %v606_v37 = vsel %vm605_vm0, %v601_v34, 0.0 }
 0x11e   :  { %v607_v45 = vsel %vm604_vm1, %v564_v44, %v606_v37 }
 0x11f   :  { %608 = vst [vmem:[%s1193_s3] sm:$0xff] %v607_v45 }
 0x120   :  { %617 = vsyncpa [#allocation3], 1 }

// kernel: forward.9
= control target key start
LH: loop header
LB: loop body
LE: loop exit
PB: predicated region body
PF: predicated region fallthrough
CT: control target
= control target key end

     0   :  { %9 = vsyncpa [#allocation3], 0  ;;  %s2076_s15 = smov [#allocation2]   ;;  %s2077_s17 = smov 64   ;;  %s2585_s0 = inlined_call_operand.vmem [shape: bf16[128,1024], index: 0, kind: input, shape index: {}]   ;;  %s2586_s1 = inlined_call_operand.hbm [shape: bf16[1024,128], index: 1, kind: input, shape index: {}]   ;;  %s2587_s2 = inlined_call_operand.vmem [shape: f32[128,128], index: 2, kind: output, shape index: {0}]   ;;  %s2588_s3 = inlined_call_operand.vmem [shape: f32[8,128], index: 3, kind: output, shape index: {1}]  }
   0x1   :  { %s16_s14 = sshll.u32 %s2586_s1, 4  ;;  %s18_s16 = sshll.u32 %s2076_s15, 4  ;;  %s17_s14 = int_to_ptr.hbm [resolvable:$true] %s16_s14  ;;  %s19_s16 = int_to_ptr.vmem [resolvable:$true] %s18_s16 }
   0x2   :  { %s2078_s18 = smov 4  }
   0x3   :  { %24 = dma.hbm_to_vmem [thread:$0]  %s17_s14, 8192, %s19_s16, [#allocation3], %s2077_s17, %s2077_s17, %s2078_s18  }
   0x4   :  { %2074 = dma.done.wait [#allocation3], 8192  }
   0x5   :  { %2075 = vsyncadd [#allocation3], 4294959104  ;;  %v1990_v0 = vld [vmem:[#allocation2 + $0x38] sm:$0xff]  ;;  %v1989_v4 = vld [vmem:[#allocation2 + $0x30] sm:$0xff] }
   0x6   :  { %v1998_v1 = vld [vmem:[#allocation2 + $0x78] sm:$0xff]  ;;  %925 = vmatpush.bf16.msra.mxu0 %v1990_v0  ;;  %v1997_v5 = vld [vmem:[#allocation2 + $0x70] sm:$0xff]  ;;  %v1988_v8 = vld [vmem:[#allocation2 + $0x28] sm:$0xff] }
   0x7   :  { %v2006_v2 = vld [vmem:[#allocation2 + $0xb8] sm:$0xff]  ;;  %974 = vmatpush.bf16.msra.mxu1 %v1998_v1  ;;  %v2005_v6 = vld [vmem:[#allocation2 + $0xb0] sm:$0xff]  ;;  %v1996_v9 = vld [vmem:[#allocation2 + $0x68] sm:$0xff] }
   0x8   :  { %v2014_v3 = vld [vmem:[#allocation2 + $0xf8] sm:$0xff]  ;;  %1023 = vmatpush.bf16.msra.mxu2 %v2006_v2  ;;  %v2013_v7 = vld [vmem:[#allocation2 + $0xf0] sm:$0xff]  ;;  %v2004_v10 = vld [vmem:[#allocation2 + $0xa8] sm:$0xff] }
   0x9   :  { %1072 = vmatpush.bf16.msra.mxu3 %v2014_v3  ;;  %v2012_v11 = vld [vmem:[#allocation2 + $0xe8] sm:$0xff]  ;;  %v1987_v12 = vld [vmem:[#allocation2 + $0x20] sm:$0xff]  ;;  %v1986_v16 = vld [vmem:[#allocation2 + $0x18] sm:$0xff] }
   0xa   :  { %926 = vmatpush.bf16.msra.mxu0 %v1989_v4  ;;  %v1995_v13 = vld [vmem:[#allocation2 + $0x60] sm:$0xff]  ;;  %v1994_v17 = vld [vmem:[#allocation2 + $0x58] sm:$0xff]  ;;  %v1985_v20 = vld [vmem:[#allocation2 + $0x10] sm:$0xff] }
   0xb   :  { %975 = vmatpush.bf16.msra.mxu1 %v1997_v5  ;;  %v2003_v14 = vld [vmem:[#allocation2 + $0xa0] sm:$0xff]  ;;  %v2002_v18 = vld [vmem:[#allocation2 + $0x98] sm:$0xff]  ;;  %v1993_v21 = vld [vmem:[#allocation2 + $0x50] sm:$0xff] }
   0xc   :  { %1024 = vmatpush.bf16.msra.mxu2 %v2005_v6  ;;  %v2011_v15 = vld [vmem:[#allocation2 + $0xe0] sm:$0xff]  ;;  %v2010_v19 = vld [vmem:[#allocation2 + $0xd8] sm:$0xff]  ;;  %v2001_v22 = vld [vmem:[#allocation2 + $0x90] sm:$0xff] }
   0xd   :  { %1073 = vmatpush.bf16.msra.mxu3 %v2013_v7  ;;  %v2009_v23 = vld [vmem:[#allocation2 + $0xd0] sm:$0xff]  ;;  %v1984_v24 = vld [vmem:[#allocation2 + $0x8] sm:$0xff]  ;;  %v1983_v28 = vld [vmem:[#allocation2] sm:$0xff] }
   0xe   :  { %927 = vmatpush.bf16.msra.mxu0 %v1988_v8  ;;  %v1992_v25 = vld [vmem:[#allocation2 + $0x48] sm:$0xff]  ;;  %v1991_v29 = vld [vmem:[#allocation2 + $0x40] sm:$0xff]  ;;  %v2038_v40 = vld [vmem:[#allocation2 + $0x1b8] sm:$0xff] }
   0xf   :  { %976 = vmatpush.bf16.msra.mxu1 %v1996_v9  ;;  %v2000_v26 = vld [vmem:[#allocation2 + $0x88] sm:$0xff]  ;;  %v1999_v30 = vld [vmem:[#allocation2 + $0x80] sm:$0xff]  ;;  %v2022_v41 = vld [vmem:[#allocation2 + $0x138] sm:$0xff] }
  0x10   :  { %1025 = vmatpush.bf16.msra.mxu2 %v2004_v10  ;;  %v2008_v27 = vld [vmem:[#allocation2 + $0xc8] sm:$0xff]  ;;  %v2007_v31 = vld [vmem:[#allocation2 + $0xc0] sm:$0xff]  ;;  %v2046_v46 = vld [vmem:[#allocation2 + $0x1f8] sm:$0xff] }
  0x11   :  { %1074 = vmatpush.bf16.msra.mxu3 %v2012_v11  ;;  %v1409_v32 = vld [vmem:[%s2585_s0] sm:$0xf]  ;;  %v1919_v34 = vld [vmem:[%s2585_s0 + $0x4] sm:$0xf]  ;;  %v1417_v36 = vld [vmem:[%s2585_s0 + $0x8] sm:$0xf] }
  0x12   :  { %928 = vmatpush.bf16.msra.mxu0 %v1987_v12  ;;  %v1923_v33 = vld [vmem:[%s2585_s0 + $0x1c] sm:$0xf0]  ;;  %v1411_v35 = vld [vmem:[%s2585_s0 + $0x20] sm:$0xf0]  ;;  %v1924_v37 = vld [vmem:[%s2585_s0 + $0x24] sm:$0xf0] }
  0x13   :  { %977 = vmatpush.bf16.msra.mxu1 %v1995_v13  ;;  %v1920_v38 = vld [vmem:[%s2585_s0 + $0xc] sm:$0xf]  ;;  %v1410_v42 = vor.u32 %v1923_v33, %v1409_v32  ;;  %v1414_v43 = vor.u32 %v1919_v34, %v1411_v35  ;;  %v1418_v44 = vor.u32 %v1924_v37, %v1417_v36  ;;  %v2030_v47 = vld [vmem:[#allocation2 + $0x178] sm:$0xff]  ;;  %v2037_v48 = vld [vmem:[#allocation2 + $0x1b0] sm:$0xff] }
  0x14   :  { %1026 = vmatpush.bf16.msra.mxu2 %v2003_v14  ;;  %v1419_v39 = vld [vmem:[%s2585_s0 + $0x28] sm:$0xf0]  ;;  %v2021_v49 = vld [vmem:[#allocation2 + $0x130] sm:$0xff]  ;;  %v1441_v56 = vld [vmem:[%s2585_s0 + $0x40] sm:$0xf] }
  0x15   :  { %1075 = vmatpush.bf16.msra.mxu3 %v2011_v15  ;;  %v1422_v45 = vor.u32 %v1920_v38, %v1419_v39  ;;  %v2045_v50 = vld [vmem:[#allocation2 + $0x1f0] sm:$0xff]  ;;  %v2036_v52 = vld [vmem:[#allocation2 + $0x1a8] sm:$0xff]  ;;  %v1931_v57 = vld [vmem:[%s2585_s0 + $0x5c] sm:$0xf0] }
  0x16   :  { %929 = vmatpush.bf16.msra.mxu0 %v1986_v16  ;;  %v2029_v51 = vld [vmem:[#allocation2 + $0x170] sm:$0xff]  ;;  %v2020_v53 = vld [vmem:[#allocation2 + $0x128] sm:$0xff]  ;;  %v1927_v58 = vld [vmem:[%s2585_s0 + $0x44] sm:$0xf]  ;;  %v1442_v0 = vor.u32 %v1931_v57, %v1441_v56 }
  0x17   :  { %978 = vmatpush.bf16.msra.mxu1 %v1994_v17  ;;  %v2044_v54 = vld [vmem:[#allocation2 + $0x1e8] sm:$0xff]  ;;  %v1443_v59 = vld [vmem:[%s2585_s0 + $0x60] sm:$0xf0]  ;;  %v1473_v8 = vld [vmem:[%s2585_s0 + $0x80] sm:$0xf] }
  0x18   :  { %1027 = vmatpush.bf16.msra.mxu2 %v2002_v18  ;;  %v2028_v55 = vld [vmem:[#allocation2 + $0x168] sm:$0xff]  ;;  %v1446_v1 = vor.u32 %v1927_v58, %v1443_v59  ;;  %v2035_v4 = vld [vmem:[#allocation2 + $0x1a0] sm:$0xff]  ;;  %v2033_v36 = vld [vmem:[#allocation2 + $0x190] sm:$0xff] }
  0x19   :  { %1076 = vmatpush.bf16.msra.mxu3 %v2010_v19  ;;  %v1449_v60 = vld [vmem:[%s2585_s0 + $0x48] sm:$0xf]  ;;  %v1928_v62 = vld [vmem:[%s2585_s0 + $0x4c] sm:$0xf]  ;;  %v2019_v5 = vld [vmem:[#allocation2 + $0x120] sm:$0xff] }
  0x1a   :  { %930 = vmatpush.bf16.msra.mxu0 %v1985_v20  ;;  %v1932_v61 = vld [vmem:[%s2585_s0 + $0x64] sm:$0xf0]  ;;  %v1451_v63 = vld [vmem:[%s2585_s0 + $0x68] sm:$0xf0]  ;;  %v2043_v6 = vld [vmem:[#allocation2 + $0x1e0] sm:$0xff] }
  0x1b   :  { %979 = vmatpush.bf16.msra.mxu1 %v1993_v21  ;;  %v1450_v2 = vor.u32 %v1932_v61, %v1449_v60  ;;  %v1454_v3 = vor.u32 %v1928_v62, %v1451_v63  ;;  %v2027_v7 = vld [vmem:[#allocation2 + $0x160] sm:$0xff]  ;;  %v1481_v12 = vld [vmem:[%s2585_s0 + $0x88] sm:$0xf]  ;;  %v1936_v14 = vld [vmem:[%s2585_s0 + $0x8c] sm:$0xf] }
  0x1c   :  { %1028 = vmatpush.bf16.msra.mxu2 %v2001_v22  ;;  %v1939_v9 = vld [vmem:[%s2585_s0 + $0x9c] sm:$0xf0]  ;;  %v1935_v10 = vld [vmem:[%s2585_s0 + $0x84] sm:$0xf]  ;;  %v1940_v13 = vld [vmem:[%s2585_s0 + $0xa4] sm:$0xf0] }
  0x1d   :  { %1077 = vmatpush.bf16.msra.mxu3 %v2009_v23  ;;  %v1475_v11 = vld [vmem:[%s2585_s0 + $0xa0] sm:$0xf0]  ;;  %v1483_v15 = vld [vmem:[%s2585_s0 + $0xa8] sm:$0xf0]  ;;  %v1474_v16 = vor.u32 %v1939_v9, %v1473_v8  ;;  %v1482_v18 = vor.u32 %v1940_v13, %v1481_v12  ;;  %v2034_v20 = vld [vmem:[#allocation2 + $0x198] sm:$0xff] }
  0x1e   :  { %931 = vmatpush.bf16.msra.mxu0 %v1984_v24  ;;  %v1478_v17 = vor.u32 %v1935_v10, %v1475_v11  ;;  %v1486_v19 = vor.u32 %v1936_v14, %v1483_v15  ;;  %v2018_v21 = vld [vmem:[#allocation2 + $0x118] sm:$0xff]  ;;  %v1505_v24 = vld [vmem:[%s2585_s0 + $0xc0] sm:$0xf]  ;;  %v2017_v37 = vld [vmem:[#allocation2 + $0x110] sm:$0xff] }
  0x1f   :  { %980 = vmatpush.bf16.msra.mxu1 %v1992_v25  ;;  %v2042_v22 = vld [vmem:[#allocation2 + $0x1d8] sm:$0xff]  ;;  %v1947_v25 = vld [vmem:[%s2585_s0 + $0xdc] sm:$0xf0]  ;;  %v2041_v38 = vld [vmem:[#allocation2 + $0x1d0] sm:$0xff] }
  0x20   :  { %1029 = vmatpush.bf16.msra.mxu2 %v2000_v26  ;;  %v2026_v23 = vld [vmem:[#allocation2 + $0x158] sm:$0xff]  ;;  %v1943_v26 = vld [vmem:[%s2585_s0 + $0xc4] sm:$0xf]  ;;  %v1506_v32 = vor.u32 %v1947_v25, %v1505_v24  ;;  %v2025_v39 = vld [vmem:[#allocation2 + $0x150] sm:$0xff] }
  0x21   :  { %1078 = vmatpush.bf16.msra.mxu3 %v2008_v27  ;;  %v1507_v27 = vld [vmem:[%s2585_s0 + $0xe0] sm:$0xf0]  ;;  %v1569_v56 = vld [vmem:[%s2585_s0 + $0x140] sm:$0xf]  ;;  %v1577_v60 = vld [vmem:[%s2585_s0 + $0x148] sm:$0xf] }
  0x22   :  { %932 = vmatpush.bf16.msra.mxu0 %v1983_v28  ;;  %v1513_v28 = vld [vmem:[%s2585_s0 + $0xc8] sm:$0xf]  ;;  %v1510_v33 = vor.u32 %v1943_v26, %v1507_v27  ;;  %v1963_v57 = vld [vmem:[%s2585_s0 + $0x15c] sm:$0xf0]  ;;  %v1959_v58 = vld [vmem:[%s2585_s0 + $0x144] sm:$0xf] }
  0x23   :  { %981 = vmatpush.bf16.msra.mxu1 %v1991_v29  ;;  %v1948_v29 = vld [vmem:[%s2585_s0 + $0xe4] sm:$0xf0]  ;;  %v1571_v59 = vld [vmem:[%s2585_s0 + $0x160] sm:$0xf0]  ;;  %v1960_v62 = vld [vmem:[%s2585_s0 + $0x14c] sm:$0xf] }
  0x24   :  { %1030 = vmatpush.bf16.msra.mxu2 %v1999_v30  ;;  %v1944_v30 = vld [vmem:[%s2585_s0 + $0xcc] sm:$0xf]  ;;  %v1514_v34 = vor.u32 %v1948_v29, %v1513_v28  ;;  %v1964_v61 = vld [vmem:[%s2585_s0 + $0x164] sm:$0xf0]  ;;  %v1601_v8 = vld [vmem:[%s2585_s0 + $0x180] sm:$0xf] }
  0x25   :  { %1079 = vmatpush.bf16.msra.mxu3 %v2007_v31  ;;  %933 = vmatmul.bf16.vlgmr.msra.gmra.mxu0 %v1410_v42  ;;  %v1515_v31 = vld [vmem:[%s2585_s0 + $0xe8] sm:$0xf0]  ;;  %v1951_v42 = vld [vmem:[%s2585_s0 + $0x104] sm:$0xf]  ;;  %v1971_v9 = vld [vmem:[%s2585_s0 + $0x19c] sm:$0xf0] }
  0x26   :  { %1121 = vmatpush.bf16.msrb.mxu0 %v2022_v41  ;;  %982 = vmatmul.bf16.vlgmr.msra.gmra.mxu1 %v1414_v43  ;;  %v1518_v35 = vor.u32 %v1944_v30, %v1515_v31  ;;  %v1955_v41 = vld [vmem:[%s2585_s0 + $0x11c] sm:$0xf0]  ;;  %v1539_v43 = vld [vmem:[%s2585_s0 + $0x120] sm:$0xf0]  ;;  %v1579_v63 = vld [vmem:[%s2585_s0 + $0x168] sm:$0xf0] }
  0x27   :  { %1031 = vmatmul.bf16.vlgmr.msra.gmra.mxu2 %v1418_v44  ;;  %1170 = vmatpush.bf16.msrb.mxu1 %v2030_v47  ;;  %v1545_v44 = vld [vmem:[%s2585_s0 + $0x108] sm:$0xf]  ;;  %v1547_v47 = vld [vmem:[%s2585_s0 + $0x128] sm:$0xf0]  ;;  %v1967_v10 = vld [vmem:[%s2585_s0 + $0x184] sm:$0xf] }
  0x28   :  { %1219 = vmatpush.bf16.msrb.mxu2 %v2038_v40  ;;  %1080 = vmatmul.bf16.vlgmr.msra.gmra.mxu3 %v1422_v45  ;;  %v1537_v40 = vld [vmem:[%s2585_s0 + $0x100] sm:$0xf]  ;;  %v1956_v45 = vld [vmem:[%s2585_s0 + $0x124] sm:$0xf0]  ;;  %v1603_v11 = vld [vmem:[%s2585_s0 + $0x1a0] sm:$0xf0] }
  0x29   :  { %1268 = vmatpush.bf16.msrb.mxu3 %v2046_v46  ;;  %v1952_v46 = vld [vmem:[%s2585_s0 + $0x10c] sm:$0xf]  ;;  %v1609_v12 = vld [vmem:[%s2585_s0 + $0x188] sm:$0xf] }
  0x2a   :  { %1122 = vmatpush.bf16.msrb.mxu0 %v2021_v49  ;;  %v1542_v49 = vor.u32 %v1951_v42, %v1539_v43  ;;  %v1972_v13 = vld [vmem:[%s2585_s0 + $0x1a4] sm:$0xf0]  ;;  %v1968_v14 = vld [vmem:[%s2585_s0 + $0x18c] sm:$0xf] }
  0x2b   :  { %1171 = vmatpush.bf16.msrb.mxu1 %v2029_v51  ;;  %v1550_v51 = vor.u32 %v1952_v46, %v1547_v47  ;;  %v1611_v15 = vld [vmem:[%s2585_s0 + $0x1a8] sm:$0xf0]  ;;  %v1641_v24 = vld [vmem:[%s2585_s0 + $0x1c8] sm:$0xf] }
  0x2c   :  { %1220 = vmatpush.bf16.msrb.mxu2 %v2037_v48  ;;  %v1538_v48 = vor.u32 %v1955_v41, %v1537_v40  ;;  %v1980_v25 = vld [vmem:[%s2585_s0 + $0x1e4] sm:$0xf0]  ;;  %v1976_v26 = vld [vmem:[%s2585_s0 + $0x1cc] sm:$0xf] }
  0x2d   :  { %1269 = vmatpush.bf16.msrb.mxu3 %v2045_v50  ;;  %v1546_v50 = vor.u32 %v1956_v45, %v1545_v44  ;;  %v1643_v27 = vld [vmem:[%s2585_s0 + $0x1e8] sm:$0xf0]  ;;  %v1642_v30 = vor.u32 %v1980_v25, %v1641_v24 }
  0x2e   :  { %1123 = vmatpush.bf16.msrb.mxu0 %v2020_v53  ;;  %v2016_v53 = vld [vmem:[#allocation2 + $0x108] sm:$0xff]  ;;  %v1646_v31 = vor.u32 %v1976_v26, %v1643_v27 }
  0x2f   :  { %1172 = vmatpush.bf16.msrb.mxu1 %v2028_v55  ;;  %v2024_v55 = vld [vmem:[#allocation2 + $0x148] sm:$0xff] }
  0x30   :  { %1221 = vmatpush.bf16.msrb.mxu2 %v2036_v52  ;;  %v2032_v52 = vld [vmem:[#allocation2 + $0x188] sm:$0xff] }
  0x31   :  { %1270 = vmatpush.bf16.msrb.mxu3 %v2044_v54  ;;  %v2040_v54 = vld [vmem:[#allocation2 + $0x1c8] sm:$0xff] }
  0x32   :  { %1124 = vmatpush.bf16.msrb.mxu0 %v2019_v5  ;;  %v2015_v5 = vld [vmem:[#allocation2 + $0x100] sm:$0xff] }
  0x33   :  { %1173 = vmatpush.bf16.msrb.mxu1 %v2027_v7  ;;  %v2023_v7 = vld [vmem:[#allocation2 + $0x140] sm:$0xff] }
  0x34   :  { %1222 = vmatpush.bf16.msrb.mxu2 %v2035_v4  ;;  %v2031_v4 = vld [vmem:[#allocation2 + $0x180] sm:$0xff] }
  0x35   :  { %938 = vmatmul.bf16.gmra.mxu0 %v1442_v0  ;;  %1271 = vmatpush.bf16.msrb.mxu3 %v2043_v6  ;;  %v1570_v0 = vor.u32 %v1963_v57, %v1569_v56  ;;  %v2039_v6 = vld [vmem:[#allocation2 + $0x1c0] sm:$0xff]  ;;  %v1929_v56 = vld [vmem:[%s2585_s0 + $0x54] sm:$0xf] }
  0x36   :  { %987 = vmatmul.bf16.gmra.mxu1 %v1446_v1  ;;  %1125 = vmatpush.bf16.msrb.mxu0 %v2018_v21  ;;  %v1574_v1 = vor.u32 %v1959_v58, %v1571_v59  ;;  %v1979_v21 = vld [vmem:[%s2585_s0 + $0x1dc] sm:$0xf0]  ;;  %v1459_v57 = vld [vmem:[%s2585_s0 + $0x70] sm:$0xf0]  ;;  %v1465_v58 = vld [vmem:[%s2585_s0 + $0x58] sm:$0xf] }
  0x37   :  { %1036 = vmatmul.bf16.gmra.mxu2 %v1450_v2  ;;  %1174 = vmatpush.bf16.msrb.mxu1 %v2026_v23  ;;  %v1578_v2 = vor.u32 %v1964_v61, %v1577_v60  ;;  %v1635_v23 = vld [vmem:[%s2585_s0 + $0x1e0] sm:$0xf0]  ;;  %v1934_v59 = vld [vmem:[%s2585_s0 + $0x74] sm:$0xf0]  ;;  %v1930_v60 = vld [vmem:[%s2585_s0 + $0x5c] sm:$0xf] }
  0x38   :  { %1085 = vmatmul.bf16.gmra.mxu3 %v1454_v3  ;;  %1223 = vmatpush.bf16.msrb.mxu2 %v2034_v20  ;;  %v1582_v3 = vor.u32 %v1960_v62, %v1579_v63  ;;  %v1633_v20 = vld [vmem:[%s2585_s0 + $0x1c0] sm:$0xf]  ;;  %v1467_v61 = vld [vmem:[%s2585_s0 + $0x78] sm:$0xf0] }
  0x39   :  { %1272 = vmatpush.bf16.msrb.mxu3 %v2042_v22  ;;  %v1975_v22 = vld [vmem:[%s2585_s0 + $0x1c4] sm:$0xf]  ;;  %v1634_v28 = vor.u32 %v1979_v21, %v1633_v20  ;;  %v1497_v20 = vld [vmem:[%s2585_s0 + $0x98] sm:$0xf] }
  0x3a   :  { %1126 = vmatpush.bf16.msrb.mxu0 %v2017_v37  ;;  %v1638_v29 = vor.u32 %v1975_v22, %v1635_v23  ;;  %v1926_v37 = vld [vmem:[%s2585_s0 + $0x34] sm:$0xf0]  ;;  %v1938_v22 = vld [vmem:[%s2585_s0 + $0x9c] sm:$0xf] }
  0x3b   :  { %1175 = vmatpush.bf16.msrb.mxu1 %v2025_v39  ;;  %v1435_v39 = vld [vmem:[%s2585_s0 + $0x38] sm:$0xf0]  ;;  %v1942_v21 = vld [vmem:[%s2585_s0 + $0xb4] sm:$0xf0] }
  0x3c   :  { %1224 = vmatpush.bf16.msrb.mxu2 %v2033_v36  ;;  %v1433_v36 = vld [vmem:[%s2585_s0 + $0x18] sm:$0xf]  ;;  %v1499_v23 = vld [vmem:[%s2585_s0 + $0xb8] sm:$0xf0] }
  0x3d   :  { %1273 = vmatpush.bf16.msrb.mxu3 %v2041_v38  ;;  %v1922_v38 = vld [vmem:[%s2585_s0 + $0x1c] sm:$0xf]  ;;  %v1434_v44 = vor.u32 %v1926_v37, %v1433_v36 }
  0x3e   :  { %1127 = vmatpush.bf16.msrb.mxu0 %v2016_v53  ;;  %v1438_v45 = vor.u32 %v1922_v38, %v1435_v39 }
  0x3f   :  { %1176 = vmatpush.bf16.msrb.mxu1 %v2024_v55  ;;  %v1933_v55 = vld [vmem:[%s2585_s0 + $0x6c] sm:$0xf0] }
  0x40   :  { %1225 = vmatpush.bf16.msrb.mxu2 %v2032_v52 }
  0x41   :  { %1274 = vmatpush.bf16.msrb.mxu3 %v2040_v54  ;;  %v1457_v54 = vld [vmem:[%s2585_s0 + $0x50] sm:$0xf] }
  0x42   :  { %1128 = vmatpush.bf16.msrb.mxu0 %v2015_v5  ;;  %v1466_v5 = vor.u32 %v1934_v59, %v1465_v58 }
  0x43   :  { %1177 = vmatpush.bf16.msrb.mxu1 %v2023_v7 }
  0x44   :  { %1226 = vmatpush.bf16.msrb.mxu2 %v2031_v4 }
  0x45   :  { %943 = vmatmul.bf16.gmra.mxu0 %v1474_v16  ;;  %1275 = vmatpush.bf16.msrb.mxu3 %v2039_v6  ;;  %v1602_v16 = vor.u32 %v1971_v9, %v1601_v8  ;;  %v1470_v6 = vor.u32 %v1930_v60, %v1467_v61 }
  0x46   :  { %992 = vmatmul.bf16.gmra.mxu1 %v1478_v17  ;;  %v1606_v17 = vor.u32 %v1967_v10, %v1603_v11 }
  0x47   :  { %1041 = vmatmul.bf16.gmra.mxu2 %v1482_v18  ;;  %v1610_v18 = vor.u32 %v1972_v13, %v1609_v12 }
  0x48   :  { %1090 = vmatmul.bf16.gmra.mxu3 %v1486_v19  ;;  %v1614_v19 = vor.u32 %v1968_v14, %v1611_v15 }
  0x55   :  { %948 = vmatmul.bf16.gmra.mxu0 %v1506_v32  ;;  %v1425_v32 = vld [vmem:[%s2585_s0 + $0x10] sm:$0xf] }
  0x56   :  { %997 = vmatmul.bf16.gmra.mxu1 %v1510_v33  ;;  %v1925_v33 = vld [vmem:[%s2585_s0 + $0x2c] sm:$0xf0] }
  0x57   :  { %1046 = vmatmul.bf16.gmra.mxu2 %v1514_v34  ;;  %v1921_v34 = vld [vmem:[%s2585_s0 + $0x14] sm:$0xf]  ;;  %v1426_v40 = vor.u32 %v1925_v33, %v1425_v32  ;;  %v1502_v32 = vor.u32 %v1938_v22, %v1499_v23 }
  0x58   :  { %1095 = vmatmul.bf16.gmra.mxu3 %v1518_v35  ;;  %v1427_v35 = vld [vmem:[%s2585_s0 + $0x30] sm:$0xf0] }
  0x59   :  { %v1430_v41 = vor.u32 %v1921_v34, %v1427_v35 }
  0x65   :  { %953 = vmatmul.bf16.gmra.mxu0 %v1538_v48 }
  0x66   :  { %1002 = vmatmul.bf16.gmra.mxu1 %v1542_v49 }
  0x67   :  { %1051 = vmatmul.bf16.gmra.mxu2 %v1546_v50 }
  0x68   :  { %1100 = vmatmul.bf16.gmra.mxu3 %v1550_v51 }
  0x75   :  { %958 = vmatmul.bf16.gmra.mxu0 %v1570_v0  ;;  %v1458_v0 = vor.u32 %v1933_v55, %v1457_v54 }
  0x76   :  { %1007 = vmatmul.bf16.gmra.mxu1 %v1574_v1  ;;  %v1462_v1 = vor.u32 %v1929_v56, %v1459_v57 }
  0x77   :  { %1056 = vmatmul.bf16.gmra.mxu2 %v1578_v2 }
  0x78   :  { %1105 = vmatmul.bf16.gmra.mxu3 %v1582_v3 }
  0x85   :  { %963 = vmatmul.bf16.gmra.mxu0 %v1602_v16  ;;  %v1489_v16 = vld [vmem:[%s2585_s0 + $0x90] sm:$0xf] }
  0x86   :  { %1012 = vmatmul.bf16.gmra.mxu1 %v1606_v17  ;;  %v1941_v17 = vld [vmem:[%s2585_s0 + $0xac] sm:$0xf0] }
  0x87   :  { %1061 = vmatmul.bf16.gmra.mxu2 %v1610_v18  ;;  %v1937_v18 = vld [vmem:[%s2585_s0 + $0x94] sm:$0xf]  ;;  %v1490_v26 = vor.u32 %v1941_v17, %v1489_v16 }
  0x88   :  { %1110 = vmatmul.bf16.gmra.mxu3 %v1614_v19  ;;  %v1491_v19 = vld [vmem:[%s2585_s0 + $0xb0] sm:$0xf0] }
  0x89   :  { %v1494_v27 = vor.u32 %v1937_v18, %v1491_v19 }
  0x95   :  { %968 = vmatmul.bf16.gmra.mxu0 %v1634_v28 }
  0x96   :  { %1017 = vmatmul.bf16.gmra.mxu1 %v1638_v29 }
  0x97   :  { %1066 = vmatmul.bf16.gmra.mxu2 %v1642_v30 }
  0x98   :  { %1115 = vmatmul.bf16.gmra.mxu3 %v1646_v31  ;;  %v1498_v31 = vor.u32 %v1942_v21, %v1497_v20 }
  0xa2   :  { %v934_v42 = vpop.f32.mrf.mxu0 }
  0xa3   :  { %v983_v43 = vpop.f32.mrf.mxu1 }
  0xa4   :  { %v984_v46 = vadd.f32 %v983_v43, %v934_v42  ;;  %v1521_v42 = vld [vmem:[%s2585_s0 + $0xd0] sm:$0xf] }
  0xa5   :  { %1129 = vmatmul.bf16.vlgmr.msrb.gmra.mxu0 %v1426_v40  ;;  %v1949_v43 = vld [vmem:[%s2585_s0 + $0xec] sm:$0xf0] }
  0xa6   :  { %1178 = vmatmul.bf16.vlgmr.msrb.gmra.mxu1 %v1430_v41 }
  0xa7   :  { %1227 = vmatmul.bf16.vlgmr.msrb.gmra.mxu2 %v1434_v44  ;;  %v1945_v44 = vld [vmem:[%s2585_s0 + $0xd4] sm:$0xf] }
  0xa8   :  { %1276 = vmatmul.bf16.vlgmr.msrb.gmra.mxu3 %v1438_v45  ;;  %v1523_v45 = vld [vmem:[%s2585_s0 + $0xf0] sm:$0xf0] }
  0xa9   :  { %v1526_v54 = vor.u32 %v1945_v44, %v1523_v45 }
  0xaa   :  { %v1032_v47 = vpop.f32.mrf.mxu2  ;;  %v936_v50 = vpop.f32.mrf.mxu0 }
  0xab   :  { %v1081_v48 = vpop.f32.mrf.mxu3  ;;  %v1033_v49 = vadd.f32 %v1032_v47, %v984_v46  ;;  %v985_v51 = vpop.f32.mrf.mxu1  ;;  %v1529_v46 = vld [vmem:[%s2585_s0 + $0xd8] sm:$0xf] }
  0xac   :  { %v986_v52 = vadd.f32 %v985_v51, %v936_v50  ;;  %v1950_v47 = vld [vmem:[%s2585_s0 + $0xf4] sm:$0xf0] }
  0xad   :  { %v2318_v53 = vadd.f32 %v1081_v48, %v1033_v49  ;;  %v1946_v48 = vld [vmem:[%s2585_s0 + $0xdc] sm:$0xf]  ;;  %v1530_v58 = vor.u32 %v1950_v47, %v1529_v46 }
  0xae   :  { %v1531_v49 = vld [vmem:[%s2585_s0 + $0xf8] sm:$0xf0] }
  0xaf   :  { %v1534_v59 = vor.u32 %v1946_v48, %v1531_v49 }
  0xb2   :  { %v1034_v62 = vpop.f32.mrf.mxu2  ;;  %v939_v3 = vpop.f32.mrf.mxu0 }
  0xb3   :  { %v1083_v63 = vpop.f32.mrf.mxu3  ;;  %v1035_v2 = vadd.f32 %v1034_v62, %v986_v52  ;;  %v988_v4 = vpop.f32.mrf.mxu1  ;;  %v1522_v52 = vor.u32 %v1949_v43, %v1521_v42  ;;  %v1595_v42 = vld [vmem:[%s2585_s0 + $0x178] sm:$0xf0] }
  0xb4   :  { %v989_v7 = vadd.f32 %v988_v4, %v939_v3 }
  0xb5   :  { %v2344_v8 = vadd.f32 %v1083_v63, %v1035_v2  ;;  %1134 = vmatmul.bf16.gmra.mxu0 %v1458_v0 }
  0xb6   :  { %1183 = vmatmul.bf16.gmra.mxu1 %v1462_v1 }
  0xb7   :  { %1232 = vmatmul.bf16.gmra.mxu2 %v1466_v5  ;;  %v1553_v5 = vld [vmem:[%s2585_s0 + $0x110] sm:$0xf] }
  0xb8   :  { %1281 = vmatmul.bf16.gmra.mxu3 %v1470_v6  ;;  %v1957_v6 = vld [vmem:[%s2585_s0 + $0x12c] sm:$0xf0] }
  0xb9   :  { %v1554_v17 = vor.u32 %v1957_v6, %v1553_v5  ;;  %v1974_v5 = vld [vmem:[%s2585_s0 + $0x1b4] sm:$0xf0]  ;;  %v1970_v6 = vld [vmem:[%s2585_s0 + $0x19c] sm:$0xf] }
  0xba   :  { %v1037_v9 = vpop.f32.mrf.mxu2  ;;  %v941_v12 = vpop.f32.mrf.mxu0 }
  0xbb   :  { %v1086_v10 = vpop.f32.mrf.mxu3  ;;  %v1038_v11 = vadd.f32 %v1037_v9, %v989_v7  ;;  %v990_v13 = vpop.f32.mrf.mxu1  ;;  %v1953_v7 = vld [vmem:[%s2585_s0 + $0x114] sm:$0xf] }
  0xbc   :  { %v991_v14 = vadd.f32 %v990_v13, %v941_v12  ;;  %v1555_v9 = vld [vmem:[%s2585_s0 + $0x130] sm:$0xf0]  ;;  %v1954_v12 = vld [vmem:[%s2585_s0 + $0x11c] sm:$0xf] }
  0xbd   :  { %v2346_v15 = vadd.f32 %v1086_v10, %v1038_v11  ;;  %v1561_v10 = vld [vmem:[%s2585_s0 + $0x118] sm:$0xf]  ;;  %v1563_v13 = vld [vmem:[%s2585_s0 + $0x138] sm:$0xf0]  ;;  %v1558_v18 = vor.u32 %v1953_v7, %v1555_v9 }
  0xbe   :  { %v1958_v11 = vld [vmem:[%s2585_s0 + $0x134] sm:$0xf0]  ;;  %v1566_v23 = vor.u32 %v1954_v12, %v1563_v13  ;;  %v1627_v7 = vld [vmem:[%s2585_s0 + $0x1b8] sm:$0xf0] }
  0xbf   :  { %v1562_v22 = vor.u32 %v1958_v11, %v1561_v10 }
  0xc2   :  { %v1039_v24 = vpop.f32.mrf.mxu2  ;;  %v944_v29 = vpop.f32.mrf.mxu0 }
  0xc3   :  { %v1088_v25 = vpop.f32.mrf.mxu3  ;;  %v1040_v28 = vadd.f32 %v1039_v24, %v991_v14  ;;  %v993_v30 = vpop.f32.mrf.mxu1 }
  0xc4   :  { %v994_v33 = vadd.f32 %v993_v30, %v944_v29 }
  0xc5   :  { %v2372_v34 = vadd.f32 %v1088_v25, %v1040_v28  ;;  %1139 = vmatmul.bf16.gmra.mxu0 %v1490_v26 }
  0xc6   :  { %1188 = vmatmul.bf16.gmra.mxu1 %v1494_v27 }
  0xc7   :  { %1237 = vmatmul.bf16.gmra.mxu2 %v1498_v31 }
  0xc8   :  { %1286 = vmatmul.bf16.gmra.mxu3 %v1502_v32 }
  0xca   :  { %v1042_v35 = vpop.f32.mrf.mxu2  ;;  %v946_v38 = vpop.f32.mrf.mxu0 }
  0xcb   :  { %v1091_v36 = vpop.f32.mrf.mxu3  ;;  %v1043_v37 = vadd.f32 %v1042_v35, %v994_v33  ;;  %v995_v39 = vpop.f32.mrf.mxu1  ;;  %v1585_v33 = vld [vmem:[%s2585_s0 + $0x150] sm:$0xf] }
  0xcc   :  { %v996_v40 = vadd.f32 %v995_v39, %v946_v38  ;;  %v1965_v35 = vld [vmem:[%s2585_s0 + $0x16c] sm:$0xf0]  ;;  %v1593_v38 = vld [vmem:[%s2585_s0 + $0x158] sm:$0xf] }
  0xcd   :  { %v2374_v41 = vadd.f32 %v1091_v36, %v1043_v37  ;;  %v1961_v36 = vld [vmem:[%s2585_s0 + $0x154] sm:$0xf]  ;;  %v1966_v39 = vld [vmem:[%s2585_s0 + $0x174] sm:$0xf0]  ;;  %v1586_v45 = vor.u32 %v1965_v35, %v1585_v33 }
  0xce   :  { %v1587_v37 = vld [vmem:[%s2585_s0 + $0x170] sm:$0xf0]  ;;  %v1657_v35 = vld [vmem:[%s2585_s0 + $0x1d8] sm:$0xf] }
  0xcf   :  { %v1590_v46 = vor.u32 %v1961_v36, %v1587_v37  ;;  %v1651_v33 = vld [vmem:[%s2585_s0 + $0x1f0] sm:$0xf0]  ;;  %v1982_v36 = vld [vmem:[%s2585_s0 + $0x1f4] sm:$0xf0]  ;;  %v1978_v37 = vld [vmem:[%s2585_s0 + $0x1dc] sm:$0xf] }
  0xd2   :  { %v1044_v50 = vpop.f32.mrf.mxu2  ;;  %v949_v56 = vpop.f32.mrf.mxu0 }
  0xd3   :  { %v1093_v51 = vpop.f32.mrf.mxu3  ;;  %v1045_v55 = vadd.f32 %v1044_v50, %v996_v40  ;;  %v998_v57 = vpop.f32.mrf.mxu1  ;;  %v1962_v40 = vld [vmem:[%s2585_s0 + $0x15c] sm:$0xf]  ;;  %v1594_v50 = vor.u32 %v1966_v39, %v1593_v38 }
  0xd4   :  { %v999_v60 = vadd.f32 %v998_v57, %v949_v56  ;;  %v1659_v38 = vld [vmem:[%s2585_s0 + $0x1f8] sm:$0xf0] }
  0xd5   :  { %v2400_v61 = vadd.f32 %v1093_v51, %v1045_v55  ;;  %1144 = vmatmul.bf16.gmra.mxu0 %v1522_v52  ;;  %v1598_v51 = vor.u32 %v1962_v40, %v1595_v42 }
  0xd6   :  { %1193 = vmatmul.bf16.gmra.mxu1 %v1526_v54 }
  0xd7   :  { %1242 = vmatmul.bf16.gmra.mxu2 %v1530_v58 }
  0xd8   :  { %1291 = vmatmul.bf16.gmra.mxu3 %v1534_v59 }
  0xda   :  { %v1047_v62 = vpop.f32.mrf.mxu2  ;;  %v951_v1 = vpop.f32.mrf.mxu0 }
  0xdb   :  { %v1096_v63 = vpop.f32.mrf.mxu3  ;;  %v1048_v0 = vadd.f32 %v1047_v62, %v999_v60  ;;  %v1000_v2 = vpop.f32.mrf.mxu1 }
  0xdc   :  { %v1001_v3 = vadd.f32 %v1000_v2, %v951_v1  ;;  %v1969_v1 = vld [vmem:[%s2585_s0 + $0x194] sm:$0xf] }
  0xdd   :  { %v2402_v4 = vadd.f32 %v1096_v63, %v1048_v0  ;;  %v1617_v63 = vld [vmem:[%s2585_s0 + $0x190] sm:$0xf]  ;;  %v1619_v2 = vld [vmem:[%s2585_s0 + $0x1b0] sm:$0xf0] }
  0xde   :  { %v1973_v0 = vld [vmem:[%s2585_s0 + $0x1ac] sm:$0xf0]  ;;  %v1622_v12 = vor.u32 %v1969_v1, %v1619_v2 }
  0xdf   :  { %v1618_v11 = vor.u32 %v1973_v0, %v1617_v63 }
  0xe2   :  { %v1049_v14 = vpop.f32.mrf.mxu2  ;;  %v954_v20 = vpop.f32.mrf.mxu0 }
  0xe3   :  { %v1098_v16 = vpop.f32.mrf.mxu3  ;;  %v1050_v19 = vadd.f32 %v1049_v14, %v1001_v3  ;;  %v1003_v21 = vpop.f32.mrf.mxu1  ;;  %v1625_v3 = vld [vmem:[%s2585_s0 + $0x198] sm:$0xf] }
  0xe4   :  { %v1004_v24 = vadd.f32 %v1003_v21, %v954_v20 }
  0xe5   :  { %v2428_v25 = vadd.f32 %v1098_v16, %v1050_v19  ;;  %1149 = vmatmul.bf16.gmra.mxu0 %v1554_v17  ;;  %v1626_v17 = vor.u32 %v1974_v5, %v1625_v3 }
  0xe6   :  { %1198 = vmatmul.bf16.gmra.mxu1 %v1558_v18  ;;  %v1630_v18 = vor.u32 %v1970_v6, %v1627_v7 }
  0xe7   :  { %1247 = vmatmul.bf16.gmra.mxu2 %v1562_v22 }
  0xe8   :  { %1296 = vmatmul.bf16.gmra.mxu3 %v1566_v23 }
  0xea   :  { %v1052_v26 = vpop.f32.mrf.mxu2  ;;  %v956_v29 = vpop.f32.mrf.mxu0 }
  0xeb   :  { %v1101_v27 = vpop.f32.mrf.mxu3  ;;  %v1053_v28 = vadd.f32 %v1052_v26, %v1004_v24  ;;  %v1005_v30 = vpop.f32.mrf.mxu1 }
  0xec   :  { %v1006_v31 = vadd.f32 %v1005_v30, %v956_v29  ;;  %v1649_v29 = vld [vmem:[%s2585_s0 + $0x1d0] sm:$0xf] }
  0xed   :  { %v2430_v32 = vadd.f32 %v1101_v27, %v1053_v28  ;;  %v1981_v30 = vld [vmem:[%s2585_s0 + $0x1ec] sm:$0xf0] }
  0xee   :  { %v1650_v42 = vor.u32 %v1981_v30, %v1649_v29 }
  0xf2   :  { %v1054_v43 = vpop.f32.mrf.mxu2  ;;  %v959_v48 = vpop.f32.mrf.mxu0 }
  0xf3   :  { %v1103_v44 = vpop.f32.mrf.mxu3  ;;  %v1055_v47 = vadd.f32 %v1054_v43, %v1006_v31  ;;  %v1008_v49 = vpop.f32.mrf.mxu1  ;;  %v1977_v31 = vld [vmem:[%s2585_s0 + $0x1d4] sm:$0xf] }
  0xf4   :  { %v1009_v52 = vadd.f32 %v1008_v49, %v959_v48  ;;  %v1654_v43 = vor.u32 %v1977_v31, %v1651_v33  ;;  %v1662_v48 = vor.u32 %v1978_v37, %v1659_v38 }
  0xf5   :  { %v2456_v54 = vadd.f32 %v1103_v44, %v1055_v47  ;;  %1154 = vmatmul.bf16.gmra.mxu0 %v1586_v45  ;;  %v1658_v47 = vor.u32 %v1982_v36, %v1657_v35 }
  0xf6   :  { %1203 = vmatmul.bf16.gmra.mxu1 %v1590_v46 }
  0xf7   :  { %1252 = vmatmul.bf16.gmra.mxu2 %v1594_v50 }
  0xf8   :  { %1301 = vmatmul.bf16.gmra.mxu3 %v1598_v51 }
  0xfa   :  { %v1057_v55 = vpop.f32.mrf.mxu2  ;;  %v961_v58 = vpop.f32.mrf.mxu0 }
  0xfb   :  { %v1106_v56 = vpop.f32.mrf.mxu3  ;;  %v1058_v57 = vadd.f32 %v1057_v55, %v1009_v52  ;;  %v1010_v59 = vpop.f32.mrf.mxu1 }
  0xfc   :  { %v1011_v60 = vadd.f32 %v1010_v59, %v961_v58 }
  0xfd   :  { %v2458_v62 = vadd.f32 %v1106_v56, %v1058_v57 }
 0x102   :  { %v1059_v9 = vpop.f32.mrf.mxu2  ;;  %v964_v14 = vpop.f32.mrf.mxu0 }
 0x103   :  { %v1108_v10 = vpop.f32.mrf.mxu3  ;;  %v1060_v13 = vadd.f32 %v1059_v9, %v1011_v60  ;;  %v1013_v16 = vpop.f32.mrf.mxu1 }
 0x104   :  { %v1014_v19 = vadd.f32 %v1013_v16, %v964_v14 }
 0x105   :  { %v2484_v20 = vadd.f32 %v1108_v10, %v1060_v13  ;;  %1159 = vmatmul.bf16.gmra.mxu0 %v1618_v11 }
 0x106   :  { %1208 = vmatmul.bf16.gmra.mxu1 %v1622_v12 }
 0x107   :  { %1257 = vmatmul.bf16.gmra.mxu2 %v1626_v17 }
 0x108   :  { %1306 = vmatmul.bf16.gmra.mxu3 %v1630_v18 }
 0x10a   :  { %v1062_v21 = vpop.f32.mrf.mxu2  ;;  %v966_v24 = vpop.f32.mrf.mxu0 }
 0x10b   :  { %v1111_v22 = vpop.f32.mrf.mxu3  ;;  %v1063_v23 = vadd.f32 %v1062_v21, %v1014_v19  ;;  %v1015_v26 = vpop.f32.mrf.mxu1 }
 0x10c   :  { %v1016_v27 = vadd.f32 %v1015_v26, %v966_v24 }
 0x10d   :  { %v2486_v28 = vadd.f32 %v1111_v22, %v1063_v23 }
 0x112   :  { %v1064_v39 = vpop.f32.mrf.mxu2  ;;  %v969_v45 = vpop.f32.mrf.mxu0 }
 0x113   :  { %v1113_v40 = vpop.f32.mrf.mxu3  ;;  %v1065_v44 = vadd.f32 %v1064_v39, %v1016_v27  ;;  %v1018_v46 = vpop.f32.mrf.mxu1 }
 0x114   :  { %v1019_v49 = vadd.f32 %v1018_v46, %v969_v45 }
 0x115   :  { %v2512_v50 = vadd.f32 %v1113_v40, %v1065_v44  ;;  %1164 = vmatmul.bf16.gmra.mxu0 %v1650_v42 }
 0x116   :  { %1213 = vmatmul.bf16.gmra.mxu1 %v1654_v43 }
 0x117   :  { %1262 = vmatmul.bf16.gmra.mxu2 %v1658_v47 }
 0x118   :  { %1311 = vmatmul.bf16.gmra.mxu3 %v1662_v48 }
 0x11a   :  { %v1067_v51 = vpop.f32.mrf.mxu2  ;;  %v971_v56 = vpop.f32.mrf.mxu0 }
 0x11b   :  { %v1116_v52 = vpop.f32.mrf.mxu3  ;;  %v1068_v55 = vadd.f32 %v1067_v51, %v1019_v49  ;;  %v1020_v57 = vpop.f32.mrf.mxu1 }
 0x11c   :  { %v1021_v58 = vadd.f32 %v1020_v57, %v971_v56 }
 0x11d   :  { %v2514_v59 = vadd.f32 %v1116_v52, %v1068_v55 }
 0x122   :  { %v1069_v60 = vpop.f32.mrf.mxu2  ;;  %v1130_v1 = vpop.f32.mrf.mxu0 }
 0x123   :  { %v1118_v63 = vpop.f32.mrf.mxu3  ;;  %v1070_v0 = vadd.f32 %v1069_v60, %v1021_v58  ;;  %v1179_v2 = vpop.f32.mrf.mxu1  ;;  %v1131_v5 = vadd.f32 %v1130_v1, %v2318_v53 }
 0x125   :  { %v2516_v3 = vadd.f32 %v1118_v63, %v1070_v0  ;;  %v1180_v6 = vadd.f32 %v1179_v2, %v1131_v5 }
 0x12a   :  { %v1228_v7 = vpop.f32.mrf.mxu2  ;;  %v1132_v11 = vpop.f32.mrf.mxu0 }
 0x12b   :  { %v1277_v9 = vpop.f32.mrf.mxu3  ;;  %v1229_v10 = vadd.f32 %v1228_v7, %v1180_v6  ;;  %v1181_v12 = vpop.f32.mrf.mxu1  ;;  %v1133_v14 = vadd.f32 %v1132_v11, %v2344_v8 }
 0x12d   :  { %v1278_v13 = vadd.f32 %v1277_v9, %v1229_v10  ;;  %v1182_v16 = vadd.f32 %v1181_v12, %v1133_v14 }
 0x12f   :  { %1317 = vst [vmem:[%s2587_s2] sm:$0xff] %v1278_v13  ;;  %v1354_v24 = vmul.f32 %v1278_v13, %v1278_v13 }
 0x132   :  { %v1230_v17 = vpop.f32.mrf.mxu2  ;;  %v1135_v21 = vpop.f32.mrf.mxu0 }
 0x133   :  { %v1279_v18 = vpop.f32.mrf.mxu3  ;;  %v1231_v19 = vadd.f32 %v1230_v17, %v1182_v16  ;;  %v1184_v22 = vpop.f32.mrf.mxu1  ;;  %v1136_v23 = vadd.f32 %v1135_v21, %v2346_v15 }
 0x135   :  { %v1280_v53 = vadd.f32 %v1279_v18, %v1231_v19  ;;  %v1185_v29 = vadd.f32 %v1184_v22, %v1136_v23 }
 0x137   :  { %1318 = vst [vmem:[%s2587_s2 + $0x8] sm:$0xff] %v1280_v53  ;;  %v1333_v26 = vadd.f32 %v1280_v53, %v1278_v13  ;;  %v1355_v8 = vmul.f32 %v1280_v53, %v1280_v53 }
 0x139   :  { %v1370_v27 = vadd.f32 %v1355_v8, %v1354_v24 }
 0x13a   :  { %v1233_v30 = vpop.f32.mrf.mxu2  ;;  %v1137_v35 = vpop.f32.mrf.mxu0 }
 0x13b   :  { %v1282_v31 = vpop.f32.mrf.mxu3  ;;  %v1234_v33 = vadd.f32 %v1233_v30, %v1185_v29  ;;  %v1186_v36 = vpop.f32.mrf.mxu1  ;;  %v1138_v38 = vadd.f32 %v1137_v35, %v2372_v34 }
 0x13d   :  { %v1283_v37 = vadd.f32 %v1282_v31, %v1234_v33  ;;  %v1187_v42 = vadd.f32 %v1186_v36, %v1138_v38 }
 0x13f   :  { %1319 = vst [vmem:[%s2587_s2 + $0x10] sm:$0xff] %v1283_v37  ;;  %v1334_v15 = vadd.f32 %v1333_v26, %v1283_v37  ;;  %v1356_v39 = vmul.f32 %v1283_v37, %v1283_v37 }
 0x141   :  { %v1371_v40 = vadd.f32 %v1370_v27, %v1356_v39 }
 0x142   :  { %v1235_v43 = vpop.f32.mrf.mxu2  ;;  %v1140_v46 = vpop.f32.mrf.mxu0 }
 0x143   :  { %v1284_v44 = vpop.f32.mrf.mxu3  ;;  %v1236_v45 = vadd.f32 %v1235_v43, %v1187_v42  ;;  %v1189_v47 = vpop.f32.mrf.mxu1  ;;  %v1141_v49 = vadd.f32 %v1140_v46, %v2374_v41 }
 0x145   :  { %v1285_v48 = vadd.f32 %v1284_v44, %v1236_v45  ;;  %v1190_v55 = vadd.f32 %v1189_v47, %v1141_v49 }
 0x147   :  { %1320 = vst [vmem:[%s2587_s2 + $0x18] sm:$0xff] %v1285_v48  ;;  %v1335_v34 = vadd.f32 %v1334_v15, %v1285_v48  ;;  %v1357_v51 = vmul.f32 %v1285_v48, %v1285_v48 }
 0x149   :  { %v1372_v52 = vadd.f32 %v1371_v40, %v1357_v51 }
 0x14a   :  { %v1238_v56 = vpop.f32.mrf.mxu2  ;;  %v1142_v60 = vpop.f32.mrf.mxu0 }
 0x14b   :  { %v1287_v57 = vpop.f32.mrf.mxu3  ;;  %v1239_v58 = vadd.f32 %v1238_v56, %v1190_v55  ;;  %v1191_v63 = vpop.f32.mrf.mxu1  ;;  %v1143_v1 = vadd.f32 %v1142_v60, %v2400_v61 }
 0x14d   :  { %v1288_v0 = vadd.f32 %v1287_v57, %v1239_v58  ;;  %v1192_v6 = vadd.f32 %v1191_v63, %v1143_v1 }
 0x14f   :  { %1321 = vst [vmem:[%s2587_s2 + $0x20] sm:$0xff] %v1288_v0  ;;  %v1336_v41 = vadd.f32 %v1335_v34, %v1288_v0  ;;  %v1358_v2 = vmul.f32 %v1288_v0, %v1288_v0 }
 0x151   :  { %v1373_v5 = vadd.f32 %v1372_v52, %v1358_v2 }
 0x152   :  { %v1240_v7 = vpop.f32.mrf.mxu2  ;;  %v1145_v11 = vpop.f32.mrf.mxu0 }
 0x153   :  { %v1289_v9 = vpop.f32.mrf.mxu3  ;;  %v1241_v10 = vadd.f32 %v1240_v7, %v1192_v6  ;;  %v1194_v12 = vpop.f32.mrf.mxu1  ;;  %v1146_v14 = vadd.f32 %v1145_v11, %v2402_v4 }
 0x155   :  { %v1290_v13 = vadd.f32 %v1289_v9, %v1241_v10  ;;  %v1195_v18 = vadd.f32 %v1194_v12, %v1146_v14 }
 0x157   :  { %1322 = vst [vmem:[%s2587_s2 + $0x28] sm:$0xff] %v1290_v13  ;;  %v1337_v61 = vadd.f32 %v1336_v41, %v1290_v13  ;;  %v1359_v16 = vmul.f32 %v1290_v13, %v1290_v13 }
 0x159   :  { %v1374_v17 = vadd.f32 %v1373_v5, %v1359_v16 }
 0x15a   :  { %v1243_v19 = vpop.f32.mrf.mxu2  ;;  %v1147_v53 = vpop.f32.mrf.mxu0 }
 0x15b   :  { %v1292_v21 = vpop.f32.mrf.mxu3  ;;  %v1244_v22 = vadd.f32 %v1243_v19, %v1195_v18  ;;  %v1196_v23 = vpop.f32.mrf.mxu1  ;;  %v1148_v26 = vadd.f32 %v1147_v53, %v2428_v25 }
 0x15d   :  { %v1293_v24 = vadd.f32 %v1292_v21, %v1244_v22  ;;  %v1197_v29 = vadd.f32 %v1196_v23, %v1148_v26 }
 0x15f   :  { %1323 = vst [vmem:[%s2587_s2 + $0x30] sm:$0xff] %v1293_v24  ;;  %v1338_v4 = vadd.f32 %v1337_v61, %v1293_v24  ;;  %v1360_v8 = vmul.f32 %v1293_v24, %v1293_v24 }
 0x161   :  { %v1375_v27 = vadd.f32 %v1374_v17, %v1360_v8 }
 0x162   :  { %v1245_v30 = vpop.f32.mrf.mxu2  ;;  %v1150_v35 = vpop.f32.mrf.mxu0 }
 0x163   :  { %v1294_v31 = vpop.f32.mrf.mxu3  ;;  %v1246_v33 = vadd.f32 %v1245_v30, %v1197_v29  ;;  %v1199_v36 = vpop.f32.mrf.mxu1  ;;  %v1151_v38 = vadd.f32 %v1150_v35, %v2430_v32 }
 0x165   :  { %v1295_v37 = vadd.f32 %v1294_v31, %v1246_v33  ;;  %v1200_v40 = vadd.f32 %v1199_v36, %v1151_v38 }
 0x167   :  { %1324 = vst [vmem:[%s2587_s2 + $0x38] sm:$0xff] %v1295_v37  ;;  %v1339_v25 = vadd.f32 %v1338_v4, %v1295_v37  ;;  %v1361_v15 = vmul.f32 %v1295_v37, %v1295_v37 }
 0x169   :  { %v1376_v39 = vadd.f32 %v1375_v27, %v1361_v15 }
 0x16a   :  { %v1248_v42 = vpop.f32.mrf.mxu2  ;;  %v1152_v45 = vpop.f32.mrf.mxu0 }
 0x16b   :  { %v1297_v43 = vpop.f32.mrf.mxu3  ;;  %v1249_v44 = vadd.f32 %v1248_v42, %v1200_v40  ;;  %v1201_v46 = vpop.f32.mrf.mxu1  ;;  %v1153_v48 = vadd.f32 %v1152_v45, %v2456_v54 }
 0x16d   :  { %v1298_v47 = vadd.f32 %v1297_v43, %v1249_v44  ;;  %v1202_v51 = vadd.f32 %v1201_v46, %v1153_v48 }
 0x16f   :  { %1325 = vst [vmem:[%s2587_s2 + $0x40] sm:$0xff] %v1298_v47  ;;  %v1340_v32 = vadd.f32 %v1339_v25, %v1298_v47  ;;  %v1362_v49 = vmul.f32 %v1298_v47, %v1298_v47 }
 0x171   :  { %v1377_v34 = vadd.f32 %v1376_v39, %v1362_v49 }
 0x172   :  { %v1250_v52 = vpop.f32.mrf.mxu2  ;;  %v1155_v57 = vpop.f32.mrf.mxu0 }
 0x173   :  { %v1299_v55 = vpop.f32.mrf.mxu3  ;;  %v1251_v56 = vadd.f32 %v1250_v52, %v1202_v51  ;;  %v1204_v58 = vpop.f32.mrf.mxu1  ;;  %v1156_v63 = vadd.f32 %v1155_v57, %v2458_v62 }
 0x175   :  { %v1300_v60 = vadd.f32 %v1299_v55, %v1251_v56  ;;  %v1205_v41 = vadd.f32 %v1204_v58, %v1156_v63 }
 0x177   :  { %1326 = vst [vmem:[%s2587_s2 + $0x48] sm:$0xff] %v1300_v60  ;;  %v1341_v54 = vadd.f32 %v1340_v32, %v1300_v60  ;;  %v1363_v0 = vmul.f32 %v1300_v60, %v1300_v60 }
 0x179   :  { %v1378_v1 = vadd.f32 %v1377_v34, %v1363_v0 }
 0x17a   :  { %v1253_v2 = vpop.f32.mrf.mxu2  ;;  %v1157_v7 = vpop.f32.mrf.mxu0 }
 0x17b   :  { %v1302_v5 = vpop.f32.mrf.mxu3  ;;  %v1254_v6 = vadd.f32 %v1253_v2, %v1205_v41  ;;  %v1206_v9 = vpop.f32.mrf.mxu1  ;;  %v1158_v11 = vadd.f32 %v1157_v7, %v2484_v20 }
 0x17d   :  { %v1303_v10 = vadd.f32 %v1302_v5, %v1254_v6  ;;  %v1207_v14 = vadd.f32 %v1206_v9, %v1158_v11  ;;  %v1391_v5 = vlaneseq }
 0x17f   :  { %1327 = vst [vmem:[%s2587_s2 + $0x50] sm:$0xff] %v1303_v10  ;;  %v1342_v62 = vadd.f32 %v1341_v54, %v1303_v10  ;;  %v1364_v12 = vmul.f32 %v1303_v10, %v1303_v10  ;;  %v1392_v11 = vshrl.u32 %v1391_v5, 7 }
 0x181   :  { %v1379_v13 = vadd.f32 %v1378_v1, %v1364_v12  ;;  %vm1394_vm0 = vcmp.eq.s32.totalorder %v1392_v11, 1  ;;  %vm1393_vm1 = vcmp.eq.s32.totalorder %v1392_v11, 0 }
 0x182   :  { %v1255_v61 = vpop.f32.mrf.mxu2  ;;  %v1160_v18 = vpop.f32.mrf.mxu0 }
 0x183   :  { %v1304_v16 = vpop.f32.mrf.mxu3  ;;  %v1256_v17 = vadd.f32 %v1255_v61, %v1207_v14  ;;  %v1209_v19 = vpop.f32.mrf.mxu1  ;;  %v1161_v22 = vadd.f32 %v1160_v18, %v2486_v28 }
 0x185   :  { %v1305_v21 = vadd.f32 %v1304_v16, %v1256_v17  ;;  %v1210_v24 = vadd.f32 %v1209_v19, %v1161_v22 }
 0x187   :  { %1328 = vst [vmem:[%s2587_s2 + $0x58] sm:$0xff] %v1305_v21  ;;  %v1343_v20 = vadd.f32 %v1342_v62, %v1305_v21  ;;  %v1365_v53 = vmul.f32 %v1305_v21, %v1305_v21 }
 0x189   :  { %v1380_v23 = vadd.f32 %v1379_v13, %v1365_v53 }
 0x18a   :  { %v1258_v26 = vpop.f32.mrf.mxu2  ;;  %v1162_v27 = vpop.f32.mrf.mxu0 }
 0x18b   :  { %v1307_v4 = vpop.f32.mrf.mxu3  ;;  %v1259_v8 = vadd.f32 %v1258_v26, %v1210_v24  ;;  %v1211_v29 = vpop.f32.mrf.mxu1  ;;  %v1163_v31 = vadd.f32 %v1162_v27, %v2512_v50 }
 0x18d   :  { %v1308_v30 = vadd.f32 %v1307_v4, %v1259_v8  ;;  %v1212_v36 = vadd.f32 %v1211_v29, %v1163_v31 }
 0x18f   :  { %1329 = vst [vmem:[%s2587_s2 + $0x60] sm:$0xff] %v1308_v30  ;;  %v1344_v28 = vadd.f32 %v1343_v20, %v1308_v30  ;;  %v1366_v33 = vmul.f32 %v1308_v30, %v1308_v30 }
 0x191   :  { %v1381_v35 = vadd.f32 %v1380_v23, %v1366_v33 }
 0x192   :  { %v1260_v37 = vpop.f32.mrf.mxu2  ;;  %v1165_v15 = vpop.f32.mrf.mxu0 }
 0x193   :  { %v1309_v38 = vpop.f32.mrf.mxu3  ;;  %v1261_v25 = vadd.f32 %v1260_v37, %v1212_v36  ;;  %v1166_v40 = vadd.f32 %v1165_v15, %v2514_v59  ;;  %v1214_v42 = vpop.f32.mrf.mxu1 }
 0x195   :  { %v1310_v39 = vadd.f32 %v1309_v38, %v1261_v25  ;;  %v1215_v45 = vadd.f32 %v1214_v42, %v1166_v40 }
 0x197   :  { %1330 = vst [vmem:[%s2587_s2 + $0x68] sm:$0xff] %v1310_v39  ;;  %v1345_v50 = vadd.f32 %v1344_v28, %v1310_v39  ;;  %v1367_v43 = vmul.f32 %v1310_v39, %v1310_v39 }
 0x199   :  { %v1382_v44 = vadd.f32 %v1381_v35, %v1367_v43 }
 0x19a   :  { %v1263_v46 = vpop.f32.mrf.mxu2  ;;  %v1167_v32 = vpop.f32.mrf.mxu0 }
 0x19b   :  { %v1312_v47 = vpop.f32.mrf.mxu3  ;;  %v1264_v48 = vadd.f32 %v1263_v46, %v1215_v45  ;;  %v1168_v34 = vadd.f32 %v1167_v32, %v2516_v3  ;;  %v1216_v52 = vpop.f32.mrf.mxu1 }
 0x19d   :  { %v1313_v49 = vadd.f32 %v1312_v47, %v1264_v48  ;;  %v1217_v56 = vadd.f32 %v1216_v52, %v1168_v34 }
 0x19f   :  { %1331 = vst [vmem:[%s2587_s2 + $0x70] sm:$0xff] %v1313_v49  ;;  %v1346_v59 = vadd.f32 %v1345_v50, %v1313_v49  ;;  %v1368_v51 = vmul.f32 %v1313_v49, %v1313_v49 }
 0x1a1   :  { %v1383_v55 = vadd.f32 %v1382_v44, %v1368_v51 }
 0x1a2   :  { %v1265_v57 = vpop.f32.mrf.mxu2 }
 0x1a3   :  { %v1266_v58 = vadd.f32 %v1265_v57, %v1217_v56  ;;  %v1314_v60 = vpop.f32.mrf.mxu3 }
 0x1a5   :  { %v1315_v63 = vadd.f32 %v1314_v60, %v1266_v58 }
 0x1a7   :  { %1332 = vst [vmem:[%s2587_s2 + $0x78] sm:$0xff] %v1315_v63  ;;  %v1347_v54 = vadd.f32 %v1346_v59, %v1315_v63  ;;  %v1369_v0 = vmul.f32 %v1315_v63, %v1315_v63 }
 0x1a9   :  { %v1348_v3 = vrot.slane %v1347_v54, 4  ;;  %v1384_v1 = vadd.f32 %v1383_v55, %v1369_v0 }
 0x1ab   :  { %v1349_v41 = vadd.f32 %v1348_v3, %v1347_v54  ;;  %v1385_v2 = vrot.slane %v1384_v1, 4 }
 0x1ad   :  { %v1350_v6 = vrot.slane %v1349_v41, 2  ;;  %v1386_v7 = vadd.f32 %v1385_v2, %v1384_v1 }
 0x1af   :  { %v1351_v9 = vadd.f32 %v1350_v6, %v1349_v41  ;;  %v1387_v10 = vrot.slane %v1386_v7, 2 }
 0x1b1   :  { %v1388_v62 = vadd.f32 %v1387_v10, %v1386_v7  ;;  %v1352_v12 = vrot.slane %v1351_v9, 1 }
 0x1b3   :  { %v1389_v13 = vrot.slane %v1388_v62, 1  ;;  %v1353_v61 = vadd.f32 %v1352_v12, %v1351_v9 }
 0x1b5   :  { %v1390_v14 = vadd.f32 %v1389_v13, %v1388_v62 }
 0x1b7   :  { %v1395_v16 = vsel %vm1394_vm0, %v1390_v14, 0.0 }
 0x1b8   :  { %v1396_v17 = vsel %vm1393_vm1, %v1353_v61, %v1395_v16 }
 0x1b9   :  { %1397 = vst [vmem:[%s2588_s3] sm:$0xff] %v1396_v17 }
 0x1ba   :  { %1406 = vsyncpa [#allocation3], 1 }

// kernel: forward.12
= control target key start
LH: loop header
LB: loop body
LE: loop exit
PB: predicated region body
PF: predicated region fallthrough
CT: control target
= control target key end

     0   :  { %s1049_s0 = inlined_call_operand.vmem [shape: f32[512,128], index: 0, kind: input, shape index: {}]   ;;  %s1050_s1 = inlined_call_operand.vmem [shape: f32[1,128], index: 1, kind: input, shape index: {}]   ;;  %s1051_s2 = inlined_call_operand.vmem [shape: f32[1,128], index: 2, kind: input, shape index: {}]   ;;  %s1052_s3 = inlined_call_operand.vmem [shape: bf16[512,128], index: 3, kind: output, shape index: {}]  }
   0x1   :  { %v14_v0 = vld [vmem:[%s1049_s0] sm:$0xff]  ;;  %v15_v1 = vld [vmem:[%s1049_s0 + $0x8] sm:$0xff]  ;;  %v16_v4 = vld [vmem:[%s1049_s0 + $0x10] sm:$0xff] }
   0x2   :  { %v632_v2 = vld [vmem:[%s1050_s1] ss:$0 sm:$0xff]  ;;  %v17_v5 = vld [vmem:[%s1049_s0 + $0x18] sm:$0xff]  ;;  %v19_v11 = vld [vmem:[%s1049_s0 + $0x28] sm:$0xff] }
   0x3   :  { %v637_v3 = vld [vmem:[%s1051_s2] ss:$0 sm:$0xff]  ;;  %v82_v7 = vmul.f32 %v632_v2, %v14_v0  ;;  %v83_v8 = vmul.f32 %v632_v2, %v15_v1  ;;  %v84_v9 = vmul.f32 %v632_v2, %v16_v4  ;;  %v85_v10 = vmul.f32 %v632_v2, %v17_v5  ;;  %v20_v12 = vld [vmem:[%s1049_s0 + $0x30] sm:$0xff]  ;;  %v21_v13 = vld [vmem:[%s1049_s0 + $0x38] sm:$0xff] }
   0x4   :  { %v18_v6 = vld [vmem:[%s1049_s0 + $0x20] sm:$0xff]  ;;  %v87_v15 = vmul.f32 %v632_v2, %v19_v11  ;;  %v88_v16 = vmul.f32 %v632_v2, %v20_v12  ;;  %v89_v17 = vmul.f32 %v632_v2, %v21_v13  ;;  %v23_v27 = vld [vmem:[%s1049_s0 + $0x48] sm:$0xff]  ;;  %v24_v32 = vld [vmem:[%s1049_s0 + $0x50] sm:$0xff] }
   0x5   :  { %v86_v14 = vmul.f32 %v632_v2, %v18_v6  ;;  %v150_v18 = vadd.f32 %v637_v3, %v82_v7  ;;  %v151_v19 = vadd.f32 %v637_v3, %v83_v8  ;;  %v152_v20 = vadd.f32 %v637_v3, %v84_v9  ;;  %v22_v26 = vld [vmem:[%s1049_s0 + $0x40] sm:$0xff]  ;;  %v25_v33 = vld [vmem:[%s1049_s0 + $0x58] sm:$0xff]  ;;  %v27_v39 = vld [vmem:[%s1049_s0 + $0x68] sm:$0xff] }
   0x6   :  { %v153_v21 = vadd.f32 %v637_v3, %v85_v10  ;;  %v155_v23 = vadd.f32 %v637_v3, %v87_v15  ;;  %v156_v24 = vadd.f32 %v637_v3, %v88_v16  ;;  %v157_v25 = vadd.f32 %v637_v3, %v89_v17  ;;  %v26_v38 = vld [vmem:[%s1049_s0 + $0x60] sm:$0xff]  ;;  %v28_v44 = vld [vmem:[%s1049_s0 + $0x70] sm:$0xff]  ;;  %v29_v45 = vld [vmem:[%s1049_s0 + $0x78] sm:$0xff] }
   0x7   :  { %v154_v22 = vadd.f32 %v637_v3, %v86_v14  ;;  %v214_v28 = vmax.f32 %v150_v18, 0.0  ;;  %v215_v29 = vmax.f32 %v151_v19, 0.0  ;;  %v216_v30 = vmax.f32 %v152_v20, 0.0  ;;  %v30_v58 = vld [vmem:[%s1049_s0 + $0x80] sm:$0xff]  ;;  %v31_v63 = vld [vmem:[%s1049_s0 + $0x88] sm:$0xff]  ;;  %v32_v6 = vld [vmem:[%s1049_s0 + $0x90] sm:$0xff] }
   0x8   :  { %v217_v31 = vmax.f32 %v153_v21, 0.0  ;;  %v219_v35 = vmax.f32 %v155_v23, 0.0  ;;  %v220_v36 = vmax.f32 %v156_v24, 0.0  ;;  %v221_v37 = vmax.f32 %v157_v25, 0.0  ;;  %v33_v7 = vld [vmem:[%s1049_s0 + $0x98] sm:$0xff]  ;;  %v34_v12 = vld [vmem:[%s1049_s0 + $0xa0] sm:$0xff] }
   0x9   :  { %v218_v34 = vmax.f32 %v154_v22, 0.0  ;;  %v413_v40 = vpack.c.bf16 %v215_v29, %v214_v28  ;;  %v90_v42 = vmul.f32 %v632_v2, %v22_v26  ;;  %v91_v43 = vmul.f32 %v632_v2, %v23_v27  ;;  %v35_v13 = vld [vmem:[%s1049_s0 + $0xa8] sm:$0xff]  ;;  %v36_v18 = vld [vmem:[%s1049_s0 + $0xb0] sm:$0xff]  ;;  %v37_v23 = vld [vmem:[%s1049_s0 + $0xb8] sm:$0xff] }
   0xa   :  { %v418_v41 = vpack.c.bf16 %v217_v31, %v216_v30  ;;  %v428_v47 = vpack.c.bf16 %v221_v37, %v220_v36  ;;  %v92_v48 = vmul.f32 %v632_v2, %v24_v32  ;;  %v93_v49 = vmul.f32 %v632_v2, %v25_v33  ;;  %v38_v28 = vld [vmem:[%s1049_s0 + $0xc0] sm:$0xff]  ;;  %v39_v37 = vld [vmem:[%s1049_s0 + $0xc8] sm:$0xff] }
   0xb   :  { %v423_v46 = vpack.c.bf16 %v219_v35, %v218_v34  ;;  %414 = vst [vmem:[%s1052_s3] sm:$0xff] %v413_v40   ;;  %v158_v50 = vadd.f32 %v637_v3, %v90_v42  ;;  %v159_v51 = vadd.f32 %v637_v3, %v91_v43  ;;  %v94_v52 = vmul.f32 %v632_v2, %v26_v38  ;;  %v40_v42 = vld [vmem:[%s1049_s0 + $0xd0] sm:$0xff]  ;;  %v41_v43 = vld [vmem:[%s1049_s0 + $0xd8] sm:$0xff] }
   0xc   :  { %v95_v53 = vmul.f32 %v632_v2, %v27_v39  ;;  %570 = vst [vmem:[%s1052_s3 + $0x8] sm:$0xff] %v418_v41   ;;  %v160_v54 = vadd.f32 %v637_v3, %v92_v48  ;;  %v161_v55 = vadd.f32 %v637_v3, %v93_v49  ;;  %v96_v56 = vmul.f32 %v632_v2, %v28_v44  ;;  %v42_v48 = vld [vmem:[%s1049_s0 + $0xe0] sm:$0xff]  ;;  %v43_v49 = vld [vmem:[%s1049_s0 + $0xe8] sm:$0xff] }
   0xd   :  { %v97_v57 = vmul.f32 %v632_v2, %v29_v45  ;;  %571 = vst [vmem:[%s1052_s3 + $0x10] sm:$0xff] %v423_v46   ;;  %v222_v59 = vmax.f32 %v158_v50, 0.0  ;;  %v223_v60 = vmax.f32 %v159_v51, 0.0  ;;  %v162_v61 = vadd.f32 %v637_v3, %v94_v52 }
   0xe   :  { %v163_v62 = vadd.f32 %v637_v3, %v95_v53  ;;  %572 = vst [vmem:[%s1052_s3 + $0x18] sm:$0xff] %v428_v47   ;;  %v224_v0 = vmax.f32 %v160_v54, 0.0  ;;  %v225_v1 = vmax.f32 %v161_v55, 0.0  ;;  %v164_v4 = vadd.f32 %v637_v3, %v96_v56  ;;  %v44_v54 = vld [vmem:[%s1049_s0 + $0xf0] sm:$0xff] }
   0xf   :  { %v165_v5 = vadd.f32 %v637_v3, %v97_v57  ;;  %v433_v8 = vpack.c.bf16 %v223_v60, %v222_v59  ;;  %v226_v9 = vmax.f32 %v162_v61, 0.0  ;;  %v98_v11 = vmul.f32 %v632_v2, %v30_v58  ;;  %v45_v59 = vld [vmem:[%s1049_s0 + $0xf8] sm:$0xff] }
  0x10   :  { %v227_v10 = vmax.f32 %v163_v62, 0.0  ;;  %v438_v14 = vpack.c.bf16 %v225_v1, %v224_v0  ;;  %v228_v15 = vmax.f32 %v164_v4, 0.0  ;;  %v99_v17 = vmul.f32 %v632_v2, %v31_v63  ;;  %v46_v0 = vld [vmem:[%s1049_s0 + $0x100] sm:$0xff] }
  0x11   :  { %v229_v16 = vmax.f32 %v165_v5, 0.0  ;;  %573 = vst [vmem:[%s1052_s3 + $0x20] sm:$0xff] %v433_v8   ;;  %v166_v20 = vadd.f32 %v637_v3, %v98_v11  ;;  %v100_v21 = vmul.f32 %v632_v2, %v32_v6  ;;  %v101_v22 = vmul.f32 %v632_v2, %v33_v7  ;;  %v47_v11 = vld [vmem:[%s1049_s0 + $0x108] sm:$0xff] }
  0x12   :  { %v443_v19 = vpack.c.bf16 %v227_v10, %v226_v9  ;;  %574 = vst [vmem:[%s1052_s3 + $0x28] sm:$0xff] %v438_v14   ;;  %v167_v25 = vadd.f32 %v637_v3, %v99_v17  ;;  %v102_v26 = vmul.f32 %v632_v2, %v34_v12  ;;  %v103_v27 = vmul.f32 %v632_v2, %v35_v13  ;;  %v49_v17 = vld [vmem:[%s1049_s0 + $0x118] sm:$0xff] }
  0x13   :  { %v448_v24 = vpack.c.bf16 %v229_v16, %v228_v15  ;;  %v230_v29 = vmax.f32 %v166_v20, 0.0  ;;  %v168_v30 = vadd.f32 %v637_v3, %v100_v21  ;;  %v169_v31 = vadd.f32 %v637_v3, %v101_v22  ;;  %v48_v16 = vld [vmem:[%s1049_s0 + $0x110] sm:$0xff]  ;;  %v50_v22 = vld [vmem:[%s1049_s0 + $0x120] sm:$0xff] }
  0x14   :  { %575 = vst [vmem:[%s1052_s3 + $0x30] sm:$0xff] %v443_v19   ;;  %v104_v32 = vmul.f32 %v632_v2, %v36_v18  ;;  %v231_v33 = vmax.f32 %v167_v25, 0.0  ;;  %v170_v34 = vadd.f32 %v637_v3, %v102_v26  ;;  %v171_v35 = vadd.f32 %v637_v3, %v103_v27 }
  0x15   :  { %576 = vst [vmem:[%s1052_s3 + $0x38] sm:$0xff] %v448_v24   ;;  %v105_v36 = vmul.f32 %v632_v2, %v37_v23  ;;  %v232_v38 = vmax.f32 %v168_v30, 0.0  ;;  %v233_v39 = vmax.f32 %v169_v31, 0.0  ;;  %v106_v41 = vmul.f32 %v632_v2, %v38_v28  ;;  %v51_v23 = vld [vmem:[%s1049_s0 + $0x128] sm:$0xff]  ;;  %v52_v28 = vld [vmem:[%s1049_s0 + $0x130] sm:$0xff] }
  0x16   :  { %v172_v40 = vadd.f32 %v637_v3, %v104_v32  ;;  %v453_v44 = vpack.c.bf16 %v231_v33, %v230_v29  ;;  %v234_v45 = vmax.f32 %v170_v34, 0.0  ;;  %v235_v46 = vmax.f32 %v171_v35, 0.0  ;;  %v53_v33 = vld [vmem:[%s1049_s0 + $0x138] sm:$0xff] }
  0x17   :  { %v173_v47 = vadd.f32 %v637_v3, %v105_v36  ;;  %v458_v50 = vpack.c.bf16 %v233_v39, %v232_v38  ;;  %v107_v52 = vmul.f32 %v632_v2, %v39_v37  ;;  %v174_v53 = vadd.f32 %v637_v3, %v106_v41  ;;  %v54_v38 = vld [vmem:[%s1049_s0 + $0x140] sm:$0xff] }
  0x18   :  { %v236_v51 = vmax.f32 %v172_v40, 0.0  ;;  %577 = vst [vmem:[%s1052_s3 + $0x40] sm:$0xff] %v453_v44   ;;  %v463_v55 = vpack.c.bf16 %v235_v46, %v234_v45  ;;  %v108_v57 = vmul.f32 %v632_v2, %v40_v42  ;;  %v109_v58 = vmul.f32 %v632_v2, %v41_v43 }
  0x19   :  { %v237_v56 = vmax.f32 %v173_v47, 0.0  ;;  %578 = vst [vmem:[%s1052_s3 + $0x48] sm:$0xff] %v458_v50   ;;  %v175_v60 = vadd.f32 %v637_v3, %v107_v52  ;;  %v238_v61 = vmax.f32 %v174_v53, 0.0  ;;  %v110_v62 = vmul.f32 %v632_v2, %v42_v48  ;;  %v55_v47 = vld [vmem:[%s1049_s0 + $0x148] sm:$0xff]  ;;  %v56_v52 = vld [vmem:[%s1049_s0 + $0x150] sm:$0xff]  ;;  %v57_v53 = vld [vmem:[%s1049_s0 + $0x158] sm:$0xff] }
  0x1a   :  { %v111_v63 = vmul.f32 %v632_v2, %v43_v49  ;;  %579 = vst [vmem:[%s1052_s3 + $0x50] sm:$0xff] %v463_v55   ;;  %v176_v4 = vadd.f32 %v637_v3, %v108_v57  ;;  %v177_v5 = vadd.f32 %v637_v3, %v109_v58  ;;  %v112_v6 = vmul.f32 %v632_v2, %v44_v54  ;;  %v58_v58 = vld [vmem:[%s1049_s0 + $0x160] sm:$0xff] }
  0x1b   :  { %v468_v1 = vpack.c.bf16 %v237_v56, %v236_v51  ;;  %v239_v7 = vmax.f32 %v175_v60, 0.0  ;;  %v178_v8 = vadd.f32 %v637_v3, %v110_v62  ;;  %v113_v10 = vmul.f32 %v632_v2, %v45_v59  ;;  %v59_v59 = vld [vmem:[%s1049_s0 + $0x168] sm:$0xff] }
  0x1c   :  { %v179_v9 = vadd.f32 %v637_v3, %v111_v63  ;;  %v240_v12 = vmax.f32 %v176_v4, 0.0  ;;  %v241_v13 = vmax.f32 %v177_v5, 0.0  ;;  %v180_v14 = vadd.f32 %v637_v3, %v112_v6 }
  0x1d   :  { %580 = vst [vmem:[%s1052_s3 + $0x58] sm:$0xff] %v468_v1   ;;  %v114_v15 = vmul.f32 %v632_v2, %v46_v0  ;;  %v473_v18 = vpack.c.bf16 %v239_v7, %v238_v61  ;;  %v242_v19 = vmax.f32 %v178_v8, 0.0  ;;  %v181_v21 = vadd.f32 %v637_v3, %v113_v10  ;;  %v60_v0 = vld [vmem:[%s1049_s0 + $0x170] sm:$0xff]  ;;  %v61_v7 = vld [vmem:[%s1049_s0 + $0x178] sm:$0xff] }
  0x1e   :  { %v243_v20 = vmax.f32 %v179_v9, 0.0  ;;  %v478_v24 = vpack.c.bf16 %v241_v13, %v240_v12  ;;  %v244_v25 = vmax.f32 %v180_v14, 0.0  ;;  %v115_v26 = vmul.f32 %v632_v2, %v47_v11  ;;  %v62_v12 = vld [vmem:[%s1049_s0 + $0x180] sm:$0xff] }
  0x1f   :  { %v182_v27 = vadd.f32 %v637_v3, %v114_v15  ;;  %581 = vst [vmem:[%s1052_s3 + $0x60] sm:$0xff] %v473_v18   ;;  %v245_v30 = vmax.f32 %v181_v21, 0.0  ;;  %v116_v31 = vmul.f32 %v632_v2, %v48_v16  ;;  %v117_v32 = vmul.f32 %v632_v2, %v49_v17  ;;  %v63_v21 = vld [vmem:[%s1049_s0 + $0x188] sm:$0xff] }
  0x20   :  { %v483_v29 = vpack.c.bf16 %v243_v20, %v242_v19  ;;  %582 = vst [vmem:[%s1052_s3 + $0x68] sm:$0xff] %v478_v24   ;;  %v183_v34 = vadd.f32 %v637_v3, %v115_v26  ;;  %v118_v36 = vmul.f32 %v632_v2, %v50_v22  ;;  %v119_v37 = vmul.f32 %v632_v2, %v51_v23  ;;  %v64_v26 = vld [vmem:[%s1049_s0 + $0x190] sm:$0xff] }
  0x21   :  { %v246_v35 = vmax.f32 %v182_v27, 0.0  ;;  %v488_v39 = vpack.c.bf16 %v245_v30, %v244_v25  ;;  %v184_v40 = vadd.f32 %v637_v3, %v116_v31  ;;  %v185_v41 = vadd.f32 %v637_v3, %v117_v32  ;;  %v65_v27 = vld [vmem:[%s1049_s0 + $0x198] sm:$0xff]  ;;  %v66_v32 = vld [vmem:[%s1049_s0 + $0x1a0] sm:$0xff] }
  0x22   :  { %583 = vst [vmem:[%s1052_s3 + $0x70] sm:$0xff] %v483_v29   ;;  %v120_v42 = vmul.f32 %v632_v2, %v52_v28  ;;  %v247_v43 = vmax.f32 %v183_v34, 0.0  ;;  %v186_v44 = vadd.f32 %v637_v3, %v118_v36  ;;  %v187_v45 = vadd.f32 %v637_v3, %v119_v37 }
  0x23   :  { %v121_v46 = vmul.f32 %v632_v2, %v53_v33  ;;  %584 = vst [vmem:[%s1052_s3 + $0x78] sm:$0xff] %v488_v39   ;;  %v248_v48 = vmax.f32 %v184_v40, 0.0  ;;  %v249_v49 = vmax.f32 %v185_v41, 0.0  ;;  %v122_v51 = vmul.f32 %v632_v2, %v54_v38  ;;  %v67_v33 = vld [vmem:[%s1049_s0 + $0x1a8] sm:$0xff]  ;;  %v68_v38 = vld [vmem:[%s1049_s0 + $0x1b0] sm:$0xff] }
  0x24   :  { %v188_v50 = vadd.f32 %v637_v3, %v120_v42  ;;  %v493_v54 = vpack.c.bf16 %v247_v43, %v246_v35  ;;  %v250_v55 = vmax.f32 %v186_v44, 0.0  ;;  %v251_v56 = vmax.f32 %v187_v45, 0.0  ;;  %v69_v43 = vld [vmem:[%s1049_s0 + $0x1b8] sm:$0xff] }
  0x25   :  { %v189_v57 = vadd.f32 %v637_v3, %v121_v46  ;;  %v498_v60 = vpack.c.bf16 %v249_v49, %v248_v48  ;;  %v123_v62 = vmul.f32 %v632_v2, %v55_v47  ;;  %v190_v63 = vadd.f32 %v637_v3, %v122_v51  ;;  %v70_v48 = vld [vmem:[%s1049_s0 + $0x1c0] sm:$0xff] }
  0x26   :  { %v252_v61 = vmax.f32 %v188_v50, 0.0  ;;  %585 = vst [vmem:[%s1052_s3 + $0x80] sm:$0xff] %v493_v54   ;;  %v503_v1 = vpack.c.bf16 %v251_v56, %v250_v55  ;;  %v124_v5 = vmul.f32 %v632_v2, %v56_v52  ;;  %v125_v6 = vmul.f32 %v632_v2, %v57_v53 }
  0x27   :  { %v253_v4 = vmax.f32 %v189_v57, 0.0  ;;  %586 = vst [vmem:[%s1052_s3 + $0x88] sm:$0xff] %v498_v60   ;;  %v191_v8 = vadd.f32 %v637_v3, %v123_v62  ;;  %v254_v9 = vmax.f32 %v190_v63, 0.0  ;;  %v126_v10 = vmul.f32 %v632_v2, %v58_v58  ;;  %v71_v57 = vld [vmem:[%s1049_s0 + $0x1c8] sm:$0xff]  ;;  %v72_v62 = vld [vmem:[%s1049_s0 + $0x1d0] sm:$0xff]  ;;  %v73_v63 = vld [vmem:[%s1049_s0 + $0x1d8] sm:$0xff] }
  0x28   :  { %v127_v11 = vmul.f32 %v632_v2, %v59_v59  ;;  %587 = vst [vmem:[%s1052_s3 + $0x90] sm:$0xff] %v503_v1   ;;  %v192_v14 = vadd.f32 %v637_v3, %v124_v5  ;;  %v193_v15 = vadd.f32 %v637_v3, %v125_v6  ;;  %v128_v16 = vmul.f32 %v632_v2, %v60_v0  ;;  %v74_v6 = vld [vmem:[%s1049_s0 + $0x1e0] sm:$0xff] }
  0x29   :  { %v508_v13 = vpack.c.bf16 %v253_v4, %v252_v61  ;;  %v255_v17 = vmax.f32 %v191_v8, 0.0  ;;  %v194_v18 = vadd.f32 %v637_v3, %v126_v10  ;;  %v129_v20 = vmul.f32 %v632_v2, %v61_v7  ;;  %v75_v7 = vld [vmem:[%s1049_s0 + $0x1e8] sm:$0xff] }
  0x2a   :  { %v195_v19 = vadd.f32 %v637_v3, %v127_v11  ;;  %v256_v22 = vmax.f32 %v192_v14, 0.0  ;;  %v257_v23 = vmax.f32 %v193_v15, 0.0  ;;  %v196_v24 = vadd.f32 %v637_v3, %v128_v16 }
  0x2b   :  { %588 = vst [vmem:[%s1052_s3 + $0x98] sm:$0xff] %v508_v13   ;;  %v130_v25 = vmul.f32 %v632_v2, %v62_v12  ;;  %v513_v28 = vpack.c.bf16 %v255_v17, %v254_v9  ;;  %v258_v29 = vmax.f32 %v194_v18, 0.0  ;;  %v197_v31 = vadd.f32 %v637_v3, %v129_v20  ;;  %v76_v12 = vld [vmem:[%s1049_s0 + $0x1f0] sm:$0xff]  ;;  %v77_v17 = vld [vmem:[%s1049_s0 + $0x1f8] sm:$0xff] }
  0x2c   :  { %v259_v30 = vmax.f32 %v195_v19, 0.0  ;;  %v518_v34 = vpack.c.bf16 %v257_v23, %v256_v22  ;;  %v260_v35 = vmax.f32 %v196_v24, 0.0  ;;  %v131_v36 = vmul.f32 %v632_v2, %v63_v21 }
  0x2d   :  { %v198_v37 = vadd.f32 %v637_v3, %v130_v25  ;;  %589 = vst [vmem:[%s1052_s3 + $0xa0] sm:$0xff] %v513_v28   ;;  %v261_v40 = vmax.f32 %v197_v31, 0.0  ;;  %v132_v41 = vmul.f32 %v632_v2, %v64_v26  ;;  %v133_v42 = vmul.f32 %v632_v2, %v65_v27 }
  0x2e   :  { %v523_v39 = vpack.c.bf16 %v259_v30, %v258_v29  ;;  %590 = vst [vmem:[%s1052_s3 + $0xa8] sm:$0xff] %v518_v34   ;;  %v199_v44 = vadd.f32 %v637_v3, %v131_v36  ;;  %v134_v46 = vmul.f32 %v632_v2, %v66_v32  ;;  %v135_v47 = vmul.f32 %v632_v2, %v67_v33 }
  0x2f   :  { %v262_v45 = vmax.f32 %v198_v37, 0.0  ;;  %v528_v49 = vpack.c.bf16 %v261_v40, %v260_v35  ;;  %v200_v50 = vadd.f32 %v637_v3, %v132_v41  ;;  %v201_v51 = vadd.f32 %v637_v3, %v133_v42 }
  0x30   :  { %591 = vst [vmem:[%s1052_s3 + $0xb0] sm:$0xff] %v523_v39   ;;  %v136_v52 = vmul.f32 %v632_v2, %v68_v38  ;;  %v263_v53 = vmax.f32 %v199_v44, 0.0  ;;  %v202_v54 = vadd.f32 %v637_v3, %v134_v46  ;;  %v203_v55 = vadd.f32 %v637_v3, %v135_v47 }
  0x31   :  { %v137_v56 = vmul.f32 %v632_v2, %v69_v43  ;;  %592 = vst [vmem:[%s1052_s3 + $0xb8] sm:$0xff] %v528_v49   ;;  %v264_v58 = vmax.f32 %v200_v50, 0.0  ;;  %v265_v59 = vmax.f32 %v201_v51, 0.0  ;;  %v138_v61 = vmul.f32 %v632_v2, %v70_v48 }
  0x32   :  { %v204_v60 = vadd.f32 %v637_v3, %v136_v52  ;;  %v533_v0 = vpack.c.bf16 %v263_v53, %v262_v45  ;;  %v266_v1 = vmax.f32 %v202_v54, 0.0  ;;  %v267_v4 = vmax.f32 %v203_v55, 0.0 }
  0x33   :  { %v205_v5 = vadd.f32 %v637_v3, %v137_v56  ;;  %v538_v8 = vpack.c.bf16 %v265_v59, %v264_v58  ;;  %v139_v10 = vmul.f32 %v632_v2, %v71_v57  ;;  %v206_v11 = vadd.f32 %v637_v3, %v138_v61 }
  0x34   :  { %v268_v9 = vmax.f32 %v204_v60, 0.0  ;;  %593 = vst [vmem:[%s1052_s3 + $0xc0] sm:$0xff] %v533_v0   ;;  %v543_v13 = vpack.c.bf16 %v267_v4, %v266_v1  ;;  %v140_v15 = vmul.f32 %v632_v2, %v72_v62  ;;  %v141_v16 = vmul.f32 %v632_v2, %v73_v63 }
  0x35   :  { %v269_v14 = vmax.f32 %v205_v5, 0.0  ;;  %594 = vst [vmem:[%s1052_s3 + $0xc8] sm:$0xff] %v538_v8   ;;  %v207_v18 = vadd.f32 %v637_v3, %v139_v10  ;;  %v270_v19 = vmax.f32 %v206_v11, 0.0  ;;  %v142_v20 = vmul.f32 %v632_v2, %v74_v6 }
  0x36   :  { %v143_v21 = vmul.f32 %v632_v2, %v75_v7  ;;  %595 = vst [vmem:[%s1052_s3 + $0xd0] sm:$0xff] %v543_v13   ;;  %v208_v23 = vadd.f32 %v637_v3, %v140_v15  ;;  %v209_v24 = vadd.f32 %v637_v3, %v141_v16  ;;  %v144_v25 = vmul.f32 %v632_v2, %v76_v12 }
  0x37   :  { %v548_v22 = vpack.c.bf16 %v269_v14, %v268_v9  ;;  %v271_v26 = vmax.f32 %v207_v18, 0.0  ;;  %v210_v27 = vadd.f32 %v637_v3, %v142_v20  ;;  %v145_v29 = vmul.f32 %v632_v2, %v77_v17 }
  0x38   :  { %v211_v28 = vadd.f32 %v637_v3, %v143_v21  ;;  %v272_v30 = vmax.f32 %v208_v23, 0.0  ;;  %v273_v31 = vmax.f32 %v209_v24, 0.0  ;;  %v212_v32 = vadd.f32 %v637_v3, %v144_v25 }
  0x39   :  { %596 = vst [vmem:[%s1052_s3 + $0xd8] sm:$0xff] %v548_v22   ;;  %v553_v33 = vpack.c.bf16 %v271_v26, %v270_v19  ;;  %v274_v34 = vmax.f32 %v210_v27, 0.0  ;;  %v213_v36 = vadd.f32 %v637_v3, %v145_v29 }
  0x3a   :  { %v275_v35 = vmax.f32 %v211_v28, 0.0  ;;  %v558_v37 = vpack.c.bf16 %v273_v31, %v272_v30  ;;  %v276_v38 = vmax.f32 %v212_v32, 0.0 }
  0x3b   :  { %597 = vst [vmem:[%s1052_s3 + $0xe0] sm:$0xff] %v553_v33   ;;  %v277_v39 = vmax.f32 %v213_v36, 0.0 }
  0x3c   :  { %v563_v2 = vpack.c.bf16 %v275_v35, %v274_v34  ;;  %598 = vst [vmem:[%s1052_s3 + $0xe8] sm:$0xff] %v558_v37  }
  0x3d   :  { %v568_v40 = vpack.c.bf16 %v277_v39, %v276_v38 }
  0x3e   :  { %599 = vst [vmem:[%s1052_s3 + $0xf0] sm:$0xff] %v563_v2  }
  0x3f   :  { %600 = vst [vmem:[%s1052_s3 + $0xf8] sm:$0xff] %v568_v40  }

// kernel: forward.11
= control target key start
LH: loop header
LB: loop body
LE: loop exit
PB: predicated region body
PF: predicated region fallthrough
CT: control target
= control target key end

     0   :  { %s3879_s1 = inlined_call_operand.vmem [shape: bf16[512,128], index: 1, kind: input, shape index: {}]   ;;  %s3880_s0 = inlined_call_operand.vmem [shape: bf16[512,512], index: 0, kind: input, shape index: {}]   ;;  %s3881_s2 = inlined_call_operand.vmem [shape: f32[512,128], index: 2, kind: output, shape index: {0}]   ;;  %s3882_s3 = inlined_call_operand.vmem [shape: f32[8,128], index: 3, kind: output, shape index: {1}]  }
   0x1   :  { %v2769_v0 = vld [vmem:[%s3879_s1 + $0x38] sm:$0xff]  ;;  %v2768_v4 = vld [vmem:[%s3879_s1 + $0x30] sm:$0xff]  ;;  %v2767_v8 = vld [vmem:[%s3879_s1 + $0x28] sm:$0xff] }
   0x2   :  { %v2777_v1 = vld [vmem:[%s3879_s1 + $0x78] sm:$0xff]  ;;  %1037 = vmatpush.bf16.msra.mxu0 %v2769_v0  ;;  %v2776_v5 = vld [vmem:[%s3879_s1 + $0x70] sm:$0xff]  ;;  %v2775_v9 = vld [vmem:[%s3879_s1 + $0x68] sm:$0xff] }
   0x3   :  { %v2785_v2 = vld [vmem:[%s3879_s1 + $0xb8] sm:$0xff]  ;;  %1206 = vmatpush.bf16.msra.mxu1 %v2777_v1  ;;  %v2784_v6 = vld [vmem:[%s3879_s1 + $0xb0] sm:$0xff]  ;;  %v2783_v10 = vld [vmem:[%s3879_s1 + $0xa8] sm:$0xff] }
   0x4   :  { %v2793_v3 = vld [vmem:[%s3879_s1 + $0xf8] sm:$0xff]  ;;  %1375 = vmatpush.bf16.msra.mxu2 %v2785_v2  ;;  %v2792_v7 = vld [vmem:[%s3879_s1 + $0xf0] sm:$0xff]  ;;  %v2791_v11 = vld [vmem:[%s3879_s1 + $0xe8] sm:$0xff] }
   0x5   :  { %1544 = vmatpush.bf16.msra.mxu3 %v2793_v3  ;;  %v2766_v12 = vld [vmem:[%s3879_s1 + $0x20] sm:$0xff]  ;;  %v2765_v16 = vld [vmem:[%s3879_s1 + $0x18] sm:$0xff]  ;;  %v2764_v20 = vld [vmem:[%s3879_s1 + $0x10] sm:$0xff] }
   0x6   :  { %1038 = vmatpush.bf16.msra.mxu0 %v2768_v4  ;;  %v2774_v13 = vld [vmem:[%s3879_s1 + $0x60] sm:$0xff]  ;;  %v2773_v17 = vld [vmem:[%s3879_s1 + $0x58] sm:$0xff]  ;;  %v2772_v21 = vld [vmem:[%s3879_s1 + $0x50] sm:$0xff] }
   0x7   :  { %1207 = vmatpush.bf16.msra.mxu1 %v2776_v5  ;;  %v2782_v14 = vld [vmem:[%s3879_s1 + $0xa0] sm:$0xff]  ;;  %v2781_v18 = vld [vmem:[%s3879_s1 + $0x98] sm:$0xff]  ;;  %v2780_v22 = vld [vmem:[%s3879_s1 + $0x90] sm:$0xff] }
   0x8   :  { %1376 = vmatpush.bf16.msra.mxu2 %v2784_v6  ;;  %v2790_v15 = vld [vmem:[%s3879_s1 + $0xe0] sm:$0xff]  ;;  %v2789_v19 = vld [vmem:[%s3879_s1 + $0xd8] sm:$0xff]  ;;  %v2788_v23 = vld [vmem:[%s3879_s1 + $0xd0] sm:$0xff] }
   0x9   :  { %1545 = vmatpush.bf16.msra.mxu3 %v2792_v7  ;;  %v2763_v24 = vld [vmem:[%s3879_s1 + $0x8] sm:$0xff]  ;;  %v2762_v28 = vld [vmem:[%s3879_s1] sm:$0xff]  ;;  %v2636_v33 = vld [vmem:[%s3880_s0 + $0xc] sm:$0xf0] }
   0xa   :  { %1039 = vmatpush.bf16.msra.mxu0 %v2767_v8  ;;  %v2771_v25 = vld [vmem:[%s3879_s1 + $0x48] sm:$0xff]  ;;  %v2770_v29 = vld [vmem:[%s3879_s1 + $0x40] sm:$0xff]  ;;  %v1998_v35 = vld [vmem:[%s3880_s0 + $0x10] sm:$0xf0] }
   0xb   :  { %1208 = vmatpush.bf16.msra.mxu1 %v2775_v9  ;;  %v2779_v26 = vld [vmem:[%s3879_s1 + $0x88] sm:$0xff]  ;;  %v2778_v30 = vld [vmem:[%s3879_s1 + $0x80] sm:$0xff]  ;;  %v2637_v37 = vld [vmem:[%s3880_s0 + $0x14] sm:$0xf0] }
   0xc   :  { %1377 = vmatpush.bf16.msra.mxu2 %v2783_v10  ;;  %v2787_v27 = vld [vmem:[%s3879_s1 + $0xc8] sm:$0xff]  ;;  %v2786_v31 = vld [vmem:[%s3879_s1 + $0xc0] sm:$0xff]  ;;  %v2006_v39 = vld [vmem:[%s3880_s0 + $0x18] sm:$0xf0] }
   0xd   :  { %1546 = vmatpush.bf16.msra.mxu3 %v2791_v11  ;;  %v1996_v32 = vld [vmem:[%s3880_s0] sm:$0xf]  ;;  %v2634_v34 = vld [vmem:[%s3880_s0 + $0x4] sm:$0xf]  ;;  %v2004_v36 = vld [vmem:[%s3880_s0 + $0x8] sm:$0xf] }
   0xe   :  { %1040 = vmatpush.bf16.msra.mxu0 %v2766_v12  ;;  %v2635_v38 = vld [vmem:[%s3880_s0 + $0xc] sm:$0xf]  ;;  %v1997_v40 = vor.u32 %v2636_v33, %v1996_v32  ;;  %v2001_v41 = vor.u32 %v2634_v34, %v1998_v35  ;;  %v2005_v42 = vor.u32 %v2637_v37, %v2004_v36  ;;  %v2012_v44 = vld [vmem:[%s3880_s0 + $0x20] sm:$0xf]  ;;  %v2640_v45 = vld [vmem:[%s3880_s0 + $0x2c] sm:$0xf0] }
   0xf   :  { %1209 = vmatpush.bf16.msra.mxu1 %v2774_v13  ;;  %v2009_v43 = vor.u32 %v2635_v38, %v2006_v39  ;;  %v2638_v46 = vld [vmem:[%s3880_s0 + $0x24] sm:$0xf]  ;;  %v2014_v47 = vld [vmem:[%s3880_s0 + $0x30] sm:$0xf0]  ;;  %v2020_v48 = vld [vmem:[%s3880_s0 + $0x28] sm:$0xf]  ;;  %v2013_v52 = vor.u32 %v2640_v45, %v2012_v44 }
  0x10   :  { %1378 = vmatpush.bf16.msra.mxu2 %v2782_v14  ;;  %v2641_v49 = vld [vmem:[%s3880_s0 + $0x34] sm:$0xf0]  ;;  %v2639_v50 = vld [vmem:[%s3880_s0 + $0x2c] sm:$0xf]  ;;  %v2022_v51 = vld [vmem:[%s3880_s0 + $0x38] sm:$0xf0]  ;;  %v2017_v53 = vor.u32 %v2638_v46, %v2014_v47 }
  0x11   :  { %1547 = vmatpush.bf16.msra.mxu3 %v2790_v15  ;;  %v2021_v54 = vor.u32 %v2641_v49, %v2020_v48  ;;  %v2025_v55 = vor.u32 %v2639_v50, %v2022_v51  ;;  %v2028_v56 = vld [vmem:[%s3880_s0 + $0x40] sm:$0xf]  ;;  %v2644_v57 = vld [vmem:[%s3880_s0 + $0x4c] sm:$0xf0]  ;;  %v2642_v58 = vld [vmem:[%s3880_s0 + $0x44] sm:$0xf] }
  0x12   :  { %1041 = vmatpush.bf16.msra.mxu0 %v2765_v16  ;;  %v2030_v59 = vld [vmem:[%s3880_s0 + $0x50] sm:$0xf0]  ;;  %v2036_v60 = vld [vmem:[%s3880_s0 + $0x48] sm:$0xf]  ;;  %v2645_v61 = vld [vmem:[%s3880_s0 + $0x54] sm:$0xf0]  ;;  %v2029_v0 = vor.u32 %v2644_v57, %v2028_v56 }
  0x13   :  { %1210 = vmatpush.bf16.msra.mxu1 %v2773_v17  ;;  %v2643_v62 = vld [vmem:[%s3880_s0 + $0x4c] sm:$0xf]  ;;  %v2038_v63 = vld [vmem:[%s3880_s0 + $0x58] sm:$0xf0]  ;;  %v2033_v1 = vor.u32 %v2642_v58, %v2030_v59  ;;  %v2037_v2 = vor.u32 %v2645_v61, %v2036_v60  ;;  %v2044_v4 = vld [vmem:[%s3880_s0 + $0x60] sm:$0xf] }
  0x14   :  { %1379 = vmatpush.bf16.msra.mxu2 %v2781_v18  ;;  %v2041_v3 = vor.u32 %v2643_v62, %v2038_v63  ;;  %v2648_v5 = vld [vmem:[%s3880_s0 + $0x6c] sm:$0xf0]  ;;  %v2646_v6 = vld [vmem:[%s3880_s0 + $0x64] sm:$0xf]  ;;  %v2046_v7 = vld [vmem:[%s3880_s0 + $0x70] sm:$0xf0] }
  0x15   :  { %1548 = vmatpush.bf16.msra.mxu3 %v2789_v19  ;;  %v2052_v8 = vld [vmem:[%s3880_s0 + $0x68] sm:$0xf]  ;;  %v2649_v9 = vld [vmem:[%s3880_s0 + $0x74] sm:$0xf0]  ;;  %v2647_v10 = vld [vmem:[%s3880_s0 + $0x6c] sm:$0xf]  ;;  %v2045_v12 = vor.u32 %v2648_v5, %v2044_v4  ;;  %v2049_v13 = vor.u32 %v2646_v6, %v2046_v7 }
  0x16   :  { %1042 = vmatpush.bf16.msra.mxu0 %v2764_v20  ;;  %v2054_v11 = vld [vmem:[%s3880_s0 + $0x78] sm:$0xf0]  ;;  %v2053_v14 = vor.u32 %v2649_v9, %v2052_v8  ;;  %v2060_v16 = vld [vmem:[%s3880_s0 + $0x80] sm:$0xf]  ;;  %v2652_v17 = vld [vmem:[%s3880_s0 + $0x8c] sm:$0xf0] }
  0x17   :  { %1211 = vmatpush.bf16.msra.mxu1 %v2772_v21  ;;  %v2057_v15 = vor.u32 %v2647_v10, %v2054_v11  ;;  %v2650_v18 = vld [vmem:[%s3880_s0 + $0x84] sm:$0xf]  ;;  %v2062_v19 = vld [vmem:[%s3880_s0 + $0x90] sm:$0xf0]  ;;  %v2068_v20 = vld [vmem:[%s3880_s0 + $0x88] sm:$0xf] }
  0x18   :  { %1380 = vmatpush.bf16.msra.mxu2 %v2780_v22  ;;  %v2653_v21 = vld [vmem:[%s3880_s0 + $0x94] sm:$0xf0]  ;;  %v2651_v22 = vld [vmem:[%s3880_s0 + $0x8c] sm:$0xf]  ;;  %v2084_v32 = vld [vmem:[%s3880_s0 + $0xa8] sm:$0xf] }
  0x19   :  { %1549 = vmatpush.bf16.msra.mxu3 %v2788_v23  ;;  %v2070_v23 = vld [vmem:[%s3880_s0 + $0x98] sm:$0xf0]  ;;  %v2657_v33 = vld [vmem:[%s3880_s0 + $0xb4] sm:$0xf0]  ;;  %v2655_v34 = vld [vmem:[%s3880_s0 + $0xac] sm:$0xf] }
  0x1a   :  { %1043 = vmatpush.bf16.msra.mxu0 %v2763_v24  ;;  %v2061_v24 = vor.u32 %v2652_v17, %v2060_v16  ;;  %v2086_v35 = vld [vmem:[%s3880_s0 + $0xb8] sm:$0xf0]  ;;  %v2085_v38 = vor.u32 %v2657_v33, %v2084_v32  ;;  %v2100_v44 = vld [vmem:[%s3880_s0 + $0xc8] sm:$0xf]  ;;  %v2661_v45 = vld [vmem:[%s3880_s0 + $0xd4] sm:$0xf0] }
  0x1b   :  { %1212 = vmatpush.bf16.msra.mxu1 %v2771_v25  ;;  %v2065_v25 = vor.u32 %v2650_v18, %v2062_v19  ;;  %v2089_v39 = vor.u32 %v2655_v34, %v2086_v35  ;;  %v2659_v46 = vld [vmem:[%s3880_s0 + $0xcc] sm:$0xf]  ;;  %v2102_v47 = vld [vmem:[%s3880_s0 + $0xd8] sm:$0xf0]  ;;  %v2101_v50 = vor.u32 %v2661_v45, %v2100_v44  ;;  %v2116_v56 = vld [vmem:[%s3880_s0 + $0xe8] sm:$0xf] }
  0x1c   :  { %1381 = vmatpush.bf16.msra.mxu2 %v2779_v26  ;;  %v2069_v26 = vor.u32 %v2653_v21, %v2068_v20  ;;  %v2105_v51 = vor.u32 %v2659_v46, %v2102_v47  ;;  %v2665_v57 = vld [vmem:[%s3880_s0 + $0xf4] sm:$0xf0]  ;;  %v2663_v58 = vld [vmem:[%s3880_s0 + $0xec] sm:$0xf]  ;;  %v2118_v59 = vld [vmem:[%s3880_s0 + $0xf8] sm:$0xf0] }
  0x1d   :  { %1550 = vmatpush.bf16.msra.mxu3 %v2787_v27  ;;  %v2073_v27 = vor.u32 %v2651_v22, %v2070_v23  ;;  %v2117_v62 = vor.u32 %v2665_v57, %v2116_v56  ;;  %v2121_v63 = vor.u32 %v2663_v58, %v2118_v59  ;;  %v2132_v4 = vld [vmem:[%s3880_s0 + $0x108] sm:$0xf]  ;;  %v2669_v5 = vld [vmem:[%s3880_s0 + $0x114] sm:$0xf0]  ;;  %v2667_v6 = vld [vmem:[%s3880_s0 + $0x10c] sm:$0xf] }
  0x1e   :  { %1044 = vmatpush.bf16.msra.mxu0 %v2762_v28  ;;  %v2076_v28 = vld [vmem:[%s3880_s0 + $0xa0] sm:$0xf]  ;;  %v2134_v7 = vld [vmem:[%s3880_s0 + $0x118] sm:$0xf0]  ;;  %v2672_v22 = vld [vmem:[%s3880_s0 + $0x12c] sm:$0xf0] }
  0x1f   :  { %1213 = vmatpush.bf16.msra.mxu1 %v2770_v29  ;;  %v2656_v29 = vld [vmem:[%s3880_s0 + $0xac] sm:$0xf0]  ;;  %v2140_v21 = vld [vmem:[%s3880_s0 + $0x120] sm:$0xf]  ;;  %v2670_v23 = vld [vmem:[%s3880_s0 + $0x124] sm:$0xf] }
  0x20   :  { %1382 = vmatpush.bf16.msra.mxu2 %v2778_v30  ;;  %v2654_v30 = vld [vmem:[%s3880_s0 + $0xa4] sm:$0xf]  ;;  %v2077_v36 = vor.u32 %v2656_v29, %v2076_v28  ;;  %v2150_v28 = vld [vmem:[%s3880_s0 + $0x138] sm:$0xf0]  ;;  %v2141_v32 = vor.u32 %v2672_v22, %v2140_v21  ;;  %v2158_v56 = vld [vmem:[%s3880_s0 + $0x150] sm:$0xf0] }
  0x21   :  { %1551 = vmatpush.bf16.msra.mxu3 %v2786_v31  ;;  %1045 = vmatmul.bf16.vlgmr.msra.gmra.mxu0 %v1997_v40  ;;  %v2078_v31 = vld [vmem:[%s3880_s0 + $0xb0] sm:$0xf0]  ;;  %v2092_v40 = vld [vmem:[%s3880_s0 + $0xc0] sm:$0xf]  ;;  %v2164_v57 = vld [vmem:[%s3880_s0 + $0x148] sm:$0xf] }
  0x22   :  { %1214 = vmatmul.bf16.vlgmr.msra.gmra.mxu1 %v2001_v41  ;;  %v2081_v37 = vor.u32 %v2654_v30, %v2078_v31  ;;  %v2660_v41 = vld [vmem:[%s3880_s0 + $0xcc] sm:$0xf0]  ;;  %v2677_v58 = vld [vmem:[%s3880_s0 + $0x154] sm:$0xf0]  ;;  %v2675_v59 = vld [vmem:[%s3880_s0 + $0x14c] sm:$0xf] }
  0x23   :  { %1383 = vmatmul.bf16.vlgmr.msra.gmra.mxu2 %v2005_v42  ;;  %v2658_v42 = vld [vmem:[%s3880_s0 + $0xc4] sm:$0xf]  ;;  %v2093_v48 = vor.u32 %v2660_v41, %v2092_v40 }
  0x24   :  { %1552 = vmatmul.bf16.vlgmr.msra.gmra.mxu3 %v2009_v43  ;;  %v2094_v43 = vld [vmem:[%s3880_s0 + $0xd0] sm:$0xf0]  ;;  %v2678_v21 = vld [vmem:[%s3880_s0 + $0x164] sm:$0xf] }
  0x25   :  { %v2097_v49 = vor.u32 %v2658_v42, %v2094_v43 }
  0x31   :  { %1050 = vmatmul.bf16.gmra.mxu0 %v2013_v52  ;;  %v2108_v52 = vld [vmem:[%s3880_s0 + $0xe0] sm:$0xf] }
  0x32   :  { %1219 = vmatmul.bf16.gmra.mxu1 %v2017_v53  ;;  %v2664_v53 = vld [vmem:[%s3880_s0 + $0xec] sm:$0xf0] }
  0x33   :  { %1388 = vmatmul.bf16.gmra.mxu2 %v2021_v54  ;;  %v2662_v54 = vld [vmem:[%s3880_s0 + $0xe4] sm:$0xf]  ;;  %v2109_v60 = vor.u32 %v2664_v53, %v2108_v52  ;;  %v2676_v52 = vld [vmem:[%s3880_s0 + $0x14c] sm:$0xf0] }
  0x34   :  { %1557 = vmatmul.bf16.gmra.mxu3 %v2025_v55  ;;  %v2110_v55 = vld [vmem:[%s3880_s0 + $0xf0] sm:$0xf0]  ;;  %v2674_v53 = vld [vmem:[%s3880_s0 + $0x144] sm:$0xf] }
  0x35   :  { %v2113_v61 = vor.u32 %v2662_v54, %v2110_v55 }
  0x41   :  { %1055 = vmatmul.bf16.gmra.mxu0 %v2029_v0  ;;  %v2124_v0 = vld [vmem:[%s3880_s0 + $0x100] sm:$0xf] }
  0x42   :  { %1224 = vmatmul.bf16.gmra.mxu1 %v2033_v1  ;;  %v2668_v1 = vld [vmem:[%s3880_s0 + $0x10c] sm:$0xf0] }
  0x43   :  { %1393 = vmatmul.bf16.gmra.mxu2 %v2037_v2  ;;  %v2666_v2 = vld [vmem:[%s3880_s0 + $0x104] sm:$0xf]  ;;  %v2125_v8 = vor.u32 %v2668_v1, %v2124_v0 }
  0x44   :  { %1562 = vmatmul.bf16.gmra.mxu3 %v2041_v3  ;;  %v2126_v3 = vld [vmem:[%s3880_s0 + $0x110] sm:$0xf0] }
  0x45   :  { %v2129_v9 = vor.u32 %v2666_v2, %v2126_v3  ;;  %v2161_v2 = vor.u32 %v2674_v53, %v2158_v56  ;;  %v2682_v53 = vld [vmem:[%s3880_s0 + $0x184] sm:$0xf]  ;;  %v2190_v56 = vld [vmem:[%s3880_s0 + $0x190] sm:$0xf0] }
  0x51   :  { %1060 = vmatmul.bf16.gmra.mxu0 %v2045_v12  ;;  %v2133_v12 = vor.u32 %v2669_v5, %v2132_v4 }
  0x52   :  { %1229 = vmatmul.bf16.gmra.mxu1 %v2049_v13  ;;  %v2137_v13 = vor.u32 %v2667_v6, %v2134_v7  ;;  %v2165_v6 = vor.u32 %v2677_v58, %v2164_v57  ;;  %v2196_v57 = vld [vmem:[%s3880_s0 + $0x188] sm:$0xf]  ;;  %v2685_v58 = vld [vmem:[%s3880_s0 + $0x194] sm:$0xf0] }
  0x53   :  { %1398 = vmatmul.bf16.gmra.mxu2 %v2053_v14 }
  0x54   :  { %1567 = vmatmul.bf16.gmra.mxu3 %v2057_v15 }
  0x61   :  { %1065 = vmatmul.bf16.gmra.mxu0 %v2061_v24  ;;  %v2142_v24 = vld [vmem:[%s3880_s0 + $0x130] sm:$0xf0] }
  0x62   :  { %1234 = vmatmul.bf16.gmra.mxu1 %v2065_v25  ;;  %v2148_v25 = vld [vmem:[%s3880_s0 + $0x128] sm:$0xf]  ;;  %v2145_v33 = vor.u32 %v2670_v23, %v2142_v24  ;;  %v2174_v24 = vld [vmem:[%s3880_s0 + $0x170] sm:$0xf0] }
  0x63   :  { %1403 = vmatmul.bf16.gmra.mxu2 %v2069_v26  ;;  %v2673_v26 = vld [vmem:[%s3880_s0 + $0x134] sm:$0xf0] }
  0x64   :  { %1572 = vmatmul.bf16.gmra.mxu3 %v2073_v27  ;;  %v2671_v27 = vld [vmem:[%s3880_s0 + $0x12c] sm:$0xf] }
  0x71   :  { %1070 = vmatmul.bf16.gmra.mxu0 %v2077_v36 }
  0x72   :  { %1239 = vmatmul.bf16.gmra.mxu1 %v2081_v37  ;;  %v2149_v37 = vor.u32 %v2673_v26, %v2148_v25  ;;  %v2180_v25 = vld [vmem:[%s3880_s0 + $0x168] sm:$0xf]  ;;  %v2681_v26 = vld [vmem:[%s3880_s0 + $0x174] sm:$0xf0] }
  0x73   :  { %1408 = vmatmul.bf16.gmra.mxu2 %v2085_v38  ;;  %v2153_v38 = vor.u32 %v2671_v27, %v2150_v28  ;;  %v2679_v27 = vld [vmem:[%s3880_s0 + $0x16c] sm:$0xf]  ;;  %v2182_v28 = vld [vmem:[%s3880_s0 + $0x178] sm:$0xf0] }
  0x74   :  { %1577 = vmatmul.bf16.gmra.mxu3 %v2089_v39 }
  0x81   :  { %1075 = vmatmul.bf16.gmra.mxu0 %v2093_v48 }
  0x82   :  { %1244 = vmatmul.bf16.gmra.mxu1 %v2097_v49 }
  0x83   :  { %1413 = vmatmul.bf16.gmra.mxu2 %v2101_v50 }
  0x84   :  { %1582 = vmatmul.bf16.gmra.mxu3 %v2105_v51  ;;  %v2156_v51 = vld [vmem:[%s3880_s0 + $0x140] sm:$0xf] }
  0x85   :  { %v2157_v1 = vor.u32 %v2676_v52, %v2156_v51  ;;  %v2188_v51 = vld [vmem:[%s3880_s0 + $0x180] sm:$0xf]  ;;  %v2684_v52 = vld [vmem:[%s3880_s0 + $0x18c] sm:$0xf0] }
  0x91   :  { %1080 = vmatmul.bf16.gmra.mxu0 %v2109_v60  ;;  %v2166_v60 = vld [vmem:[%s3880_s0 + $0x158] sm:$0xf0] }
  0x92   :  { %1249 = vmatmul.bf16.gmra.mxu1 %v2113_v61  ;;  %v2169_v7 = vor.u32 %v2675_v59, %v2166_v60  ;;  %v2683_v59 = vld [vmem:[%s3880_s0 + $0x18c] sm:$0xf]  ;;  %v2198_v60 = vld [vmem:[%s3880_s0 + $0x198] sm:$0xf0] }
  0x93   :  { %1418 = vmatmul.bf16.gmra.mxu2 %v2117_v62 }
  0x94   :  { %1587 = vmatmul.bf16.gmra.mxu3 %v2121_v63 }
  0x9e   :  { %v1046_v10 = vpop.f32.mrf.mxu0 }
  0x9f   :  { %v1215_v11 = vpop.f32.mrf.mxu1 }
  0xa0   :  { %v1216_v14 = vadd.f32 %v1215_v11, %v1046_v10 }
  0xa1   :  { %1085 = vmatmul.bf16.gmra.mxu0 %v2125_v8 }
  0xa2   :  { %1254 = vmatmul.bf16.gmra.mxu1 %v2129_v9 }
  0xa3   :  { %1423 = vmatmul.bf16.gmra.mxu2 %v2133_v12 }
  0xa4   :  { %1592 = vmatmul.bf16.gmra.mxu3 %v2137_v13 }
  0xa6   :  { %v1384_v15 = vpop.f32.mrf.mxu2  ;;  %v1048_v18 = vpop.f32.mrf.mxu0 }
  0xa7   :  { %v1553_v16 = vpop.f32.mrf.mxu3  ;;  %v1385_v17 = vadd.f32 %v1384_v15, %v1216_v14  ;;  %v1217_v19 = vpop.f32.mrf.mxu1 }
  0xa8   :  { %v1218_v29 = vadd.f32 %v1217_v19, %v1048_v18  ;;  %v2172_v19 = vld [vmem:[%s3880_s0 + $0x160] sm:$0xf] }
  0xa9   :  { %v1554_v20 = vadd.f32 %v1553_v16, %v1385_v17 }
  0xab   :  { %1713 = vst [vmem:[%s3881_s2] sm:$0xff] %v1554_v20  ;;  %v1846_v40 = vmul.f32 %v1554_v20, %v1554_v20 }
  0xae   :  { %v1386_v30 = vpop.f32.mrf.mxu2  ;;  %v1051_v35 = vpop.f32.mrf.mxu0 }
  0xaf   :  { %v1555_v31 = vpop.f32.mrf.mxu3  ;;  %v1387_v34 = vadd.f32 %v1386_v30, %v1218_v29  ;;  %v1220_v36 = vpop.f32.mrf.mxu1 }
  0xb0   :  { %v1221_v43 = vadd.f32 %v1220_v36, %v1051_v35 }
  0xb1   :  { %v1556_v39 = vadd.f32 %v1555_v31, %v1387_v34  ;;  %1090 = vmatmul.bf16.gmra.mxu0 %v2141_v32  ;;  %v2177_v34 = vor.u32 %v2678_v21, %v2174_v24  ;;  %v2686_v21 = vld [vmem:[%s3880_s0 + $0x1a4] sm:$0xf]  ;;  %v2206_v24 = vld [vmem:[%s3880_s0 + $0x1b0] sm:$0xf0] }
  0xb2   :  { %1259 = vmatmul.bf16.gmra.mxu1 %v2145_v33 }
  0xb3   :  { %1714 = vst [vmem:[%s3881_s2 + $0x8] sm:$0xff] %v1556_v39  ;;  %v1777_v41 = vadd.f32 %v1556_v39, %v1554_v20  ;;  %v1847_v42 = vmul.f32 %v1556_v39, %v1556_v39  ;;  %1428 = vmatmul.bf16.gmra.mxu2 %v2149_v37  ;;  %v2680_v20 = vld [vmem:[%s3880_s0 + $0x16c] sm:$0xf0]  ;;  %v2185_v39 = vor.u32 %v2679_v27, %v2182_v28  ;;  %v2687_v27 = vld [vmem:[%s3880_s0 + $0x1ac] sm:$0xf] }
  0xb4   :  { %1597 = vmatmul.bf16.gmra.mxu3 %v2153_v38  ;;  %v2173_v33 = vor.u32 %v2680_v20, %v2172_v19  ;;  %v2181_v38 = vor.u32 %v2681_v26, %v2180_v25  ;;  %v2204_v19 = vld [vmem:[%s3880_s0 + $0x1a0] sm:$0xf]  ;;  %v2688_v20 = vld [vmem:[%s3880_s0 + $0x1ac] sm:$0xf0]  ;;  %v2212_v25 = vld [vmem:[%s3880_s0 + $0x1a8] sm:$0xf] }
  0xb5   :  { %v1910_v44 = vadd.f32 %v1847_v42, %v1846_v40  ;;  %v2689_v26 = vld [vmem:[%s3880_s0 + $0x1b4] sm:$0xf0]  ;;  %v2214_v28 = vld [vmem:[%s3880_s0 + $0x1b8] sm:$0xf0] }
  0xb6   :  { %v1389_v45 = vpop.f32.mrf.mxu2  ;;  %v1053_v48 = vpop.f32.mrf.mxu0 }
  0xb7   :  { %v1558_v46 = vpop.f32.mrf.mxu3  ;;  %v1390_v47 = vadd.f32 %v1389_v45, %v1221_v43  ;;  %v1222_v49 = vpop.f32.mrf.mxu1 }
  0xb8   :  { %v1223_v62 = vadd.f32 %v1222_v49, %v1053_v48 }
  0xb9   :  { %v1559_v50 = vadd.f32 %v1558_v46, %v1390_v47 }
  0xbb   :  { %1715 = vst [vmem:[%s3881_s2 + $0x10] sm:$0xff] %v1559_v50  ;;  %v1778_v54 = vadd.f32 %v1777_v41, %v1559_v50  ;;  %v1848_v55 = vmul.f32 %v1559_v50, %v1559_v50 }
  0xbd   :  { %v1911_v61 = vadd.f32 %v1910_v44, %v1848_v55 }
  0xbe   :  { %v1391_v63 = vpop.f32.mrf.mxu2  ;;  %v1056_v4 = vpop.f32.mrf.mxu0 }
  0xbf   :  { %v1560_v0 = vpop.f32.mrf.mxu3  ;;  %v1392_v3 = vadd.f32 %v1391_v63, %v1223_v62  ;;  %v1225_v5 = vpop.f32.mrf.mxu1 }
  0xc0   :  { %v1226_v11 = vadd.f32 %v1225_v5, %v1056_v4 }
  0xc1   :  { %v1561_v8 = vadd.f32 %v1560_v0, %v1392_v3  ;;  %1095 = vmatmul.bf16.gmra.mxu0 %v2157_v1  ;;  %v2189_v1 = vor.u32 %v2684_v52, %v2188_v51  ;;  %v2220_v51 = vld [vmem:[%s3880_s0 + $0x1c0] sm:$0xf]  ;;  %v2692_v52 = vld [vmem:[%s3880_s0 + $0x1cc] sm:$0xf0] }
  0xc2   :  { %1264 = vmatmul.bf16.gmra.mxu1 %v2161_v2  ;;  %v2193_v2 = vor.u32 %v2682_v53, %v2190_v56  ;;  %v2690_v53 = vld [vmem:[%s3880_s0 + $0x1c4] sm:$0xf]  ;;  %v2222_v56 = vld [vmem:[%s3880_s0 + $0x1d0] sm:$0xf0] }
  0xc3   :  { %1716 = vst [vmem:[%s3881_s2 + $0x18] sm:$0xff] %v1561_v8  ;;  %v1779_v9 = vadd.f32 %v1778_v54, %v1561_v8  ;;  %v1849_v10 = vmul.f32 %v1561_v8, %v1561_v8  ;;  %1433 = vmatmul.bf16.gmra.mxu2 %v2165_v6  ;;  %v2197_v6 = vor.u32 %v2685_v58, %v2196_v57  ;;  %v2228_v57 = vld [vmem:[%s3880_s0 + $0x1c8] sm:$0xf]  ;;  %v2693_v58 = vld [vmem:[%s3880_s0 + $0x1d4] sm:$0xf0] }
  0xc4   :  { %1602 = vmatmul.bf16.gmra.mxu3 %v2169_v7  ;;  %v2201_v7 = vor.u32 %v2683_v59, %v2198_v60  ;;  %v2691_v59 = vld [vmem:[%s3880_s0 + $0x1cc] sm:$0xf]  ;;  %v2230_v60 = vld [vmem:[%s3880_s0 + $0x1d8] sm:$0xf0] }
  0xc5   :  { %v1912_v12 = vadd.f32 %v1911_v61, %v1849_v10 }
  0xc6   :  { %v1394_v13 = vpop.f32.mrf.mxu2  ;;  %v1058_v16 = vpop.f32.mrf.mxu0 }
  0xc7   :  { %v1563_v14 = vpop.f32.mrf.mxu3  ;;  %v1395_v15 = vadd.f32 %v1394_v13, %v1226_v11  ;;  %v1227_v17 = vpop.f32.mrf.mxu1 }
  0xc8   :  { %v1228_v30 = vadd.f32 %v1227_v17, %v1058_v16 }
  0xc9   :  { %v1564_v18 = vadd.f32 %v1563_v14, %v1395_v15 }
  0xcb   :  { %1717 = vst [vmem:[%s3881_s2 + $0x20] sm:$0xff] %v1564_v18  ;;  %v1780_v22 = vadd.f32 %v1779_v9, %v1564_v18  ;;  %v1850_v23 = vmul.f32 %v1564_v18, %v1564_v18 }
  0xcd   :  { %v1913_v29 = vadd.f32 %v1912_v12, %v1850_v23 }
  0xce   :  { %v1396_v31 = vpop.f32.mrf.mxu2  ;;  %v1061_v36 = vpop.f32.mrf.mxu0 }
  0xcf   :  { %v1565_v32 = vpop.f32.mrf.mxu3  ;;  %v1397_v35 = vadd.f32 %v1396_v31, %v1228_v30  ;;  %v1230_v37 = vpop.f32.mrf.mxu1 }
  0xd0   :  { %v1231_v43 = vadd.f32 %v1230_v37, %v1061_v36 }
  0xd1   :  { %v1566_v40 = vadd.f32 %v1565_v32, %v1397_v35  ;;  %1100 = vmatmul.bf16.gmra.mxu0 %v2173_v33  ;;  %v2205_v33 = vor.u32 %v2688_v20, %v2204_v19  ;;  %v2236_v19 = vld [vmem:[%s3880_s0 + $0x1e0] sm:$0xf]  ;;  %v2696_v20 = vld [vmem:[%s3880_s0 + $0x1ec] sm:$0xf0] }
  0xd2   :  { %1269 = vmatmul.bf16.gmra.mxu1 %v2177_v34  ;;  %v2209_v34 = vor.u32 %v2686_v21, %v2206_v24  ;;  %v2694_v21 = vld [vmem:[%s3880_s0 + $0x1e4] sm:$0xf]  ;;  %v2238_v24 = vld [vmem:[%s3880_s0 + $0x1f0] sm:$0xf0] }
  0xd3   :  { %1718 = vst [vmem:[%s3881_s2 + $0x28] sm:$0xff] %v1566_v40  ;;  %v1781_v41 = vadd.f32 %v1780_v22, %v1566_v40  ;;  %v1851_v42 = vmul.f32 %v1566_v40, %v1566_v40  ;;  %1438 = vmatmul.bf16.gmra.mxu2 %v2181_v38  ;;  %v2213_v38 = vor.u32 %v2689_v26, %v2212_v25  ;;  %v2244_v25 = vld [vmem:[%s3880_s0 + $0x1e8] sm:$0xf]  ;;  %v2697_v26 = vld [vmem:[%s3880_s0 + $0x1f4] sm:$0xf0] }
  0xd4   :  { %1607 = vmatmul.bf16.gmra.mxu3 %v2185_v39  ;;  %v2217_v39 = vor.u32 %v2687_v27, %v2214_v28  ;;  %v2695_v27 = vld [vmem:[%s3880_s0 + $0x1ec] sm:$0xf]  ;;  %v2246_v28 = vld [vmem:[%s3880_s0 + $0x1f8] sm:$0xf0] }
  0xd5   :  { %v1914_v44 = vadd.f32 %v1913_v29, %v1851_v42 }
  0xd6   :  { %v1399_v45 = vpop.f32.mrf.mxu2  ;;  %v1063_v48 = vpop.f32.mrf.mxu0 }
  0xd7   :  { %v1568_v46 = vpop.f32.mrf.mxu3  ;;  %v1400_v47 = vadd.f32 %v1399_v45, %v1231_v43  ;;  %v1232_v49 = vpop.f32.mrf.mxu1 }
  0xd8   :  { %v1233_v62 = vadd.f32 %v1232_v49, %v1063_v48 }
  0xd9   :  { %v1569_v50 = vadd.f32 %v1568_v46, %v1400_v47 }
  0xdb   :  { %1719 = vst [vmem:[%s3881_s2 + $0x30] sm:$0xff] %v1569_v50  ;;  %v1782_v54 = vadd.f32 %v1781_v41, %v1569_v50  ;;  %v1852_v55 = vmul.f32 %v1569_v50, %v1569_v50 }
  0xdd   :  { %v1915_v61 = vadd.f32 %v1914_v44, %v1852_v55 }
  0xde   :  { %v1401_v63 = vpop.f32.mrf.mxu2  ;;  %v1066_v4 = vpop.f32.mrf.mxu0 }
  0xdf   :  { %v1570_v0 = vpop.f32.mrf.mxu3  ;;  %v1402_v3 = vadd.f32 %v1401_v63, %v1233_v62  ;;  %v1235_v5 = vpop.f32.mrf.mxu1 }
  0xe0   :  { %v1236_v11 = vadd.f32 %v1235_v5, %v1066_v4 }
  0xe1   :  { %v1571_v8 = vadd.f32 %v1570_v0, %v1402_v3  ;;  %1105 = vmatmul.bf16.gmra.mxu0 %v2189_v1  ;;  %v2221_v1 = vor.u32 %v2692_v52, %v2220_v51  ;;  %v2252_v51 = vld [vmem:[%s3880_s0 + $0x200] sm:$0xf]  ;;  %v2700_v52 = vld [vmem:[%s3880_s0 + $0x20c] sm:$0xf0] }
  0xe2   :  { %1274 = vmatmul.bf16.gmra.mxu1 %v2193_v2  ;;  %v2225_v2 = vor.u32 %v2690_v53, %v2222_v56  ;;  %v2698_v53 = vld [vmem:[%s3880_s0 + $0x204] sm:$0xf]  ;;  %v2254_v56 = vld [vmem:[%s3880_s0 + $0x210] sm:$0xf0] }
  0xe3   :  { %1720 = vst [vmem:[%s3881_s2 + $0x38] sm:$0xff] %v1571_v8  ;;  %v1783_v9 = vadd.f32 %v1782_v54, %v1571_v8  ;;  %v1853_v10 = vmul.f32 %v1571_v8, %v1571_v8  ;;  %1443 = vmatmul.bf16.gmra.mxu2 %v2197_v6  ;;  %v2229_v6 = vor.u32 %v2693_v58, %v2228_v57  ;;  %v2260_v57 = vld [vmem:[%s3880_s0 + $0x208] sm:$0xf]  ;;  %v2701_v58 = vld [vmem:[%s3880_s0 + $0x214] sm:$0xf0] }
  0xe4   :  { %1612 = vmatmul.bf16.gmra.mxu3 %v2201_v7  ;;  %v2233_v7 = vor.u32 %v2691_v59, %v2230_v60  ;;  %v2699_v59 = vld [vmem:[%s3880_s0 + $0x20c] sm:$0xf]  ;;  %v2262_v60 = vld [vmem:[%s3880_s0 + $0x218] sm:$0xf0] }
  0xe5   :  { %v1916_v12 = vadd.f32 %v1915_v61, %v1853_v10 }
  0xe6   :  { %v1404_v13 = vpop.f32.mrf.mxu2  ;;  %v1068_v16 = vpop.f32.mrf.mxu0 }
  0xe7   :  { %v1573_v14 = vpop.f32.mrf.mxu3  ;;  %v1405_v15 = vadd.f32 %v1404_v13, %v1236_v11  ;;  %v1237_v17 = vpop.f32.mrf.mxu1 }
  0xe8   :  { %v1238_v30 = vadd.f32 %v1237_v17, %v1068_v16 }
  0xe9   :  { %v1574_v18 = vadd.f32 %v1573_v14, %v1405_v15 }
  0xeb   :  { %1721 = vst [vmem:[%s3881_s2 + $0x40] sm:$0xff] %v1574_v18  ;;  %v1784_v22 = vadd.f32 %v1783_v9, %v1574_v18  ;;  %v1854_v23 = vmul.f32 %v1574_v18, %v1574_v18 }
  0xed   :  { %v1917_v29 = vadd.f32 %v1916_v12, %v1854_v23 }
  0xee   :  { %v1406_v31 = vpop.f32.mrf.mxu2  ;;  %v1071_v36 = vpop.f32.mrf.mxu0 }
  0xef   :  { %v1575_v32 = vpop.f32.mrf.mxu3  ;;  %v1407_v35 = vadd.f32 %v1406_v31, %v1238_v30  ;;  %v1240_v37 = vpop.f32.mrf.mxu1 }
  0xf0   :  { %v1241_v43 = vadd.f32 %v1240_v37, %v1071_v36 }
  0xf1   :  { %v1576_v40 = vadd.f32 %v1575_v32, %v1407_v35  ;;  %1110 = vmatmul.bf16.gmra.mxu0 %v2205_v33  ;;  %v2237_v33 = vor.u32 %v2696_v20, %v2236_v19  ;;  %v2268_v19 = vld [vmem:[%s3880_s0 + $0x220] sm:$0xf]  ;;  %v2704_v20 = vld [vmem:[%s3880_s0 + $0x22c] sm:$0xf0] }
  0xf2   :  { %1279 = vmatmul.bf16.gmra.mxu1 %v2209_v34  ;;  %v2241_v34 = vor.u32 %v2694_v21, %v2238_v24  ;;  %v2702_v21 = vld [vmem:[%s3880_s0 + $0x224] sm:$0xf]  ;;  %v2270_v24 = vld [vmem:[%s3880_s0 + $0x230] sm:$0xf0] }
  0xf3   :  { %1722 = vst [vmem:[%s3881_s2 + $0x48] sm:$0xff] %v1576_v40  ;;  %v1785_v41 = vadd.f32 %v1784_v22, %v1576_v40  ;;  %v1855_v42 = vmul.f32 %v1576_v40, %v1576_v40  ;;  %1448 = vmatmul.bf16.gmra.mxu2 %v2213_v38  ;;  %v2245_v38 = vor.u32 %v2697_v26, %v2244_v25  ;;  %v2276_v25 = vld [vmem:[%s3880_s0 + $0x228] sm:$0xf]  ;;  %v2705_v26 = vld [vmem:[%s3880_s0 + $0x234] sm:$0xf0] }
  0xf4   :  { %1617 = vmatmul.bf16.gmra.mxu3 %v2217_v39  ;;  %v2249_v39 = vor.u32 %v2695_v27, %v2246_v28  ;;  %v2703_v27 = vld [vmem:[%s3880_s0 + $0x22c] sm:$0xf]  ;;  %v2278_v28 = vld [vmem:[%s3880_s0 + $0x238] sm:$0xf0] }
  0xf5   :  { %v1918_v44 = vadd.f32 %v1917_v29, %v1855_v42 }
  0xf6   :  { %v1409_v45 = vpop.f32.mrf.mxu2  ;;  %v1073_v48 = vpop.f32.mrf.mxu0 }
  0xf7   :  { %v1578_v46 = vpop.f32.mrf.mxu3  ;;  %v1410_v47 = vadd.f32 %v1409_v45, %v1241_v43  ;;  %v1242_v49 = vpop.f32.mrf.mxu1 }
  0xf8   :  { %v1243_v62 = vadd.f32 %v1242_v49, %v1073_v48 }
  0xf9   :  { %v1579_v50 = vadd.f32 %v1578_v46, %v1410_v47 }
  0xfb   :  { %1723 = vst [vmem:[%s3881_s2 + $0x50] sm:$0xff] %v1579_v50  ;;  %v1786_v54 = vadd.f32 %v1785_v41, %v1579_v50  ;;  %v1856_v55 = vmul.f32 %v1579_v50, %v1579_v50 }
  0xfd   :  { %v1919_v61 = vadd.f32 %v1918_v44, %v1856_v55 }
  0xfe   :  { %v1411_v63 = vpop.f32.mrf.mxu2  ;;  %v1076_v4 = vpop.f32.mrf.mxu0 }
  0xff   :  { %v1580_v0 = vpop.f32.mrf.mxu3  ;;  %v1412_v3 = vadd.f32 %v1411_v63, %v1243_v62  ;;  %v1245_v5 = vpop.f32.mrf.mxu1 }
 0x100   :  { %v1246_v11 = vadd.f32 %v1245_v5, %v1076_v4 }
 0x101   :  { %v1581_v8 = vadd.f32 %v1580_v0, %v1412_v3  ;;  %1115 = vmatmul.bf16.gmra.mxu0 %v2221_v1  ;;  %v2253_v1 = vor.u32 %v2700_v52, %v2252_v51  ;;  %v2284_v51 = vld [vmem:[%s3880_s0 + $0x240] sm:$0xf]  ;;  %v2708_v52 = vld [vmem:[%s3880_s0 + $0x24c] sm:$0xf0] }
 0x102   :  { %1284 = vmatmul.bf16.gmra.mxu1 %v2225_v2  ;;  %v2257_v2 = vor.u32 %v2698_v53, %v2254_v56  ;;  %v2706_v53 = vld [vmem:[%s3880_s0 + $0x244] sm:$0xf]  ;;  %v2286_v56 = vld [vmem:[%s3880_s0 + $0x250] sm:$0xf0] }
 0x103   :  { %1724 = vst [vmem:[%s3881_s2 + $0x58] sm:$0xff] %v1581_v8  ;;  %v1787_v9 = vadd.f32 %v1786_v54, %v1581_v8  ;;  %v1857_v10 = vmul.f32 %v1581_v8, %v1581_v8  ;;  %1453 = vmatmul.bf16.gmra.mxu2 %v2229_v6  ;;  %v2261_v6 = vor.u32 %v2701_v58, %v2260_v57  ;;  %v2292_v57 = vld [vmem:[%s3880_s0 + $0x248] sm:$0xf]  ;;  %v2709_v58 = vld [vmem:[%s3880_s0 + $0x254] sm:$0xf0] }
 0x104   :  { %1622 = vmatmul.bf16.gmra.mxu3 %v2233_v7  ;;  %v2265_v7 = vor.u32 %v2699_v59, %v2262_v60  ;;  %v2707_v59 = vld [vmem:[%s3880_s0 + $0x24c] sm:$0xf]  ;;  %v2294_v60 = vld [vmem:[%s3880_s0 + $0x258] sm:$0xf0] }
 0x105   :  { %v1920_v12 = vadd.f32 %v1919_v61, %v1857_v10 }
 0x106   :  { %v1414_v13 = vpop.f32.mrf.mxu2  ;;  %v1078_v16 = vpop.f32.mrf.mxu0 }
 0x107   :  { %v1583_v14 = vpop.f32.mrf.mxu3  ;;  %v1415_v15 = vadd.f32 %v1414_v13, %v1246_v11  ;;  %v1247_v17 = vpop.f32.mrf.mxu1 }
 0x108   :  { %v1248_v30 = vadd.f32 %v1247_v17, %v1078_v16 }
 0x109   :  { %v1584_v18 = vadd.f32 %v1583_v14, %v1415_v15 }
 0x10b   :  { %1725 = vst [vmem:[%s3881_s2 + $0x60] sm:$0xff] %v1584_v18  ;;  %v1788_v22 = vadd.f32 %v1787_v9, %v1584_v18  ;;  %v1858_v23 = vmul.f32 %v1584_v18, %v1584_v18 }
 0x10d   :  { %v1921_v29 = vadd.f32 %v1920_v12, %v1858_v23 }
 0x10e   :  { %v1416_v31 = vpop.f32.mrf.mxu2  ;;  %v1081_v36 = vpop.f32.mrf.mxu0 }
 0x10f   :  { %v1585_v32 = vpop.f32.mrf.mxu3  ;;  %v1417_v35 = vadd.f32 %v1416_v31, %v1248_v30  ;;  %v1250_v37 = vpop.f32.mrf.mxu1 }
 0x110   :  { %v1251_v43 = vadd.f32 %v1250_v37, %v1081_v36 }
 0x111   :  { %v1586_v40 = vadd.f32 %v1585_v32, %v1417_v35  ;;  %1120 = vmatmul.bf16.gmra.mxu0 %v2237_v33  ;;  %v2269_v33 = vor.u32 %v2704_v20, %v2268_v19  ;;  %v2300_v19 = vld [vmem:[%s3880_s0 + $0x260] sm:$0xf]  ;;  %v2712_v20 = vld [vmem:[%s3880_s0 + $0x26c] sm:$0xf0] }
 0x112   :  { %1289 = vmatmul.bf16.gmra.mxu1 %v2241_v34  ;;  %v2273_v34 = vor.u32 %v2702_v21, %v2270_v24  ;;  %v2710_v21 = vld [vmem:[%s3880_s0 + $0x264] sm:$0xf]  ;;  %v2302_v24 = vld [vmem:[%s3880_s0 + $0x270] sm:$0xf0] }
 0x113   :  { %1726 = vst [vmem:[%s3881_s2 + $0x68] sm:$0xff] %v1586_v40  ;;  %v1789_v41 = vadd.f32 %v1788_v22, %v1586_v40  ;;  %v1859_v42 = vmul.f32 %v1586_v40, %v1586_v40  ;;  %1458 = vmatmul.bf16.gmra.mxu2 %v2245_v38  ;;  %v2277_v38 = vor.u32 %v2705_v26, %v2276_v25  ;;  %v2308_v25 = vld [vmem:[%s3880_s0 + $0x268] sm:$0xf]  ;;  %v2713_v26 = vld [vmem:[%s3880_s0 + $0x274] sm:$0xf0] }
 0x114   :  { %1627 = vmatmul.bf16.gmra.mxu3 %v2249_v39  ;;  %v2281_v39 = vor.u32 %v2703_v27, %v2278_v28  ;;  %v2711_v27 = vld [vmem:[%s3880_s0 + $0x26c] sm:$0xf]  ;;  %v2310_v28 = vld [vmem:[%s3880_s0 + $0x278] sm:$0xf0] }
 0x115   :  { %v1922_v44 = vadd.f32 %v1921_v29, %v1859_v42 }
 0x116   :  { %v1419_v45 = vpop.f32.mrf.mxu2  ;;  %v1083_v48 = vpop.f32.mrf.mxu0 }
 0x117   :  { %v1588_v46 = vpop.f32.mrf.mxu3  ;;  %v1420_v47 = vadd.f32 %v1419_v45, %v1251_v43  ;;  %v1252_v49 = vpop.f32.mrf.mxu1 }
 0x118   :  { %v1253_v62 = vadd.f32 %v1252_v49, %v1083_v48 }
 0x119   :  { %v1589_v50 = vadd.f32 %v1588_v46, %v1420_v47 }
 0x11b   :  { %1727 = vst [vmem:[%s3881_s2 + $0x70] sm:$0xff] %v1589_v50  ;;  %v1790_v54 = vadd.f32 %v1789_v41, %v1589_v50  ;;  %v1860_v55 = vmul.f32 %v1589_v50, %v1589_v50 }
 0x11d   :  { %v1923_v61 = vadd.f32 %v1922_v44, %v1860_v55 }
 0x11e   :  { %v1421_v63 = vpop.f32.mrf.mxu2  ;;  %v1086_v4 = vpop.f32.mrf.mxu0 }
 0x11f   :  { %v1590_v0 = vpop.f32.mrf.mxu3  ;;  %v1422_v3 = vadd.f32 %v1421_v63, %v1253_v62  ;;  %v1255_v5 = vpop.f32.mrf.mxu1 }
 0x120   :  { %v1256_v11 = vadd.f32 %v1255_v5, %v1086_v4 }
 0x121   :  { %v1591_v8 = vadd.f32 %v1590_v0, %v1422_v3  ;;  %1125 = vmatmul.bf16.gmra.mxu0 %v2253_v1  ;;  %v2285_v1 = vor.u32 %v2708_v52, %v2284_v51  ;;  %v2316_v51 = vld [vmem:[%s3880_s0 + $0x280] sm:$0xf]  ;;  %v2716_v52 = vld [vmem:[%s3880_s0 + $0x28c] sm:$0xf0] }
 0x122   :  { %1294 = vmatmul.bf16.gmra.mxu1 %v2257_v2  ;;  %v2289_v2 = vor.u32 %v2706_v53, %v2286_v56  ;;  %v2714_v53 = vld [vmem:[%s3880_s0 + $0x284] sm:$0xf]  ;;  %v2318_v56 = vld [vmem:[%s3880_s0 + $0x290] sm:$0xf0] }
 0x123   :  { %1728 = vst [vmem:[%s3881_s2 + $0x78] sm:$0xff] %v1591_v8  ;;  %v1791_v9 = vadd.f32 %v1790_v54, %v1591_v8  ;;  %v1861_v10 = vmul.f32 %v1591_v8, %v1591_v8  ;;  %1463 = vmatmul.bf16.gmra.mxu2 %v2261_v6  ;;  %v2293_v6 = vor.u32 %v2709_v58, %v2292_v57  ;;  %v2324_v57 = vld [vmem:[%s3880_s0 + $0x288] sm:$0xf]  ;;  %v2717_v58 = vld [vmem:[%s3880_s0 + $0x294] sm:$0xf0] }
 0x124   :  { %1632 = vmatmul.bf16.gmra.mxu3 %v2265_v7  ;;  %v2297_v7 = vor.u32 %v2707_v59, %v2294_v60  ;;  %v2715_v59 = vld [vmem:[%s3880_s0 + $0x28c] sm:$0xf]  ;;  %v2326_v60 = vld [vmem:[%s3880_s0 + $0x298] sm:$0xf0] }
 0x125   :  { %v1924_v12 = vadd.f32 %v1923_v61, %v1861_v10 }
 0x126   :  { %v1424_v13 = vpop.f32.mrf.mxu2  ;;  %v1088_v16 = vpop.f32.mrf.mxu0 }
 0x127   :  { %v1593_v14 = vpop.f32.mrf.mxu3  ;;  %v1425_v15 = vadd.f32 %v1424_v13, %v1256_v11  ;;  %v1257_v17 = vpop.f32.mrf.mxu1 }
 0x128   :  { %v1258_v30 = vadd.f32 %v1257_v17, %v1088_v16 }
 0x129   :  { %v1594_v18 = vadd.f32 %v1593_v14, %v1425_v15 }
 0x12b   :  { %1729 = vst [vmem:[%s3881_s2 + $0x80] sm:$0xff] %v1594_v18  ;;  %v1792_v22 = vadd.f32 %v1791_v9, %v1594_v18  ;;  %v1862_v23 = vmul.f32 %v1594_v18, %v1594_v18 }
 0x12d   :  { %v1925_v29 = vadd.f32 %v1924_v12, %v1862_v23 }
 0x12e   :  { %v1426_v31 = vpop.f32.mrf.mxu2  ;;  %v1091_v36 = vpop.f32.mrf.mxu0 }
 0x12f   :  { %v1595_v32 = vpop.f32.mrf.mxu3  ;;  %v1427_v35 = vadd.f32 %v1426_v31, %v1258_v30  ;;  %v1260_v37 = vpop.f32.mrf.mxu1 }
 0x130   :  { %v1261_v43 = vadd.f32 %v1260_v37, %v1091_v36 }
 0x131   :  { %v1596_v40 = vadd.f32 %v1595_v32, %v1427_v35  ;;  %1130 = vmatmul.bf16.gmra.mxu0 %v2269_v33  ;;  %v2301_v33 = vor.u32 %v2712_v20, %v2300_v19  ;;  %v2332_v19 = vld [vmem:[%s3880_s0 + $0x2a0] sm:$0xf]  ;;  %v2720_v20 = vld [vmem:[%s3880_s0 + $0x2ac] sm:$0xf0] }
 0x132   :  { %1299 = vmatmul.bf16.gmra.mxu1 %v2273_v34  ;;  %v2305_v34 = vor.u32 %v2710_v21, %v2302_v24  ;;  %v2718_v21 = vld [vmem:[%s3880_s0 + $0x2a4] sm:$0xf]  ;;  %v2334_v24 = vld [vmem:[%s3880_s0 + $0x2b0] sm:$0xf0] }
 0x133   :  { %1730 = vst [vmem:[%s3881_s2 + $0x88] sm:$0xff] %v1596_v40  ;;  %v1793_v41 = vadd.f32 %v1792_v22, %v1596_v40  ;;  %v1863_v42 = vmul.f32 %v1596_v40, %v1596_v40  ;;  %1468 = vmatmul.bf16.gmra.mxu2 %v2277_v38  ;;  %v2309_v38 = vor.u32 %v2713_v26, %v2308_v25  ;;  %v2340_v25 = vld [vmem:[%s3880_s0 + $0x2a8] sm:$0xf]  ;;  %v2721_v26 = vld [vmem:[%s3880_s0 + $0x2b4] sm:$0xf0] }
 0x134   :  { %1637 = vmatmul.bf16.gmra.mxu3 %v2281_v39  ;;  %v2313_v39 = vor.u32 %v2711_v27, %v2310_v28  ;;  %v2719_v27 = vld [vmem:[%s3880_s0 + $0x2ac] sm:$0xf]  ;;  %v2342_v28 = vld [vmem:[%s3880_s0 + $0x2b8] sm:$0xf0] }
 0x135   :  { %v1926_v44 = vadd.f32 %v1925_v29, %v1863_v42 }
 0x136   :  { %v1429_v45 = vpop.f32.mrf.mxu2  ;;  %v1093_v48 = vpop.f32.mrf.mxu0 }
 0x137   :  { %v1598_v46 = vpop.f32.mrf.mxu3  ;;  %v1430_v47 = vadd.f32 %v1429_v45, %v1261_v43  ;;  %v1262_v49 = vpop.f32.mrf.mxu1 }
 0x138   :  { %v1263_v62 = vadd.f32 %v1262_v49, %v1093_v48 }
 0x139   :  { %v1599_v50 = vadd.f32 %v1598_v46, %v1430_v47 }
 0x13b   :  { %1731 = vst [vmem:[%s3881_s2 + $0x90] sm:$0xff] %v1599_v50  ;;  %v1794_v54 = vadd.f32 %v1793_v41, %v1599_v50  ;;  %v1864_v55 = vmul.f32 %v1599_v50, %v1599_v50 }
 0x13d   :  { %v1927_v61 = vadd.f32 %v1926_v44, %v1864_v55 }
 0x13e   :  { %v1431_v63 = vpop.f32.mrf.mxu2  ;;  %v1096_v4 = vpop.f32.mrf.mxu0 }
 0x13f   :  { %v1600_v0 = vpop.f32.mrf.mxu3  ;;  %v1432_v3 = vadd.f32 %v1431_v63, %v1263_v62  ;;  %v1265_v5 = vpop.f32.mrf.mxu1 }
 0x140   :  { %v1266_v11 = vadd.f32 %v1265_v5, %v1096_v4 }
 0x141   :  { %v1601_v8 = vadd.f32 %v1600_v0, %v1432_v3  ;;  %1135 = vmatmul.bf16.gmra.mxu0 %v2285_v1  ;;  %v2317_v1 = vor.u32 %v2716_v52, %v2316_v51  ;;  %v2348_v51 = vld [vmem:[%s3880_s0 + $0x2c0] sm:$0xf]  ;;  %v2724_v52 = vld [vmem:[%s3880_s0 + $0x2cc] sm:$0xf0] }
 0x142   :  { %1304 = vmatmul.bf16.gmra.mxu1 %v2289_v2  ;;  %v2321_v2 = vor.u32 %v2714_v53, %v2318_v56  ;;  %v2722_v53 = vld [vmem:[%s3880_s0 + $0x2c4] sm:$0xf]  ;;  %v2350_v56 = vld [vmem:[%s3880_s0 + $0x2d0] sm:$0xf0] }
 0x143   :  { %1732 = vst [vmem:[%s3881_s2 + $0x98] sm:$0xff] %v1601_v8  ;;  %v1795_v9 = vadd.f32 %v1794_v54, %v1601_v8  ;;  %v1865_v10 = vmul.f32 %v1601_v8, %v1601_v8  ;;  %1473 = vmatmul.bf16.gmra.mxu2 %v2293_v6  ;;  %v2325_v6 = vor.u32 %v2717_v58, %v2324_v57  ;;  %v2356_v57 = vld [vmem:[%s3880_s0 + $0x2c8] sm:$0xf]  ;;  %v2725_v58 = vld [vmem:[%s3880_s0 + $0x2d4] sm:$0xf0] }
 0x144   :  { %1642 = vmatmul.bf16.gmra.mxu3 %v2297_v7  ;;  %v2329_v7 = vor.u32 %v2715_v59, %v2326_v60  ;;  %v2723_v59 = vld [vmem:[%s3880_s0 + $0x2cc] sm:$0xf]  ;;  %v2358_v60 = vld [vmem:[%s3880_s0 + $0x2d8] sm:$0xf0] }
 0x145   :  { %v1928_v12 = vadd.f32 %v1927_v61, %v1865_v10 }
 0x146   :  { %v1434_v13 = vpop.f32.mrf.mxu2  ;;  %v1098_v16 = vpop.f32.mrf.mxu0 }
 0x147   :  { %v1603_v14 = vpop.f32.mrf.mxu3  ;;  %v1435_v15 = vadd.f32 %v1434_v13, %v1266_v11  ;;  %v1267_v17 = vpop.f32.mrf.mxu1 }
 0x148   :  { %v1268_v30 = vadd.f32 %v1267_v17, %v1098_v16 }
 0x149   :  { %v1604_v18 = vadd.f32 %v1603_v14, %v1435_v15 }
 0x14b   :  { %1733 = vst [vmem:[%s3881_s2 + $0xa0] sm:$0xff] %v1604_v18  ;;  %v1796_v22 = vadd.f32 %v1795_v9, %v1604_v18  ;;  %v1866_v23 = vmul.f32 %v1604_v18, %v1604_v18 }
 0x14d   :  { %v1929_v29 = vadd.f32 %v1928_v12, %v1866_v23 }
 0x14e   :  { %v1436_v31 = vpop.f32.mrf.mxu2  ;;  %v1101_v36 = vpop.f32.mrf.mxu0 }
 0x14f   :  { %v1605_v32 = vpop.f32.mrf.mxu3  ;;  %v1437_v35 = vadd.f32 %v1436_v31, %v1268_v30  ;;  %v1270_v37 = vpop.f32.mrf.mxu1 }
 0x150   :  { %v1271_v43 = vadd.f32 %v1270_v37, %v1101_v36 }
 0x151   :  { %v1606_v40 = vadd.f32 %v1605_v32, %v1437_v35  ;;  %1140 = vmatmul.bf16.gmra.mxu0 %v2301_v33  ;;  %v2333_v33 = vor.u32 %v2720_v20, %v2332_v19  ;;  %v2364_v19 = vld [vmem:[%s3880_s0 + $0x2e0] sm:$0xf]  ;;  %v2728_v20 = vld [vmem:[%s3880_s0 + $0x2ec] sm:$0xf0] }
 0x152   :  { %1309 = vmatmul.bf16.gmra.mxu1 %v2305_v34  ;;  %v2337_v34 = vor.u32 %v2718_v21, %v2334_v24  ;;  %v2726_v21 = vld [vmem:[%s3880_s0 + $0x2e4] sm:$0xf]  ;;  %v2366_v24 = vld [vmem:[%s3880_s0 + $0x2f0] sm:$0xf0] }
 0x153   :  { %1734 = vst [vmem:[%s3881_s2 + $0xa8] sm:$0xff] %v1606_v40  ;;  %v1797_v41 = vadd.f32 %v1796_v22, %v1606_v40  ;;  %v1867_v42 = vmul.f32 %v1606_v40, %v1606_v40  ;;  %1478 = vmatmul.bf16.gmra.mxu2 %v2309_v38  ;;  %v2341_v38 = vor.u32 %v2721_v26, %v2340_v25  ;;  %v2372_v25 = vld [vmem:[%s3880_s0 + $0x2e8] sm:$0xf]  ;;  %v2729_v26 = vld [vmem:[%s3880_s0 + $0x2f4] sm:$0xf0] }
 0x154   :  { %1647 = vmatmul.bf16.gmra.mxu3 %v2313_v39  ;;  %v2345_v39 = vor.u32 %v2719_v27, %v2342_v28  ;;  %v2727_v27 = vld [vmem:[%s3880_s0 + $0x2ec] sm:$0xf]  ;;  %v2374_v28 = vld [vmem:[%s3880_s0 + $0x2f8] sm:$0xf0] }
 0x155   :  { %v1930_v44 = vadd.f32 %v1929_v29, %v1867_v42 }
 0x156   :  { %v1439_v45 = vpop.f32.mrf.mxu2  ;;  %v1103_v48 = vpop.f32.mrf.mxu0 }
 0x157   :  { %v1608_v46 = vpop.f32.mrf.mxu3  ;;  %v1440_v47 = vadd.f32 %v1439_v45, %v1271_v43  ;;  %v1272_v49 = vpop.f32.mrf.mxu1 }
 0x158   :  { %v1273_v62 = vadd.f32 %v1272_v49, %v1103_v48 }
 0x159   :  { %v1609_v50 = vadd.f32 %v1608_v46, %v1440_v47 }
 0x15b   :  { %1735 = vst [vmem:[%s3881_s2 + $0xb0] sm:$0xff] %v1609_v50  ;;  %v1798_v54 = vadd.f32 %v1797_v41, %v1609_v50  ;;  %v1868_v55 = vmul.f32 %v1609_v50, %v1609_v50 }
 0x15d   :  { %v1931_v61 = vadd.f32 %v1930_v44, %v1868_v55 }
 0x15e   :  { %v1441_v63 = vpop.f32.mrf.mxu2  ;;  %v1106_v4 = vpop.f32.mrf.mxu0 }
 0x15f   :  { %v1610_v0 = vpop.f32.mrf.mxu3  ;;  %v1442_v3 = vadd.f32 %v1441_v63, %v1273_v62  ;;  %v1275_v5 = vpop.f32.mrf.mxu1 }
 0x160   :  { %v1276_v11 = vadd.f32 %v1275_v5, %v1106_v4 }
 0x161   :  { %v1611_v8 = vadd.f32 %v1610_v0, %v1442_v3  ;;  %1145 = vmatmul.bf16.gmra.mxu0 %v2317_v1  ;;  %v2349_v1 = vor.u32 %v2724_v52, %v2348_v51  ;;  %v2380_v51 = vld [vmem:[%s3880_s0 + $0x300] sm:$0xf]  ;;  %v2732_v52 = vld [vmem:[%s3880_s0 + $0x30c] sm:$0xf0] }
 0x162   :  { %1314 = vmatmul.bf16.gmra.mxu1 %v2321_v2  ;;  %v2353_v2 = vor.u32 %v2722_v53, %v2350_v56  ;;  %v2730_v53 = vld [vmem:[%s3880_s0 + $0x304] sm:$0xf]  ;;  %v2382_v56 = vld [vmem:[%s3880_s0 + $0x310] sm:$0xf0] }
 0x163   :  { %1736 = vst [vmem:[%s3881_s2 + $0xb8] sm:$0xff] %v1611_v8  ;;  %v1799_v9 = vadd.f32 %v1798_v54, %v1611_v8  ;;  %v1869_v10 = vmul.f32 %v1611_v8, %v1611_v8  ;;  %1483 = vmatmul.bf16.gmra.mxu2 %v2325_v6  ;;  %v2357_v6 = vor.u32 %v2725_v58, %v2356_v57  ;;  %v2388_v57 = vld [vmem:[%s3880_s0 + $0x308] sm:$0xf]  ;;  %v2733_v58 = vld [vmem:[%s3880_s0 + $0x314] sm:$0xf0] }
 0x164   :  { %1652 = vmatmul.bf16.gmra.mxu3 %v2329_v7  ;;  %v2361_v7 = vor.u32 %v2723_v59, %v2358_v60  ;;  %v2731_v59 = vld [vmem:[%s3880_s0 + $0x30c] sm:$0xf]  ;;  %v2390_v60 = vld [vmem:[%s3880_s0 + $0x318] sm:$0xf0] }
 0x165   :  { %v1932_v12 = vadd.f32 %v1931_v61, %v1869_v10 }
 0x166   :  { %v1444_v13 = vpop.f32.mrf.mxu2  ;;  %v1108_v16 = vpop.f32.mrf.mxu0 }
 0x167   :  { %v1613_v14 = vpop.f32.mrf.mxu3  ;;  %v1445_v15 = vadd.f32 %v1444_v13, %v1276_v11  ;;  %v1277_v17 = vpop.f32.mrf.mxu1 }
 0x168   :  { %v1278_v30 = vadd.f32 %v1277_v17, %v1108_v16 }
 0x169   :  { %v1614_v18 = vadd.f32 %v1613_v14, %v1445_v15 }
 0x16b   :  { %1737 = vst [vmem:[%s3881_s2 + $0xc0] sm:$0xff] %v1614_v18  ;;  %v1800_v22 = vadd.f32 %v1799_v9, %v1614_v18  ;;  %v1870_v23 = vmul.f32 %v1614_v18, %v1614_v18 }
 0x16d   :  { %v1933_v29 = vadd.f32 %v1932_v12, %v1870_v23 }
 0x16e   :  { %v1446_v31 = vpop.f32.mrf.mxu2  ;;  %v1111_v36 = vpop.f32.mrf.mxu0 }
 0x16f   :  { %v1615_v32 = vpop.f32.mrf.mxu3  ;;  %v1447_v35 = vadd.f32 %v1446_v31, %v1278_v30  ;;  %v1280_v37 = vpop.f32.mrf.mxu1 }
 0x170   :  { %v1281_v43 = vadd.f32 %v1280_v37, %v1111_v36 }
 0x171   :  { %v1616_v40 = vadd.f32 %v1615_v32, %v1447_v35  ;;  %1150 = vmatmul.bf16.gmra.mxu0 %v2333_v33  ;;  %v2365_v33 = vor.u32 %v2728_v20, %v2364_v19  ;;  %v2396_v19 = vld [vmem:[%s3880_s0 + $0x320] sm:$0xf]  ;;  %v2736_v20 = vld [vmem:[%s3880_s0 + $0x32c] sm:$0xf0] }
 0x172   :  { %1319 = vmatmul.bf16.gmra.mxu1 %v2337_v34  ;;  %v2369_v34 = vor.u32 %v2726_v21, %v2366_v24  ;;  %v2734_v21 = vld [vmem:[%s3880_s0 + $0x324] sm:$0xf]  ;;  %v2398_v24 = vld [vmem:[%s3880_s0 + $0x330] sm:$0xf0] }
 0x173   :  { %1738 = vst [vmem:[%s3881_s2 + $0xc8] sm:$0xff] %v1616_v40  ;;  %v1801_v41 = vadd.f32 %v1800_v22, %v1616_v40  ;;  %v1871_v42 = vmul.f32 %v1616_v40, %v1616_v40  ;;  %1488 = vmatmul.bf16.gmra.mxu2 %v2341_v38  ;;  %v2373_v38 = vor.u32 %v2729_v26, %v2372_v25  ;;  %v2404_v25 = vld [vmem:[%s3880_s0 + $0x328] sm:$0xf]  ;;  %v2737_v26 = vld [vmem:[%s3880_s0 + $0x334] sm:$0xf0] }
 0x174   :  { %1657 = vmatmul.bf16.gmra.mxu3 %v2345_v39  ;;  %v2377_v39 = vor.u32 %v2727_v27, %v2374_v28  ;;  %v2735_v27 = vld [vmem:[%s3880_s0 + $0x32c] sm:$0xf]  ;;  %v2406_v28 = vld [vmem:[%s3880_s0 + $0x338] sm:$0xf0] }
 0x175   :  { %v1934_v44 = vadd.f32 %v1933_v29, %v1871_v42 }
 0x176   :  { %v1449_v45 = vpop.f32.mrf.mxu2  ;;  %v1113_v48 = vpop.f32.mrf.mxu0 }
 0x177   :  { %v1618_v46 = vpop.f32.mrf.mxu3  ;;  %v1450_v47 = vadd.f32 %v1449_v45, %v1281_v43  ;;  %v1282_v49 = vpop.f32.mrf.mxu1 }
 0x178   :  { %v1283_v62 = vadd.f32 %v1282_v49, %v1113_v48 }
 0x179   :  { %v1619_v50 = vadd.f32 %v1618_v46, %v1450_v47 }
 0x17b   :  { %1739 = vst [vmem:[%s3881_s2 + $0xd0] sm:$0xff] %v1619_v50  ;;  %v1802_v54 = vadd.f32 %v1801_v41, %v1619_v50  ;;  %v1872_v55 = vmul.f32 %v1619_v50, %v1619_v50 }
 0x17d   :  { %v1935_v61 = vadd.f32 %v1934_v44, %v1872_v55 }
 0x17e   :  { %v1451_v63 = vpop.f32.mrf.mxu2  ;;  %v1116_v4 = vpop.f32.mrf.mxu0 }
 0x17f   :  { %v1620_v0 = vpop.f32.mrf.mxu3  ;;  %v1452_v3 = vadd.f32 %v1451_v63, %v1283_v62  ;;  %v1285_v5 = vpop.f32.mrf.mxu1 }
 0x180   :  { %v1286_v11 = vadd.f32 %v1285_v5, %v1116_v4 }
 0x181   :  { %v1621_v8 = vadd.f32 %v1620_v0, %v1452_v3  ;;  %1155 = vmatmul.bf16.gmra.mxu0 %v2349_v1  ;;  %v2381_v1 = vor.u32 %v2732_v52, %v2380_v51  ;;  %v2412_v51 = vld [vmem:[%s3880_s0 + $0x340] sm:$0xf]  ;;  %v2740_v52 = vld [vmem:[%s3880_s0 + $0x34c] sm:$0xf0] }
 0x182   :  { %1324 = vmatmul.bf16.gmra.mxu1 %v2353_v2  ;;  %v2385_v2 = vor.u32 %v2730_v53, %v2382_v56  ;;  %v2738_v53 = vld [vmem:[%s3880_s0 + $0x344] sm:$0xf]  ;;  %v2414_v56 = vld [vmem:[%s3880_s0 + $0x350] sm:$0xf0] }
 0x183   :  { %1740 = vst [vmem:[%s3881_s2 + $0xd8] sm:$0xff] %v1621_v8  ;;  %v1803_v9 = vadd.f32 %v1802_v54, %v1621_v8  ;;  %v1873_v10 = vmul.f32 %v1621_v8, %v1621_v8  ;;  %1493 = vmatmul.bf16.gmra.mxu2 %v2357_v6  ;;  %v2389_v6 = vor.u32 %v2733_v58, %v2388_v57  ;;  %v2420_v57 = vld [vmem:[%s3880_s0 + $0x348] sm:$0xf]  ;;  %v2741_v58 = vld [vmem:[%s3880_s0 + $0x354] sm:$0xf0] }
 0x184   :  { %1662 = vmatmul.bf16.gmra.mxu3 %v2361_v7  ;;  %v2393_v7 = vor.u32 %v2731_v59, %v2390_v60  ;;  %v2739_v59 = vld [vmem:[%s3880_s0 + $0x34c] sm:$0xf]  ;;  %v2422_v60 = vld [vmem:[%s3880_s0 + $0x358] sm:$0xf0] }
 0x185   :  { %v1936_v12 = vadd.f32 %v1935_v61, %v1873_v10 }
 0x186   :  { %v1454_v13 = vpop.f32.mrf.mxu2  ;;  %v1118_v16 = vpop.f32.mrf.mxu0 }
 0x187   :  { %v1623_v14 = vpop.f32.mrf.mxu3  ;;  %v1455_v15 = vadd.f32 %v1454_v13, %v1286_v11  ;;  %v1287_v17 = vpop.f32.mrf.mxu1 }
 0x188   :  { %v1288_v30 = vadd.f32 %v1287_v17, %v1118_v16 }
 0x189   :  { %v1624_v18 = vadd.f32 %v1623_v14, %v1455_v15 }
 0x18b   :  { %1741 = vst [vmem:[%s3881_s2 + $0xe0] sm:$0xff] %v1624_v18  ;;  %v1804_v22 = vadd.f32 %v1803_v9, %v1624_v18  ;;  %v1874_v23 = vmul.f32 %v1624_v18, %v1624_v18 }
 0x18d   :  { %v1937_v29 = vadd.f32 %v1936_v12, %v1874_v23 }
 0x18e   :  { %v1456_v31 = vpop.f32.mrf.mxu2  ;;  %v1121_v36 = vpop.f32.mrf.mxu0 }
 0x18f   :  { %v1625_v32 = vpop.f32.mrf.mxu3  ;;  %v1457_v35 = vadd.f32 %v1456_v31, %v1288_v30  ;;  %v1290_v37 = vpop.f32.mrf.mxu1 }
 0x190   :  { %v1291_v43 = vadd.f32 %v1290_v37, %v1121_v36 }
 0x191   :  { %v1626_v40 = vadd.f32 %v1625_v32, %v1457_v35  ;;  %1160 = vmatmul.bf16.gmra.mxu0 %v2365_v33  ;;  %v2397_v33 = vor.u32 %v2736_v20, %v2396_v19  ;;  %v2428_v19 = vld [vmem:[%s3880_s0 + $0x360] sm:$0xf]  ;;  %v2744_v20 = vld [vmem:[%s3880_s0 + $0x36c] sm:$0xf0] }
 0x192   :  { %1329 = vmatmul.bf16.gmra.mxu1 %v2369_v34  ;;  %v2401_v34 = vor.u32 %v2734_v21, %v2398_v24  ;;  %v2742_v21 = vld [vmem:[%s3880_s0 + $0x364] sm:$0xf]  ;;  %v2430_v24 = vld [vmem:[%s3880_s0 + $0x370] sm:$0xf0] }
 0x193   :  { %1742 = vst [vmem:[%s3881_s2 + $0xe8] sm:$0xff] %v1626_v40  ;;  %v1805_v41 = vadd.f32 %v1804_v22, %v1626_v40  ;;  %v1875_v42 = vmul.f32 %v1626_v40, %v1626_v40  ;;  %1498 = vmatmul.bf16.gmra.mxu2 %v2373_v38  ;;  %v2405_v38 = vor.u32 %v2737_v26, %v2404_v25  ;;  %v2436_v25 = vld [vmem:[%s3880_s0 + $0x368] sm:$0xf]  ;;  %v2745_v26 = vld [vmem:[%s3880_s0 + $0x374] sm:$0xf0] }
 0x194   :  { %1667 = vmatmul.bf16.gmra.mxu3 %v2377_v39  ;;  %v2409_v39 = vor.u32 %v2735_v27, %v2406_v28  ;;  %v2743_v27 = vld [vmem:[%s3880_s0 + $0x36c] sm:$0xf]  ;;  %v2438_v28 = vld [vmem:[%s3880_s0 + $0x378] sm:$0xf0] }
 0x195   :  { %v1938_v44 = vadd.f32 %v1937_v29, %v1875_v42 }
 0x196   :  { %v1459_v45 = vpop.f32.mrf.mxu2  ;;  %v1123_v48 = vpop.f32.mrf.mxu0 }
 0x197   :  { %v1628_v46 = vpop.f32.mrf.mxu3  ;;  %v1460_v47 = vadd.f32 %v1459_v45, %v1291_v43  ;;  %v1292_v49 = vpop.f32.mrf.mxu1 }
 0x198   :  { %v1293_v62 = vadd.f32 %v1292_v49, %v1123_v48 }
 0x199   :  { %v1629_v50 = vadd.f32 %v1628_v46, %v1460_v47 }
 0x19b   :  { %1743 = vst [vmem:[%s3881_s2 + $0xf0] sm:$0xff] %v1629_v50  ;;  %v1806_v54 = vadd.f32 %v1805_v41, %v1629_v50  ;;  %v1876_v55 = vmul.f32 %v1629_v50, %v1629_v50 }
 0x19d   :  { %v1939_v61 = vadd.f32 %v1938_v44, %v1876_v55 }
 0x19e   :  { %v1461_v63 = vpop.f32.mrf.mxu2  ;;  %v1126_v4 = vpop.f32.mrf.mxu0 }
 0x19f   :  { %v1630_v0 = vpop.f32.mrf.mxu3  ;;  %v1462_v3 = vadd.f32 %v1461_v63, %v1293_v62  ;;  %v1295_v5 = vpop.f32.mrf.mxu1 }
 0x1a0   :  { %v1296_v11 = vadd.f32 %v1295_v5, %v1126_v4 }
 0x1a1   :  { %v1631_v8 = vadd.f32 %v1630_v0, %v1462_v3  ;;  %1165 = vmatmul.bf16.gmra.mxu0 %v2381_v1  ;;  %v2413_v1 = vor.u32 %v2740_v52, %v2412_v51  ;;  %v2444_v51 = vld [vmem:[%s3880_s0 + $0x380] sm:$0xf]  ;;  %v2748_v52 = vld [vmem:[%s3880_s0 + $0x38c] sm:$0xf0] }
 0x1a2   :  { %1334 = vmatmul.bf16.gmra.mxu1 %v2385_v2  ;;  %v2417_v2 = vor.u32 %v2738_v53, %v2414_v56  ;;  %v2746_v53 = vld [vmem:[%s3880_s0 + $0x384] sm:$0xf]  ;;  %v2446_v56 = vld [vmem:[%s3880_s0 + $0x390] sm:$0xf0] }
 0x1a3   :  { %1744 = vst [vmem:[%s3881_s2 + $0xf8] sm:$0xff] %v1631_v8  ;;  %v1807_v9 = vadd.f32 %v1806_v54, %v1631_v8  ;;  %v1877_v10 = vmul.f32 %v1631_v8, %v1631_v8  ;;  %1503 = vmatmul.bf16.gmra.mxu2 %v2389_v6  ;;  %v2421_v6 = vor.u32 %v2741_v58, %v2420_v57  ;;  %v2452_v57 = vld [vmem:[%s3880_s0 + $0x388] sm:$0xf]  ;;  %v2749_v58 = vld [vmem:[%s3880_s0 + $0x394] sm:$0xf0] }
 0x1a4   :  { %1672 = vmatmul.bf16.gmra.mxu3 %v2393_v7  ;;  %v2425_v7 = vor.u32 %v2739_v59, %v2422_v60  ;;  %v2747_v59 = vld [vmem:[%s3880_s0 + $0x38c] sm:$0xf]  ;;  %v2454_v60 = vld [vmem:[%s3880_s0 + $0x398] sm:$0xf0] }
 0x1a5   :  { %v1940_v12 = vadd.f32 %v1939_v61, %v1877_v10 }
 0x1a6   :  { %v1464_v13 = vpop.f32.mrf.mxu2  ;;  %v1128_v16 = vpop.f32.mrf.mxu0 }
 0x1a7   :  { %v1633_v14 = vpop.f32.mrf.mxu3  ;;  %v1465_v15 = vadd.f32 %v1464_v13, %v1296_v11  ;;  %v1297_v17 = vpop.f32.mrf.mxu1 }
 0x1a8   :  { %v1298_v30 = vadd.f32 %v1297_v17, %v1128_v16 }
 0x1a9   :  { %v1634_v18 = vadd.f32 %v1633_v14, %v1465_v15 }
 0x1ab   :  { %1745 = vst [vmem:[%s3881_s2 + $0x100] sm:$0xff] %v1634_v18  ;;  %v1808_v22 = vadd.f32 %v1807_v9, %v1634_v18  ;;  %v1878_v23 = vmul.f32 %v1634_v18, %v1634_v18 }
 0x1ad   :  { %v1941_v29 = vadd.f32 %v1940_v12, %v1878_v23 }
 0x1ae   :  { %v1466_v31 = vpop.f32.mrf.mxu2  ;;  %v1131_v36 = vpop.f32.mrf.mxu0 }
 0x1af   :  { %v1635_v32 = vpop.f32.mrf.mxu3  ;;  %v1467_v35 = vadd.f32 %v1466_v31, %v1298_v30  ;;  %v1300_v37 = vpop.f32.mrf.mxu1 }
 0x1b0   :  { %v1301_v43 = vadd.f32 %v1300_v37, %v1131_v36 }
 0x1b1   :  { %v1636_v40 = vadd.f32 %v1635_v32, %v1467_v35  ;;  %1170 = vmatmul.bf16.gmra.mxu0 %v2397_v33  ;;  %v2429_v33 = vor.u32 %v2744_v20, %v2428_v19  ;;  %v2460_v19 = vld [vmem:[%s3880_s0 + $0x3a0] sm:$0xf]  ;;  %v2752_v20 = vld [vmem:[%s3880_s0 + $0x3ac] sm:$0xf0] }
 0x1b2   :  { %1339 = vmatmul.bf16.gmra.mxu1 %v2401_v34  ;;  %v2433_v34 = vor.u32 %v2742_v21, %v2430_v24  ;;  %v2750_v21 = vld [vmem:[%s3880_s0 + $0x3a4] sm:$0xf]  ;;  %v2462_v24 = vld [vmem:[%s3880_s0 + $0x3b0] sm:$0xf0] }
 0x1b3   :  { %1746 = vst [vmem:[%s3881_s2 + $0x108] sm:$0xff] %v1636_v40  ;;  %v1809_v41 = vadd.f32 %v1808_v22, %v1636_v40  ;;  %v1879_v42 = vmul.f32 %v1636_v40, %v1636_v40  ;;  %1508 = vmatmul.bf16.gmra.mxu2 %v2405_v38  ;;  %v2437_v38 = vor.u32 %v2745_v26, %v2436_v25  ;;  %v2468_v25 = vld [vmem:[%s3880_s0 + $0x3a8] sm:$0xf]  ;;  %v2753_v26 = vld [vmem:[%s3880_s0 + $0x3b4] sm:$0xf0] }
 0x1b4   :  { %1677 = vmatmul.bf16.gmra.mxu3 %v2409_v39  ;;  %v2441_v39 = vor.u32 %v2743_v27, %v2438_v28  ;;  %v2751_v27 = vld [vmem:[%s3880_s0 + $0x3ac] sm:$0xf]  ;;  %v2470_v28 = vld [vmem:[%s3880_s0 + $0x3b8] sm:$0xf0] }
 0x1b5   :  { %v1942_v44 = vadd.f32 %v1941_v29, %v1879_v42 }
 0x1b6   :  { %v1469_v45 = vpop.f32.mrf.mxu2  ;;  %v1133_v48 = vpop.f32.mrf.mxu0 }
 0x1b7   :  { %v1638_v46 = vpop.f32.mrf.mxu3  ;;  %v1470_v47 = vadd.f32 %v1469_v45, %v1301_v43  ;;  %v1302_v49 = vpop.f32.mrf.mxu1 }
 0x1b8   :  { %v1303_v62 = vadd.f32 %v1302_v49, %v1133_v48 }
 0x1b9   :  { %v1639_v50 = vadd.f32 %v1638_v46, %v1470_v47 }
 0x1bb   :  { %1747 = vst [vmem:[%s3881_s2 + $0x110] sm:$0xff] %v1639_v50  ;;  %v1810_v54 = vadd.f32 %v1809_v41, %v1639_v50  ;;  %v1880_v55 = vmul.f32 %v1639_v50, %v1639_v50 }
 0x1bd   :  { %v1943_v61 = vadd.f32 %v1942_v44, %v1880_v55 }
 0x1be   :  { %v1471_v63 = vpop.f32.mrf.mxu2  ;;  %v1136_v4 = vpop.f32.mrf.mxu0 }
 0x1bf   :  { %v1640_v0 = vpop.f32.mrf.mxu3  ;;  %v1472_v3 = vadd.f32 %v1471_v63, %v1303_v62  ;;  %v1305_v5 = vpop.f32.mrf.mxu1 }
 0x1c0   :  { %v1306_v11 = vadd.f32 %v1305_v5, %v1136_v4 }
 0x1c1   :  { %v1641_v8 = vadd.f32 %v1640_v0, %v1472_v3  ;;  %1175 = vmatmul.bf16.gmra.mxu0 %v2413_v1  ;;  %v2445_v1 = vor.u32 %v2748_v52, %v2444_v51  ;;  %v2476_v51 = vld [vmem:[%s3880_s0 + $0x3c0] sm:$0xf]  ;;  %v2756_v52 = vld [vmem:[%s3880_s0 + $0x3cc] sm:$0xf0] }
 0x1c2   :  { %1344 = vmatmul.bf16.gmra.mxu1 %v2417_v2  ;;  %v2449_v2 = vor.u32 %v2746_v53, %v2446_v56  ;;  %v2754_v53 = vld [vmem:[%s3880_s0 + $0x3c4] sm:$0xf]  ;;  %v2478_v56 = vld [vmem:[%s3880_s0 + $0x3d0] sm:$0xf0] }
 0x1c3   :  { %1748 = vst [vmem:[%s3881_s2 + $0x118] sm:$0xff] %v1641_v8  ;;  %v1811_v9 = vadd.f32 %v1810_v54, %v1641_v8  ;;  %v1881_v10 = vmul.f32 %v1641_v8, %v1641_v8  ;;  %1513 = vmatmul.bf16.gmra.mxu2 %v2421_v6  ;;  %v2453_v6 = vor.u32 %v2749_v58, %v2452_v57  ;;  %v2484_v57 = vld [vmem:[%s3880_s0 + $0x3c8] sm:$0xf]  ;;  %v2757_v58 = vld [vmem:[%s3880_s0 + $0x3d4] sm:$0xf0] }
 0x1c4   :  { %1682 = vmatmul.bf16.gmra.mxu3 %v2425_v7  ;;  %v2457_v7 = vor.u32 %v2747_v59, %v2454_v60  ;;  %v2755_v59 = vld [vmem:[%s3880_s0 + $0x3cc] sm:$0xf]  ;;  %v2486_v60 = vld [vmem:[%s3880_s0 + $0x3d8] sm:$0xf0] }
 0x1c5   :  { %v1944_v12 = vadd.f32 %v1943_v61, %v1881_v10 }
 0x1c6   :  { %v1474_v13 = vpop.f32.mrf.mxu2  ;;  %v1138_v16 = vpop.f32.mrf.mxu0 }
 0x1c7   :  { %v1643_v14 = vpop.f32.mrf.mxu3  ;;  %v1475_v15 = vadd.f32 %v1474_v13, %v1306_v11  ;;  %v1307_v17 = vpop.f32.mrf.mxu1 }
 0x1c8   :  { %v1308_v30 = vadd.f32 %v1307_v17, %v1138_v16 }
 0x1c9   :  { %v1644_v18 = vadd.f32 %v1643_v14, %v1475_v15 }
 0x1cb   :  { %1749 = vst [vmem:[%s3881_s2 + $0x120] sm:$0xff] %v1644_v18  ;;  %v1812_v22 = vadd.f32 %v1811_v9, %v1644_v18  ;;  %v1882_v23 = vmul.f32 %v1644_v18, %v1644_v18 }
 0x1cd   :  { %v1945_v29 = vadd.f32 %v1944_v12, %v1882_v23 }
 0x1ce   :  { %v1476_v31 = vpop.f32.mrf.mxu2  ;;  %v1141_v36 = vpop.f32.mrf.mxu0 }
 0x1cf   :  { %v1645_v32 = vpop.f32.mrf.mxu3  ;;  %v1477_v35 = vadd.f32 %v1476_v31, %v1308_v30  ;;  %v1310_v37 = vpop.f32.mrf.mxu1 }
 0x1d0   :  { %v1311_v43 = vadd.f32 %v1310_v37, %v1141_v36 }
 0x1d1   :  { %v1646_v40 = vadd.f32 %v1645_v32, %v1477_v35  ;;  %1180 = vmatmul.bf16.gmra.mxu0 %v2429_v33  ;;  %v2461_v33 = vor.u32 %v2752_v20, %v2460_v19  ;;  %v2492_v19 = vld [vmem:[%s3880_s0 + $0x3e0] sm:$0xf]  ;;  %v2760_v20 = vld [vmem:[%s3880_s0 + $0x3ec] sm:$0xf0] }
 0x1d2   :  { %1349 = vmatmul.bf16.gmra.mxu1 %v2433_v34  ;;  %v2465_v34 = vor.u32 %v2750_v21, %v2462_v24  ;;  %v2758_v21 = vld [vmem:[%s3880_s0 + $0x3e4] sm:$0xf]  ;;  %v2494_v24 = vld [vmem:[%s3880_s0 + $0x3f0] sm:$0xf0] }
 0x1d3   :  { %1750 = vst [vmem:[%s3881_s2 + $0x128] sm:$0xff] %v1646_v40  ;;  %v1813_v41 = vadd.f32 %v1812_v22, %v1646_v40  ;;  %v1883_v42 = vmul.f32 %v1646_v40, %v1646_v40  ;;  %1518 = vmatmul.bf16.gmra.mxu2 %v2437_v38  ;;  %v2469_v38 = vor.u32 %v2753_v26, %v2468_v25  ;;  %v2500_v25 = vld [vmem:[%s3880_s0 + $0x3e8] sm:$0xf]  ;;  %v2761_v26 = vld [vmem:[%s3880_s0 + $0x3f4] sm:$0xf0] }
 0x1d4   :  { %1687 = vmatmul.bf16.gmra.mxu3 %v2441_v39  ;;  %v2473_v39 = vor.u32 %v2751_v27, %v2470_v28  ;;  %v2759_v27 = vld [vmem:[%s3880_s0 + $0x3ec] sm:$0xf]  ;;  %v2502_v28 = vld [vmem:[%s3880_s0 + $0x3f8] sm:$0xf0] }
 0x1d5   :  { %v1946_v44 = vadd.f32 %v1945_v29, %v1883_v42 }
 0x1d6   :  { %v1479_v45 = vpop.f32.mrf.mxu2  ;;  %v1143_v48 = vpop.f32.mrf.mxu0 }
 0x1d7   :  { %v1648_v46 = vpop.f32.mrf.mxu3  ;;  %v1480_v47 = vadd.f32 %v1479_v45, %v1311_v43  ;;  %v1312_v49 = vpop.f32.mrf.mxu1 }
 0x1d8   :  { %v1313_v62 = vadd.f32 %v1312_v49, %v1143_v48 }
 0x1d9   :  { %v1649_v50 = vadd.f32 %v1648_v46, %v1480_v47 }
 0x1db   :  { %1751 = vst [vmem:[%s3881_s2 + $0x130] sm:$0xff] %v1649_v50  ;;  %v1814_v54 = vadd.f32 %v1813_v41, %v1649_v50  ;;  %v1884_v55 = vmul.f32 %v1649_v50, %v1649_v50 }
 0x1dd   :  { %v1947_v61 = vadd.f32 %v1946_v44, %v1884_v55 }
 0x1de   :  { %v1481_v63 = vpop.f32.mrf.mxu2  ;;  %v1146_v4 = vpop.f32.mrf.mxu0 }
 0x1df   :  { %v1650_v0 = vpop.f32.mrf.mxu3  ;;  %v1482_v3 = vadd.f32 %v1481_v63, %v1313_v62  ;;  %v1315_v5 = vpop.f32.mrf.mxu1 }
 0x1e0   :  { %v1316_v11 = vadd.f32 %v1315_v5, %v1146_v4 }
 0x1e1   :  { %v1651_v8 = vadd.f32 %v1650_v0, %v1482_v3  ;;  %1185 = vmatmul.bf16.gmra.mxu0 %v2445_v1  ;;  %v2477_v1 = vor.u32 %v2756_v52, %v2476_v51 }
 0x1e2   :  { %1354 = vmatmul.bf16.gmra.mxu1 %v2449_v2  ;;  %v2481_v2 = vor.u32 %v2754_v53, %v2478_v56 }
 0x1e3   :  { %1752 = vst [vmem:[%s3881_s2 + $0x138] sm:$0xff] %v1651_v8  ;;  %v1815_v9 = vadd.f32 %v1814_v54, %v1651_v8  ;;  %v1885_v10 = vmul.f32 %v1651_v8, %v1651_v8  ;;  %1523 = vmatmul.bf16.gmra.mxu2 %v2453_v6  ;;  %v2485_v6 = vor.u32 %v2757_v58, %v2484_v57 }
 0x1e4   :  { %1692 = vmatmul.bf16.gmra.mxu3 %v2457_v7  ;;  %v2489_v7 = vor.u32 %v2755_v59, %v2486_v60 }
 0x1e5   :  { %v1948_v12 = vadd.f32 %v1947_v61, %v1885_v10 }
 0x1e6   :  { %v1484_v13 = vpop.f32.mrf.mxu2  ;;  %v1148_v16 = vpop.f32.mrf.mxu0 }
 0x1e7   :  { %v1653_v14 = vpop.f32.mrf.mxu3  ;;  %v1485_v15 = vadd.f32 %v1484_v13, %v1316_v11  ;;  %v1317_v17 = vpop.f32.mrf.mxu1 }
 0x1e8   :  { %v1318_v30 = vadd.f32 %v1317_v17, %v1148_v16 }
 0x1e9   :  { %v1654_v18 = vadd.f32 %v1653_v14, %v1485_v15 }
 0x1eb   :  { %1753 = vst [vmem:[%s3881_s2 + $0x140] sm:$0xff] %v1654_v18  ;;  %v1816_v22 = vadd.f32 %v1815_v9, %v1654_v18  ;;  %v1886_v23 = vmul.f32 %v1654_v18, %v1654_v18 }
 0x1ed   :  { %v1949_v29 = vadd.f32 %v1948_v12, %v1886_v23 }
 0x1ee   :  { %v1486_v31 = vpop.f32.mrf.mxu2  ;;  %v1151_v36 = vpop.f32.mrf.mxu0 }
 0x1ef   :  { %v1655_v32 = vpop.f32.mrf.mxu3  ;;  %v1487_v35 = vadd.f32 %v1486_v31, %v1318_v30  ;;  %v1320_v37 = vpop.f32.mrf.mxu1 }
 0x1f0   :  { %v1321_v43 = vadd.f32 %v1320_v37, %v1151_v36 }
 0x1f1   :  { %v1656_v40 = vadd.f32 %v1655_v32, %v1487_v35  ;;  %1190 = vmatmul.bf16.gmra.mxu0 %v2461_v33  ;;  %v2493_v33 = vor.u32 %v2760_v20, %v2492_v19 }
 0x1f2   :  { %1359 = vmatmul.bf16.gmra.mxu1 %v2465_v34  ;;  %v2497_v34 = vor.u32 %v2758_v21, %v2494_v24 }
 0x1f3   :  { %1754 = vst [vmem:[%s3881_s2 + $0x148] sm:$0xff] %v1656_v40  ;;  %v1817_v41 = vadd.f32 %v1816_v22, %v1656_v40  ;;  %v1887_v42 = vmul.f32 %v1656_v40, %v1656_v40  ;;  %1528 = vmatmul.bf16.gmra.mxu2 %v2469_v38  ;;  %v2501_v38 = vor.u32 %v2761_v26, %v2500_v25 }
 0x1f4   :  { %1697 = vmatmul.bf16.gmra.mxu3 %v2473_v39  ;;  %v2505_v39 = vor.u32 %v2759_v27, %v2502_v28 }
 0x1f5   :  { %v1950_v44 = vadd.f32 %v1949_v29, %v1887_v42 }
 0x1f6   :  { %v1489_v45 = vpop.f32.mrf.mxu2  ;;  %v1153_v48 = vpop.f32.mrf.mxu0 }
 0x1f7   :  { %v1658_v46 = vpop.f32.mrf.mxu3  ;;  %v1490_v47 = vadd.f32 %v1489_v45, %v1321_v43  ;;  %v1322_v49 = vpop.f32.mrf.mxu1 }
 0x1f8   :  { %v1323_v62 = vadd.f32 %v1322_v49, %v1153_v48 }
 0x1f9   :  { %v1659_v50 = vadd.f32 %v1658_v46, %v1490_v47 }
 0x1fb   :  { %1755 = vst [vmem:[%s3881_s2 + $0x150] sm:$0xff] %v1659_v50  ;;  %v1818_v54 = vadd.f32 %v1817_v41, %v1659_v50  ;;  %v1888_v55 = vmul.f32 %v1659_v50, %v1659_v50 }
 0x1fd   :  { %v1951_v61 = vadd.f32 %v1950_v44, %v1888_v55 }
 0x1fe   :  { %v1491_v63 = vpop.f32.mrf.mxu2  ;;  %v1156_v4 = vpop.f32.mrf.mxu0 }
 0x1ff   :  { %v1660_v0 = vpop.f32.mrf.mxu3  ;;  %v1492_v3 = vadd.f32 %v1491_v63, %v1323_v62  ;;  %v1325_v5 = vpop.f32.mrf.mxu1 }
 0x200   :  { %v1326_v11 = vadd.f32 %v1325_v5, %v1156_v4 }
 0x201   :  { %v1661_v8 = vadd.f32 %v1660_v0, %v1492_v3  ;;  %1195 = vmatmul.bf16.gmra.mxu0 %v2477_v1 }
 0x202   :  { %1364 = vmatmul.bf16.gmra.mxu1 %v2481_v2 }
 0x203   :  { %1756 = vst [vmem:[%s3881_s2 + $0x158] sm:$0xff] %v1661_v8  ;;  %v1819_v9 = vadd.f32 %v1818_v54, %v1661_v8  ;;  %v1889_v10 = vmul.f32 %v1661_v8, %v1661_v8  ;;  %1533 = vmatmul.bf16.gmra.mxu2 %v2485_v6 }
 0x204   :  { %1702 = vmatmul.bf16.gmra.mxu3 %v2489_v7 }
 0x205   :  { %v1952_v12 = vadd.f32 %v1951_v61, %v1889_v10 }
 0x206   :  { %v1494_v13 = vpop.f32.mrf.mxu2  ;;  %v1158_v16 = vpop.f32.mrf.mxu0 }
 0x207   :  { %v1663_v14 = vpop.f32.mrf.mxu3  ;;  %v1495_v15 = vadd.f32 %v1494_v13, %v1326_v11  ;;  %v1327_v17 = vpop.f32.mrf.mxu1 }
 0x208   :  { %v1328_v30 = vadd.f32 %v1327_v17, %v1158_v16 }
 0x209   :  { %v1664_v18 = vadd.f32 %v1663_v14, %v1495_v15 }
 0x20b   :  { %1757 = vst [vmem:[%s3881_s2 + $0x160] sm:$0xff] %v1664_v18  ;;  %v1820_v22 = vadd.f32 %v1819_v9, %v1664_v18  ;;  %v1890_v23 = vmul.f32 %v1664_v18, %v1664_v18 }
 0x20d   :  { %v1953_v29 = vadd.f32 %v1952_v12, %v1890_v23 }
 0x20e   :  { %v1496_v31 = vpop.f32.mrf.mxu2  ;;  %v1161_v36 = vpop.f32.mrf.mxu0 }
 0x20f   :  { %v1665_v32 = vpop.f32.mrf.mxu3  ;;  %v1497_v35 = vadd.f32 %v1496_v31, %v1328_v30  ;;  %v1330_v37 = vpop.f32.mrf.mxu1 }
 0x210   :  { %v1331_v43 = vadd.f32 %v1330_v37, %v1161_v36 }
 0x211   :  { %v1666_v40 = vadd.f32 %v1665_v32, %v1497_v35  ;;  %1200 = vmatmul.bf16.gmra.mxu0 %v2493_v33 }
 0x212   :  { %1369 = vmatmul.bf16.gmra.mxu1 %v2497_v34 }
 0x213   :  { %1758 = vst [vmem:[%s3881_s2 + $0x168] sm:$0xff] %v1666_v40  ;;  %v1821_v41 = vadd.f32 %v1820_v22, %v1666_v40  ;;  %v1891_v42 = vmul.f32 %v1666_v40, %v1666_v40  ;;  %1538 = vmatmul.bf16.gmra.mxu2 %v2501_v38 }
 0x214   :  { %1707 = vmatmul.bf16.gmra.mxu3 %v2505_v39 }
 0x215   :  { %v1954_v44 = vadd.f32 %v1953_v29, %v1891_v42 }
 0x216   :  { %v1499_v45 = vpop.f32.mrf.mxu2  ;;  %v1163_v48 = vpop.f32.mrf.mxu0 }
 0x217   :  { %v1668_v46 = vpop.f32.mrf.mxu3  ;;  %v1500_v47 = vadd.f32 %v1499_v45, %v1331_v43  ;;  %v1332_v49 = vpop.f32.mrf.mxu1 }
 0x218   :  { %v1333_v54 = vadd.f32 %v1332_v49, %v1163_v48 }
 0x219   :  { %v1669_v50 = vadd.f32 %v1668_v46, %v1500_v47 }
 0x21b   :  { %1759 = vst [vmem:[%s3881_s2 + $0x170] sm:$0xff] %v1669_v50  ;;  %v1822_v51 = vadd.f32 %v1821_v41, %v1669_v50  ;;  %v1892_v52 = vmul.f32 %v1669_v50, %v1669_v50 }
 0x21d   :  { %v1955_v53 = vadd.f32 %v1954_v44, %v1892_v52 }
 0x21e   :  { %v1501_v55 = vpop.f32.mrf.mxu2  ;;  %v1166_v58 = vpop.f32.mrf.mxu0 }
 0x21f   :  { %v1670_v56 = vpop.f32.mrf.mxu3  ;;  %v1502_v57 = vadd.f32 %v1501_v55, %v1333_v54  ;;  %v1335_v59 = vpop.f32.mrf.mxu1 }
 0x220   :  { %v1336_v63 = vadd.f32 %v1335_v59, %v1166_v58 }
 0x221   :  { %v1671_v60 = vadd.f32 %v1670_v56, %v1502_v57 }
 0x223   :  { %1760 = vst [vmem:[%s3881_s2 + $0x178] sm:$0xff] %v1671_v60  ;;  %v1823_v61 = vadd.f32 %v1822_v51, %v1671_v60  ;;  %v1893_v62 = vmul.f32 %v1671_v60, %v1671_v60 }
 0x225   :  { %v1956_v0 = vadd.f32 %v1955_v53, %v1893_v62 }
 0x226   :  { %v1504_v1 = vpop.f32.mrf.mxu2  ;;  %v1168_v4 = vpop.f32.mrf.mxu0 }
 0x227   :  { %v1673_v2 = vpop.f32.mrf.mxu3  ;;  %v1505_v3 = vadd.f32 %v1504_v1, %v1336_v63  ;;  %v1337_v5 = vpop.f32.mrf.mxu1 }
 0x228   :  { %v1338_v10 = vadd.f32 %v1337_v5, %v1168_v4 }
 0x229   :  { %v1674_v6 = vadd.f32 %v1673_v2, %v1505_v3 }
 0x22b   :  { %1761 = vst [vmem:[%s3881_s2 + $0x180] sm:$0xff] %v1674_v6  ;;  %v1824_v7 = vadd.f32 %v1823_v61, %v1674_v6  ;;  %v1894_v8 = vmul.f32 %v1674_v6, %v1674_v6 }
 0x22d   :  { %v1957_v9 = vadd.f32 %v1956_v0, %v1894_v8 }
 0x22e   :  { %v1506_v11 = vpop.f32.mrf.mxu2  ;;  %v1171_v14 = vpop.f32.mrf.mxu0 }
 0x22f   :  { %v1675_v12 = vpop.f32.mrf.mxu3  ;;  %v1507_v13 = vadd.f32 %v1506_v11, %v1338_v10  ;;  %v1340_v15 = vpop.f32.mrf.mxu1 }
 0x230   :  { %v1341_v19 = vadd.f32 %v1340_v15, %v1171_v14 }
 0x231   :  { %v1676_v16 = vadd.f32 %v1675_v12, %v1507_v13 }
 0x233   :  { %1762 = vst [vmem:[%s3881_s2 + $0x188] sm:$0xff] %v1676_v16  ;;  %v1825_v17 = vadd.f32 %v1824_v7, %v1676_v16  ;;  %v1895_v18 = vmul.f32 %v1676_v16, %v1676_v16 }
 0x235   :  { %v1958_v20 = vadd.f32 %v1957_v9, %v1895_v18 }
 0x236   :  { %v1509_v21 = vpop.f32.mrf.mxu2  ;;  %v1173_v24 = vpop.f32.mrf.mxu0 }
 0x237   :  { %v1678_v22 = vpop.f32.mrf.mxu3  ;;  %v1510_v23 = vadd.f32 %v1509_v21, %v1341_v19  ;;  %v1342_v25 = vpop.f32.mrf.mxu1 }
 0x238   :  { %v1343_v30 = vadd.f32 %v1342_v25, %v1173_v24 }
 0x239   :  { %v1679_v26 = vadd.f32 %v1678_v22, %v1510_v23 }
 0x23b   :  { %1763 = vst [vmem:[%s3881_s2 + $0x190] sm:$0xff] %v1679_v26  ;;  %v1826_v27 = vadd.f32 %v1825_v17, %v1679_v26  ;;  %v1896_v28 = vmul.f32 %v1679_v26, %v1679_v26 }
 0x23d   :  { %v1959_v29 = vadd.f32 %v1958_v20, %v1896_v28 }
 0x23e   :  { %v1511_v31 = vpop.f32.mrf.mxu2  ;;  %v1176_v34 = vpop.f32.mrf.mxu0 }
 0x23f   :  { %v1680_v32 = vpop.f32.mrf.mxu3  ;;  %v1512_v33 = vadd.f32 %v1511_v31, %v1343_v30  ;;  %v1345_v35 = vpop.f32.mrf.mxu1 }
 0x240   :  { %v1346_v39 = vadd.f32 %v1345_v35, %v1176_v34 }
 0x241   :  { %v1681_v36 = vadd.f32 %v1680_v32, %v1512_v33 }
 0x243   :  { %1764 = vst [vmem:[%s3881_s2 + $0x198] sm:$0xff] %v1681_v36  ;;  %v1827_v37 = vadd.f32 %v1826_v27, %v1681_v36  ;;  %v1897_v38 = vmul.f32 %v1681_v36, %v1681_v36 }
 0x245   :  { %v1960_v40 = vadd.f32 %v1959_v29, %v1897_v38 }
 0x246   :  { %v1514_v41 = vpop.f32.mrf.mxu2  ;;  %v1178_v44 = vpop.f32.mrf.mxu0 }
 0x247   :  { %v1683_v42 = vpop.f32.mrf.mxu3  ;;  %v1515_v43 = vadd.f32 %v1514_v41, %v1346_v39  ;;  %v1347_v45 = vpop.f32.mrf.mxu1 }
 0x248   :  { %v1348_v50 = vadd.f32 %v1347_v45, %v1178_v44 }
 0x249   :  { %v1684_v46 = vadd.f32 %v1683_v42, %v1515_v43 }
 0x24b   :  { %1765 = vst [vmem:[%s3881_s2 + $0x1a0] sm:$0xff] %v1684_v46  ;;  %v1828_v47 = vadd.f32 %v1827_v37, %v1684_v46  ;;  %v1898_v48 = vmul.f32 %v1684_v46, %v1684_v46 }
 0x24d   :  { %v3837_v49 = vadd.f32 %v1960_v40, %v1898_v48 }
 0x24e   :  { %v1516_v51 = vpop.f32.mrf.mxu2  ;;  %v1181_v54 = vpop.f32.mrf.mxu0 }
 0x24f   :  { %v1685_v52 = vpop.f32.mrf.mxu3  ;;  %v1517_v53 = vadd.f32 %v1516_v51, %v1348_v50  ;;  %v1350_v55 = vpop.f32.mrf.mxu1 }
 0x250   :  { %v1351_v58 = vadd.f32 %v1350_v55, %v1181_v54 }
 0x251   :  { %v1686_v56 = vadd.f32 %v1685_v52, %v1517_v53 }
 0x253   :  { %1766 = vst [vmem:[%s3881_s2 + $0x1a8] sm:$0xff] %v1686_v56  ;;  %v3842_v57 = vadd.f32 %v1828_v47, %v1686_v56  ;;  %v1899_v43 = vmul.f32 %v1686_v56, %v1686_v56 }
 0x255   :  { %v1962_v52 = vadd.f32 %v3837_v49, %v1899_v43 }
 0x256   :  { %v1519_v59 = vpop.f32.mrf.mxu2  ;;  %v1183_v62 = vpop.f32.mrf.mxu0 }
 0x257   :  { %v1688_v60 = vpop.f32.mrf.mxu3  ;;  %v1520_v61 = vadd.f32 %v1519_v59, %v1351_v58  ;;  %v1352_v63 = vpop.f32.mrf.mxu1 }
 0x258   :  { %v1353_v1 = vadd.f32 %v1352_v63, %v1183_v62 }
 0x259   :  { %v1689_v0 = vadd.f32 %v1688_v60, %v1520_v61 }
 0x25b   :  { %1767 = vst [vmem:[%s3881_s2 + $0x1b0] sm:$0xff] %v1689_v0  ;;  %v1900_v47 = vmul.f32 %v1689_v0, %v1689_v0  ;;  %v1830_v53 = vadd.f32 %v3842_v57, %v1689_v0 }
 0x25d   :  { %v1963_v58 = vadd.f32 %v1962_v52, %v1900_v47 }
 0x25e   :  { %v1521_v2 = vpop.f32.mrf.mxu2  ;;  %v1186_v5 = vpop.f32.mrf.mxu0 }
 0x25f   :  { %v1690_v3 = vpop.f32.mrf.mxu3  ;;  %v1522_v4 = vadd.f32 %v1521_v2, %v1353_v1  ;;  %v1355_v6 = vpop.f32.mrf.mxu1 }
 0x260   :  { %v1356_v8 = vadd.f32 %v1355_v6, %v1186_v5 }
 0x261   :  { %v1691_v7 = vadd.f32 %v1690_v3, %v1522_v4 }
 0x263   :  { %1768 = vst [vmem:[%s3881_s2 + $0x1b8] sm:$0xff] %v1691_v7  ;;  %v1901_v54 = vmul.f32 %v1691_v7, %v1691_v7  ;;  %v1831_v59 = vadd.f32 %v1830_v53, %v1691_v7 }
 0x265   :  { %v1964_v61 = vadd.f32 %v1963_v58, %v1901_v54 }
 0x266   :  { %v1524_v9 = vpop.f32.mrf.mxu2  ;;  %v1188_v12 = vpop.f32.mrf.mxu0 }
 0x267   :  { %v1693_v10 = vpop.f32.mrf.mxu3  ;;  %v1525_v11 = vadd.f32 %v1524_v9, %v1356_v8  ;;  %v1357_v13 = vpop.f32.mrf.mxu1 }
 0x268   :  { %v1358_v15 = vadd.f32 %v1357_v13, %v1188_v12 }
 0x269   :  { %v1694_v14 = vadd.f32 %v1693_v10, %v1525_v11 }
 0x26b   :  { %1769 = vst [vmem:[%s3881_s2 + $0x1c0] sm:$0xff] %v1694_v14  ;;  %v1902_v60 = vmul.f32 %v1694_v14, %v1694_v14  ;;  %v1832_v62 = vadd.f32 %v1831_v59, %v1694_v14 }
 0x26d   :  { %v1965_v3 = vadd.f32 %v1964_v61, %v1902_v60 }
 0x26e   :  { %v1526_v16 = vpop.f32.mrf.mxu2  ;;  %v1191_v19 = vpop.f32.mrf.mxu0 }
 0x26f   :  { %v1695_v17 = vpop.f32.mrf.mxu3  ;;  %v1527_v18 = vadd.f32 %v1526_v16, %v1358_v15  ;;  %v1360_v20 = vpop.f32.mrf.mxu1 }
 0x270   :  { %v1361_v22 = vadd.f32 %v1360_v20, %v1191_v19 }
 0x271   :  { %v1696_v21 = vadd.f32 %v1695_v17, %v1527_v18 }
 0x273   :  { %1770 = vst [vmem:[%s3881_s2 + $0x1c8] sm:$0xff] %v1696_v21  ;;  %v1903_v63 = vmul.f32 %v1696_v21, %v1696_v21  ;;  %v1833_v4 = vadd.f32 %v1832_v62, %v1696_v21 }
 0x275   :  { %v1966_v57 = vadd.f32 %v1965_v3, %v1903_v63 }
 0x276   :  { %v1529_v23 = vpop.f32.mrf.mxu2  ;;  %v1193_v26 = vpop.f32.mrf.mxu0 }
 0x277   :  { %v1698_v24 = vpop.f32.mrf.mxu3  ;;  %v1530_v25 = vadd.f32 %v1529_v23, %v1361_v22  ;;  %v1362_v27 = vpop.f32.mrf.mxu1 }
 0x278   :  { %v1363_v29 = vadd.f32 %v1362_v27, %v1193_v26 }
 0x279   :  { %v1699_v28 = vadd.f32 %v1698_v24, %v1530_v25 }
 0x27b   :  { %1771 = vst [vmem:[%s3881_s2 + $0x1d0] sm:$0xff] %v1699_v28  ;;  %v1904_v49 = vmul.f32 %v1699_v28, %v1699_v28  ;;  %v1834_v0 = vadd.f32 %v1833_v4, %v1699_v28 }
 0x27d   :  { %v1967_v10 = vadd.f32 %v1966_v57, %v1904_v49 }
 0x27e   :  { %v1531_v30 = vpop.f32.mrf.mxu2  ;;  %v1196_v33 = vpop.f32.mrf.mxu0 }
 0x27f   :  { %v1700_v31 = vpop.f32.mrf.mxu3  ;;  %v1532_v32 = vadd.f32 %v1531_v30, %v1363_v29  ;;  %v1365_v34 = vpop.f32.mrf.mxu1 }
 0x280   :  { %v1366_v36 = vadd.f32 %v1365_v34, %v1196_v33  ;;  %v1979_v33 = vlaneseq }
 0x281   :  { %v1701_v35 = vadd.f32 %v1700_v31, %v1532_v32 }
 0x283   :  { %1772 = vst [vmem:[%s3881_s2 + $0x1d8] sm:$0xff] %v1701_v35  ;;  %v1905_v6 = vmul.f32 %v1701_v35, %v1701_v35  ;;  %v1835_v11 = vadd.f32 %v1834_v0, %v1701_v35 }
 0x285   :  { %v1968_v13 = vadd.f32 %v1967_v10, %v1905_v6 }
 0x286   :  { %v1534_v37 = vpop.f32.mrf.mxu2  ;;  %v1198_v40 = vpop.f32.mrf.mxu0 }
 0x287   :  { %v1703_v38 = vpop.f32.mrf.mxu3  ;;  %v1535_v39 = vadd.f32 %v1534_v37, %v1366_v36  ;;  %v1367_v41 = vpop.f32.mrf.mxu1 }
 0x288   :  { %v1368_v44 = vadd.f32 %v1367_v41, %v1198_v40 }
 0x289   :  { %v1704_v42 = vadd.f32 %v1703_v38, %v1535_v39  ;;  %v1980_v38 = vshrl.u32 %v1979_v33, 7 }
 0x28b   :  { %1773 = vst [vmem:[%s3881_s2 + $0x1e0] sm:$0xff] %v1704_v42  ;;  %v1906_v12 = vmul.f32 %v1704_v42, %v1704_v42  ;;  %v1836_v14 = vadd.f32 %v1835_v11, %v1704_v42  ;;  %vm1982_vm0 = vcmp.eq.s32.totalorder %v1980_v38, 1  ;;  %vm1981_vm1 = vcmp.eq.s32.totalorder %v1980_v38, 0 }
 0x28d   :  { %v1969_v18 = vadd.f32 %v1968_v13, %v1906_v12 }
 0x28e   :  { %v1536_v45 = vpop.f32.mrf.mxu2  ;;  %v1201_v50 = vpop.f32.mrf.mxu0 }
 0x28f   :  { %v1705_v46 = vpop.f32.mrf.mxu3  ;;  %v1537_v48 = vadd.f32 %v1536_v45, %v1368_v44  ;;  %v1370_v51 = vpop.f32.mrf.mxu1 }
 0x290   :  { %v1371_v56 = vadd.f32 %v1370_v51, %v1201_v50 }
 0x291   :  { %v1706_v55 = vadd.f32 %v1705_v46, %v1537_v48 }
 0x293   :  { %1774 = vst [vmem:[%s3881_s2 + $0x1e8] sm:$0xff] %v1706_v55  ;;  %v1907_v15 = vmul.f32 %v1706_v55, %v1706_v55  ;;  %v1837_v19 = vadd.f32 %v1836_v14, %v1706_v55 }
 0x295   :  { %v1970_v23 = vadd.f32 %v1969_v18, %v1907_v15 }
 0x296   :  { %v1539_v1 = vpop.f32.mrf.mxu2  ;;  %v1203_v7 = vpop.f32.mrf.mxu0 }
 0x297   :  { %v1708_v2 = vpop.f32.mrf.mxu3  ;;  %v1540_v5 = vadd.f32 %v1539_v1, %v1371_v56  ;;  %v1372_v9 = vpop.f32.mrf.mxu1 }
 0x298   :  { %v1373_v16 = vadd.f32 %v1372_v9, %v1203_v7 }
 0x299   :  { %v1709_v8 = vadd.f32 %v1708_v2, %v1540_v5 }
 0x29b   :  { %1775 = vst [vmem:[%s3881_s2 + $0x1f0] sm:$0xff] %v1709_v8  ;;  %v1908_v20 = vmul.f32 %v1709_v8, %v1709_v8  ;;  %v1838_v24 = vadd.f32 %v1837_v19, %v1709_v8 }
 0x29d   :  { %v1971_v26 = vadd.f32 %v1970_v23, %v1908_v20 }
 0x29e   :  { %v1541_v17 = vpop.f32.mrf.mxu2 }
 0x29f   :  { %v1542_v21 = vadd.f32 %v1541_v17, %v1373_v16  ;;  %v1710_v22 = vpop.f32.mrf.mxu3 }
 0x2a1   :  { %v1711_v25 = vadd.f32 %v1710_v22, %v1542_v21 }
 0x2a3   :  { %1776 = vst [vmem:[%s3881_s2 + $0x1f8] sm:$0xff] %v1711_v25  ;;  %v1839_v27 = vadd.f32 %v1838_v24, %v1711_v25  ;;  %v1909_v28 = vmul.f32 %v1711_v25, %v1711_v25 }
 0x2a5   :  { %v1840_v29 = vrot.slane %v1839_v27, 4  ;;  %v1972_v30 = vadd.f32 %v1971_v26, %v1909_v28 }
 0x2a7   :  { %v1841_v31 = vadd.f32 %v1840_v29, %v1839_v27  ;;  %v1973_v32 = vrot.slane %v1972_v30, 4 }
 0x2a9   :  { %v1842_v34 = vrot.slane %v1841_v31, 2  ;;  %v1974_v35 = vadd.f32 %v1973_v32, %v1972_v30 }
 0x2ab   :  { %v1843_v36 = vadd.f32 %v1842_v34, %v1841_v31  ;;  %v1975_v37 = vrot.slane %v1974_v35, 2 }
 0x2ad   :  { %v1976_v39 = vadd.f32 %v1975_v37, %v1974_v35  ;;  %v1844_v40 = vrot.slane %v1843_v36, 1 }
 0x2af   :  { %v1977_v41 = vrot.slane %v1976_v39, 1  ;;  %v1845_v43 = vadd.f32 %v1844_v40, %v1843_v36 }
 0x2b1   :  { %v1978_v42 = vadd.f32 %v1977_v41, %v1976_v39 }
 0x2b3   :  { %v1983_v44 = vsel %vm1982_vm0, %v1978_v42, 0.0 }
 0x2b4   :  { %v1984_v45 = vsel %vm1981_vm1, %v1845_v43, %v1983_v44 }
 0x2b5   :  { %1985 = vst [vmem:[%s3882_s3] sm:$0xff] %v1984_v45 }

// kernel: forward.13
= control target key start
LH: loop header
LB: loop body
LE: loop exit
PB: predicated region body
PF: predicated region fallthrough
CT: control target
= control target key end

     0   :  { %s1810_s12 = smov 0   ;;  %s2141_s0 = inlined_call_operand.vmem [shape: bf16[2048,256], index: 0, kind: input, shape index: {}]   ;;  %s2142_s1 = inlined_call_operand.vmem [shape: bf16[256,128], index: 1, kind: input, shape index: {}]   ;;  %s2143_s2 = inlined_call_operand.vmem [shape: f32[1,128], index: 2, kind: input, shape index: {}]   ;;  %s2144_s3 = inlined_call_operand.vmem [shape: f32[2048,128], index: 3, kind: output, shape index: {}]  }
   0x1 LB: > { %s1215_s13 = sadd.s32 4294967295, %s1788_s12   ;;  %p1219_p0 = scmp.ge.s32.totalorder %s1788_s12, 1  ;;  %s1788_s12 = sphi %s1810_s12, %s13_s12  }
   0x2   : > { %p139_p1 = scmp.lt.s32.totalorder %s1788_s12, 5 }
   0x4   : > { %p140_p2 = pnand %p1219_p0, %p139_p1 }
   0x5   : > { %s1220_s26 = sshll.u32 (!%p140_p2), %s1215_s13, 6 }
   0x6   : > { %143 = sbr.rel (%p140_p2) target bundleno = 435 (0x1b3), region = 32  ;;  %p165_p3 = scmp.lt.s32.totalorder (!%p140_p2), %s1220_s26, 255 }
   0xb   : > { %v1619_v0 = vld [vmem:[%s2142_s1 + $0x38] sm:$0xff]  ;;  %v1618_v2 = vld [vmem:[%s2142_s1 + $0x30] sm:$0xff]  ;;  %v1617_v4 = vld [vmem:[%s2142_s1 + $0x28] sm:$0xff]  ;;  %s2146_s26 = smov (!%p165_p3, %s1220_s26), 255 }
   0xc   : > { %v1627_v1 = vld [vmem:[%s2142_s1 + $0x78] sm:$0xff]  ;;  %693 = vmatpush.bf16.msra.mxu0 %v1619_v0  ;;  %1628 = vmatpush.bf16.msra.mxu2 %v1619_v0  ;;  %v1626_v3 = vld [vmem:[%s2142_s1 + $0x70] sm:$0xff]  ;;  %v1625_v5 = vld [vmem:[%s2142_s1 + $0x68] sm:$0xff]  ;;  %s1547_s13 = sshll.u32 %s2146_s26, 3 }
   0xd   : > { %862 = vmatpush.bf16.msra.mxu1 %v1627_v1  ;;  %1636 = vmatpush.bf16.msra.mxu3 %v1627_v1  ;;  %v1616_v6 = vld [vmem:[%s2142_s1 + $0x20] sm:$0xff]  ;;  %v1615_v8 = vld [vmem:[%s2142_s1 + $0x18] sm:$0xff]  ;;  %v1614_v10 = vld [vmem:[%s2142_s1 + $0x10] sm:$0xff]  ;;  %s1865_s18 = scalar_lea.vmem %s2141_s0, %s1547_s13  ;;  %s1960_s30 = scalar_lea.vmem %s2144_s3, %s1547_s13 }
   0xe   : > { %v1624_v7 = vld [vmem:[%s2142_s1 + $0x60] sm:$0xff]  ;;  %v1623_v9 = vld [vmem:[%s2142_s1 + $0x58] sm:$0xff]  ;;  %v1622_v11 = vld [vmem:[%s2142_s1 + $0x50] sm:$0xff] }
   0xf   : > { %v1613_v12 = vld [vmem:[%s2142_s1 + $0x8] sm:$0xff]  ;;  %v1612_v14 = vld [vmem:[%s2142_s1] sm:$0xff]  ;;  %v1235_v28 = vld [vmem:[%s1865_s18 + $0x10] sm:$0xf] }
  0x10   : > { %694 = vmatpush.bf16.msra.mxu0 %v1618_v2  ;;  %1629 = vmatpush.bf16.msra.mxu2 %v1618_v2  ;;  %v1621_v13 = vld [vmem:[%s2142_s1 + $0x48] sm:$0xff]  ;;  %v1620_v15 = vld [vmem:[%s2142_s1 + $0x40] sm:$0xff]  ;;  %v1551_v29 = vld [vmem:[%s1865_s18 + $0x14] sm:$0xf0] }
  0x11   : > { %863 = vmatpush.bf16.msra.mxu1 %v1626_v3  ;;  %1637 = vmatpush.bf16.msra.mxu3 %v1626_v3  ;;  %v1227_v16 = vld [vmem:[%s1865_s18] sm:$0xf]  ;;  %v1549_v17 = vld [vmem:[%s1865_s18 + $0x4] sm:$0xf0]  ;;  %v1548_v20 = vld [vmem:[%s1865_s18 + $0x4] sm:$0xf]  ;;  %v1236_v36 = vor.u32 %v1551_v29, %v1235_v28 }
  0x12   : > { %v1355_v18 = vld [vmem:[%s1865_s18 + $0x100] sm:$0xf]  ;;  %v1581_v19 = vld [vmem:[%s1865_s18 + $0x104] sm:$0xf0]  ;;  %v1229_v21 = vld [vmem:[%s1865_s18 + $0x8] sm:$0xf0]  ;;  %v1228_v24 = vor.u32 %v1549_v17, %v1227_v16 }
  0x13   : > { %v1580_v22 = vld [vmem:[%s1865_s18 + $0x104] sm:$0xf]  ;;  %v1357_v23 = vld [vmem:[%s1865_s18 + $0x108] sm:$0xf0]  ;;  %v1356_v25 = vor.u32 %v1581_v19, %v1355_v18  ;;  %v1232_v26 = vor.u32 %v1548_v20, %v1229_v21  ;;  %v1363_v30 = vld [vmem:[%s1865_s18 + $0x110] sm:$0xf] }
  0x14   : > { %695 = vmatpush.bf16.msra.mxu0 %v1617_v4  ;;  %1630 = vmatpush.bf16.msra.mxu2 %v1617_v4  ;;  %v1360_v27 = vor.u32 %v1580_v22, %v1357_v23  ;;  %v1583_v31 = vld [vmem:[%s1865_s18 + $0x114] sm:$0xf0]  ;;  %v1550_v32 = vld [vmem:[%s1865_s18 + $0x14] sm:$0xf]  ;;  %v1237_v33 = vld [vmem:[%s1865_s18 + $0x18] sm:$0xf0] }
  0x15   : > { %864 = vmatpush.bf16.msra.mxu1 %v1625_v5  ;;  %1638 = vmatpush.bf16.msra.mxu3 %v1625_v5  ;;  %v1582_v34 = vld [vmem:[%s1865_s18 + $0x114] sm:$0xf]  ;;  %v1365_v35 = vld [vmem:[%s1865_s18 + $0x118] sm:$0xf0]  ;;  %v1364_v37 = vor.u32 %v1583_v31, %v1363_v30  ;;  %v1240_v38 = vor.u32 %v1550_v32, %v1237_v33  ;;  %v1243_v40 = vld [vmem:[%s1865_s18 + $0x20] sm:$0xf] }
  0x16   : > { %v1368_v39 = vor.u32 %v1582_v34, %v1365_v35  ;;  %v1553_v41 = vld [vmem:[%s1865_s18 + $0x24] sm:$0xf0]  ;;  %v1371_v42 = vld [vmem:[%s1865_s18 + $0x120] sm:$0xf]  ;;  %v1552_v44 = vld [vmem:[%s1865_s18 + $0x24] sm:$0xf] }
  0x17   : > { %v1585_v43 = vld [vmem:[%s1865_s18 + $0x124] sm:$0xf0]  ;;  %v1245_v45 = vld [vmem:[%s1865_s18 + $0x28] sm:$0xf0]  ;;  %v1584_v46 = vld [vmem:[%s1865_s18 + $0x124] sm:$0xf]  ;;  %v1244_v48 = vor.u32 %v1553_v41, %v1243_v40 }
  0x18   : > { %696 = vmatpush.bf16.msra.mxu0 %v1616_v6  ;;  %1631 = vmatpush.bf16.msra.mxu2 %v1616_v6  ;;  %v1373_v47 = vld [vmem:[%s1865_s18 + $0x128] sm:$0xf0]  ;;  %v1372_v49 = vor.u32 %v1585_v43, %v1371_v42  ;;  %v1248_v50 = vor.u32 %v1552_v44, %v1245_v45  ;;  %v1251_v52 = vld [vmem:[%s1865_s18 + $0x30] sm:$0xf]  ;;  %v1555_v53 = vld [vmem:[%s1865_s18 + $0x34] sm:$0xf0] }
  0x19   : > { %865 = vmatpush.bf16.msra.mxu1 %v1624_v7  ;;  %1639 = vmatpush.bf16.msra.mxu3 %v1624_v7  ;;  %v1376_v51 = vor.u32 %v1584_v46, %v1373_v47  ;;  %v1379_v54 = vld [vmem:[%s1865_s18 + $0x130] sm:$0xf]  ;;  %v1587_v55 = vld [vmem:[%s1865_s18 + $0x134] sm:$0xf0]  ;;  %v1554_v56 = vld [vmem:[%s1865_s18 + $0x34] sm:$0xf]  ;;  %v1252_v60 = vor.u32 %v1555_v53, %v1251_v52 }
  0x1a   : > { %v1253_v57 = vld [vmem:[%s1865_s18 + $0x38] sm:$0xf0]  ;;  %v1586_v58 = vld [vmem:[%s1865_s18 + $0x134] sm:$0xf]  ;;  %v1380_v61 = vor.u32 %v1587_v55, %v1379_v54  ;;  %v1259_v0 = vld [vmem:[%s1865_s18 + $0x40] sm:$0xf] }
  0x1b   : > { %v1381_v59 = vld [vmem:[%s1865_s18 + $0x138] sm:$0xf0]  ;;  %v1256_v62 = vor.u32 %v1554_v56, %v1253_v57  ;;  %v1557_v1 = vld [vmem:[%s1865_s18 + $0x44] sm:$0xf0]  ;;  %v1387_v2 = vld [vmem:[%s1865_s18 + $0x140] sm:$0xf] }
  0x1c   : > { %697 = vmatpush.bf16.msra.mxu0 %v1615_v8  ;;  %1632 = vmatpush.bf16.msra.mxu2 %v1615_v8  ;;  %v1384_v63 = vor.u32 %v1586_v58, %v1381_v59  ;;  %v1589_v3 = vld [vmem:[%s1865_s18 + $0x144] sm:$0xf0]  ;;  %v1556_v4 = vld [vmem:[%s1865_s18 + $0x44] sm:$0xf]  ;;  %v1261_v5 = vld [vmem:[%s1865_s18 + $0x48] sm:$0xf0]  ;;  %v1260_v8 = vor.u32 %v1557_v1, %v1259_v0 }
  0x1d   : > { %866 = vmatpush.bf16.msra.mxu1 %v1623_v9  ;;  %1640 = vmatpush.bf16.msra.mxu3 %v1623_v9  ;;  %v1588_v6 = vld [vmem:[%s1865_s18 + $0x144] sm:$0xf]  ;;  %v1389_v7 = vld [vmem:[%s1865_s18 + $0x148] sm:$0xf0]  ;;  %v1388_v9 = vor.u32 %v1589_v3, %v1387_v2  ;;  %v1558_v16 = vld [vmem:[%s1865_s18 + $0x54] sm:$0xf] }
  0x1e   : > { %v1269_v17 = vld [vmem:[%s1865_s18 + $0x58] sm:$0xf0]  ;;  %v1590_v18 = vld [vmem:[%s1865_s18 + $0x154] sm:$0xf]  ;;  %v1560_v28 = vld [vmem:[%s1865_s18 + $0x64] sm:$0xf] }
  0x1f   : > { %v1397_v19 = vld [vmem:[%s1865_s18 + $0x158] sm:$0xf0]  ;;  %v1272_v22 = vor.u32 %v1558_v16, %v1269_v17  ;;  %v1277_v29 = vld [vmem:[%s1865_s18 + $0x68] sm:$0xf0]  ;;  %v1592_v30 = vld [vmem:[%s1865_s18 + $0x164] sm:$0xf] }
  0x20   : > { %698 = vmatpush.bf16.msra.mxu0 %v1614_v10  ;;  %1633 = vmatpush.bf16.msra.mxu2 %v1614_v10  ;;  %v1264_v10 = vor.u32 %v1556_v4, %v1261_v5  ;;  %v1400_v23 = vor.u32 %v1590_v18, %v1397_v19  ;;  %v1405_v31 = vld [vmem:[%s1865_s18 + $0x168] sm:$0xf0]  ;;  %v1280_v34 = vor.u32 %v1560_v28, %v1277_v29  ;;  %v1562_v40 = vld [vmem:[%s1865_s18 + $0x74] sm:$0xf]  ;;  %v1285_v41 = vld [vmem:[%s1865_s18 + $0x78] sm:$0xf0] }
  0x21   : > { %867 = vmatpush.bf16.msra.mxu1 %v1622_v11  ;;  %1641 = vmatpush.bf16.msra.mxu3 %v1622_v11  ;;  %v1392_v11 = vor.u32 %v1588_v6, %v1389_v7  ;;  %v1408_v35 = vor.u32 %v1592_v30, %v1405_v31  ;;  %v1594_v42 = vld [vmem:[%s1865_s18 + $0x174] sm:$0xf]  ;;  %v1413_v43 = vld [vmem:[%s1865_s18 + $0x178] sm:$0xf0]  ;;  %v1288_v46 = vor.u32 %v1562_v40, %v1285_v41  ;;  %v1597_v52 = vld [vmem:[%s1865_s18 + $0x184] sm:$0xf0] }
  0x22   : > { %v1416_v47 = vor.u32 %v1594_v42, %v1413_v43  ;;  %v1564_v53 = vld [vmem:[%s1865_s18 + $0x84] sm:$0xf]  ;;  %v1293_v54 = vld [vmem:[%s1865_s18 + $0x88] sm:$0xf0]  ;;  %v1598_v16 = vld [vmem:[%s1865_s18 + $0x194] sm:$0xf] }
  0x23   : > { %v1596_v55 = vld [vmem:[%s1865_s18 + $0x184] sm:$0xf]  ;;  %v1421_v56 = vld [vmem:[%s1865_s18 + $0x188] sm:$0xf0]  ;;  %v1429_v17 = vld [vmem:[%s1865_s18 + $0x198] sm:$0xf0] }
  0x24   : > { %699 = vmatpush.bf16.msra.mxu0 %v1613_v12  ;;  %1634 = vmatpush.bf16.msra.mxu2 %v1613_v12  ;;  %v1267_v12 = vld [vmem:[%s1865_s18 + $0x50] sm:$0xf]  ;;  %v1307_v42 = vld [vmem:[%s1865_s18 + $0xa0] sm:$0xf]  ;;  %v1569_v43 = vld [vmem:[%s1865_s18 + $0xa4] sm:$0xf0] }
  0x25   : > { %868 = vmatpush.bf16.msra.mxu1 %v1621_v13  ;;  %1642 = vmatpush.bf16.msra.mxu3 %v1621_v13  ;;  %v1559_v13 = vld [vmem:[%s1865_s18 + $0x54] sm:$0xf0] }
  0x26   : > { %v1268_v20 = vor.u32 %v1559_v13, %v1267_v12  ;;  %v1427_v12 = vld [vmem:[%s1865_s18 + $0x190] sm:$0xf]  ;;  %v1599_v13 = vld [vmem:[%s1865_s18 + $0x194] sm:$0xf0] }
  0x28   : > { %700 = vmatpush.bf16.msra.mxu0 %v1612_v14  ;;  %1635 = vmatpush.bf16.msra.mxu2 %v1612_v14  ;;  %v1395_v14 = vld [vmem:[%s1865_s18 + $0x150] sm:$0xf] }
  0x29   : > { %869 = vmatpush.bf16.msra.mxu1 %v1620_v15  ;;  %1643 = vmatpush.bf16.msra.mxu3 %v1620_v15  ;;  %v1591_v15 = vld [vmem:[%s1865_s18 + $0x154] sm:$0xf0] }
  0x2a   : > { %v1396_v21 = vor.u32 %v1591_v15, %v1395_v14  ;;  %v1566_v14 = vld [vmem:[%s1865_s18 + $0x94] sm:$0xf]  ;;  %v1301_v15 = vld [vmem:[%s1865_s18 + $0x98] sm:$0xf0] }
  0x2b   : > { %701 = vmatmul.bf16.vlgmr.msra.gmra.mxu0 %v1228_v24  ;;  %781 = vmatmul.bf16.vlgmr.msra.gmra.mxu2 %v1356_v25  ;;  %v1275_v24 = vld [vmem:[%s1865_s18 + $0x60] sm:$0xf]  ;;  %v1561_v25 = vld [vmem:[%s1865_s18 + $0x64] sm:$0xf0] }
  0x2c   : > { %870 = vmatmul.bf16.vlgmr.msra.gmra.mxu1 %v1232_v26  ;;  %950 = vmatmul.bf16.vlgmr.msra.gmra.mxu3 %v1360_v27  ;;  %v1403_v26 = vld [vmem:[%s1865_s18 + $0x160] sm:$0xf]  ;;  %v1593_v27 = vld [vmem:[%s1865_s18 + $0x164] sm:$0xf0]  ;;  %v1276_v32 = vor.u32 %v1561_v25, %v1275_v24  ;;  %v1304_v24 = vor.u32 %v1566_v14, %v1301_v15  ;;  %v1432_v25 = vor.u32 %v1598_v16, %v1429_v17  ;;  %v1603_v14 = vld [vmem:[%s1865_s18 + $0x1b4] sm:$0xf0] }
  0x2d   : > { %v1404_v33 = vor.u32 %v1593_v27, %v1403_v26  ;;  %v1570_v15 = vld [vmem:[%s1865_s18 + $0xb4] sm:$0xf]  ;;  %v1317_v16 = vld [vmem:[%s1865_s18 + $0xb8] sm:$0xf0] }
  0x2e   : > { %v1602_v17 = vld [vmem:[%s1865_s18 + $0x1b4] sm:$0xf] }
  0x3b   : > { %706 = vmatmul.bf16.gmra.mxu0 %v1236_v36  ;;  %786 = vmatmul.bf16.gmra.mxu2 %v1364_v37  ;;  %v1283_v36 = vld [vmem:[%s1865_s18 + $0x70] sm:$0xf]  ;;  %v1563_v37 = vld [vmem:[%s1865_s18 + $0x74] sm:$0xf0] }
  0x3c   : > { %875 = vmatmul.bf16.gmra.mxu1 %v1240_v38  ;;  %955 = vmatmul.bf16.gmra.mxu3 %v1368_v39  ;;  %v1411_v38 = vld [vmem:[%s1865_s18 + $0x170] sm:$0xf]  ;;  %v1595_v39 = vld [vmem:[%s1865_s18 + $0x174] sm:$0xf0]  ;;  %v1284_v44 = vor.u32 %v1563_v37, %v1283_v36 }
  0x3d   : > { %v1412_v45 = vor.u32 %v1595_v39, %v1411_v38 }
  0x4b   : > { %711 = vmatmul.bf16.gmra.mxu0 %v1244_v48  ;;  %791 = vmatmul.bf16.gmra.mxu2 %v1372_v49  ;;  %v1943_v48 = vld [vmem:[%s2143_s2] ss:$0 sm:$0xff] }
  0x4c   : > { %880 = vmatmul.bf16.gmra.mxu1 %v1248_v50  ;;  %960 = vmatmul.bf16.gmra.mxu3 %v1376_v51  ;;  %v1291_v49 = vld [vmem:[%s1865_s18 + $0x80] sm:$0xf]  ;;  %v1565_v50 = vld [vmem:[%s1865_s18 + $0x84] sm:$0xf0] }
  0x4d   : > { %v1419_v51 = vld [vmem:[%s1865_s18 + $0x180] sm:$0xf]  ;;  %v1292_v57 = vor.u32 %v1565_v50, %v1291_v49  ;;  %v1600_v49 = vld [vmem:[%s1865_s18 + $0x1a4] sm:$0xf]  ;;  %v1437_v50 = vld [vmem:[%s1865_s18 + $0x1a8] sm:$0xf0] }
  0x4e   : > { %v1420_v58 = vor.u32 %v1597_v52, %v1419_v51 }
  0x5b   : > { %716 = vmatmul.bf16.gmra.mxu0 %v1252_v60  ;;  %796 = vmatmul.bf16.gmra.mxu2 %v1380_v61  ;;  %v1296_v60 = vor.u32 %v1564_v53, %v1293_v54  ;;  %v1424_v61 = vor.u32 %v1596_v55, %v1421_v56  ;;  %v1308_v54 = vor.u32 %v1569_v43, %v1307_v42  ;;  %v1323_v43 = vld [vmem:[%s1865_s18 + $0xc0] sm:$0xf] }
  0x5c   : > { %885 = vmatmul.bf16.gmra.mxu1 %v1256_v62  ;;  %965 = vmatmul.bf16.gmra.mxu3 %v1384_v63 }
  0x6b   : > { %721 = vmatmul.bf16.gmra.mxu0 %v1260_v8  ;;  %801 = vmatmul.bf16.gmra.mxu2 %v1388_v9 }
  0x6c   : > { %890 = vmatmul.bf16.gmra.mxu1 %v1264_v10  ;;  %970 = vmatmul.bf16.gmra.mxu3 %v1392_v11  ;;  %v1299_v10 = vld [vmem:[%s1865_s18 + $0x90] sm:$0xf]  ;;  %v1567_v11 = vld [vmem:[%s1865_s18 + $0x94] sm:$0xf0] }
  0x7b   : > { %726 = vmatmul.bf16.gmra.mxu0 %v1268_v20  ;;  %806 = vmatmul.bf16.gmra.mxu2 %v1396_v21  ;;  %v1300_v21 = vor.u32 %v1567_v11, %v1299_v10  ;;  %v1315_v11 = vld [vmem:[%s1865_s18 + $0xb0] sm:$0xf] }
  0x7c   : > { %895 = vmatmul.bf16.gmra.mxu1 %v1272_v22  ;;  %975 = vmatmul.bf16.gmra.mxu3 %v1400_v23  ;;  %v1428_v22 = vor.u32 %v1599_v13, %v1427_v12  ;;  %v1571_v12 = vld [vmem:[%s1865_s18 + $0xb4] sm:$0xf0]  ;;  %v1443_v13 = vld [vmem:[%s1865_s18 + $0x1b0] sm:$0xf] }
  0x8b   : > { %731 = vmatmul.bf16.gmra.mxu0 %v1276_v32  ;;  %811 = vmatmul.bf16.gmra.mxu2 %v1404_v33 }
  0x8c   : > { %900 = vmatmul.bf16.gmra.mxu1 %v1280_v34  ;;  %980 = vmatmul.bf16.gmra.mxu3 %v1408_v35 }
  0x9b   : > { %736 = vmatmul.bf16.gmra.mxu0 %v1284_v44  ;;  %816 = vmatmul.bf16.gmra.mxu2 %v1412_v45  ;;  %v1435_v44 = vld [vmem:[%s1865_s18 + $0x1a0] sm:$0xf]  ;;  %v1601_v45 = vld [vmem:[%s1865_s18 + $0x1a4] sm:$0xf0] }
  0x9c   : > { %905 = vmatmul.bf16.gmra.mxu1 %v1288_v46  ;;  %985 = vmatmul.bf16.gmra.mxu3 %v1416_v47  ;;  %v1568_v46 = vld [vmem:[%s1865_s18 + $0xa4] sm:$0xf]  ;;  %v1309_v47 = vld [vmem:[%s1865_s18 + $0xa8] sm:$0xf0]  ;;  %v1436_v55 = vor.u32 %v1601_v45, %v1435_v44  ;;  %v1573_v44 = vld [vmem:[%s1865_s18 + $0xc4] sm:$0xf0] }
  0x9d   : > { %v1451_v45 = vld [vmem:[%s1865_s18 + $0x1c0] sm:$0xf] }
  0xa8   : > { %v702_v59 = vpop.f32.mrf.mxu0 }
  0xa9   : > { %v703_v62 = vadd.f32 %v1943_v48, %v702_v59  ;;  %v871_v63 = vpop.f32.mrf.mxu1 }
  0xab   : > { %v872_v0 = vadd.f32 %v871_v63, %v703_v62  ;;  %741 = vmatmul.bf16.gmra.mxu0 %v1292_v57  ;;  %821 = vmatmul.bf16.gmra.mxu2 %v1420_v58  ;;  %v1312_v57 = vor.u32 %v1568_v46, %v1309_v47  ;;  %v1440_v58 = vor.u32 %v1600_v49, %v1437_v50  ;;  %v1605_v46 = vld [vmem:[%s1865_s18 + $0x1c4] sm:$0xf0]  ;;  %v1572_v47 = vld [vmem:[%s1865_s18 + $0xc4] sm:$0xf]  ;;  %v1325_v49 = vld [vmem:[%s1865_s18 + $0xc8] sm:$0xf0] }
  0xac   : > { %910 = vmatmul.bf16.gmra.mxu1 %v1296_v60  ;;  %990 = vmatmul.bf16.gmra.mxu3 %v1424_v61  ;;  %v1604_v50 = vld [vmem:[%s1865_s18 + $0x1c4] sm:$0xf] }
  0xad   : > { %1653 = vtanh.f32 %v872_v0 }
  0xae   : > { %v782_v1 = vpop.f32.mrf.mxu2 }
  0xaf   : > { %v783_v2 = vadd.f32 %v1943_v48, %v782_v1  ;;  %v951_v3 = vpop.f32.mrf.mxu3 }
  0xb0   : > { %v704_v4 = vpop.f32.mrf.mxu0 }
  0xb1   : > { %v952_v5 = vadd.f32 %v951_v3, %v783_v2  ;;  %v705_v6 = vadd.f32 %v1943_v48, %v704_v4  ;;  %v873_v7 = vpop.f32.mrf.mxu1 }
  0xb3   : > { %v1654_v8 = vpop.eup %1653  ;;  %1655 = vtanh.f32 %v952_v5  ;;  %v874_v9 = vadd.f32 %v873_v7, %v705_v6 }
  0xb4   : > { %1095 = vst [vmem:[%s1960_s30] sm:$0xff] %v1654_v8 }
  0xb5   : > { %1657 = vtanh.f32 %v874_v9 }
  0xb6   : > { %v784_v18 = vpop.f32.mrf.mxu2 }
  0xb7   : > { %v785_v19 = vadd.f32 %v1943_v48, %v784_v18  ;;  %v953_v20 = vpop.f32.mrf.mxu3  ;;  %v1445_v18 = vld [vmem:[%s1865_s18 + $0x1b8] sm:$0xf0] }
  0xb8   : > { %v707_v23 = vpop.f32.mrf.mxu0 }
  0xb9   : > { %v1656_v26 = vpop.eup %1655  ;;  %v954_v27 = vadd.f32 %v953_v20, %v785_v19  ;;  %v708_v28 = vadd.f32 %v1943_v48, %v707_v23  ;;  %v876_v29 = vpop.f32.mrf.mxu1  ;;  %v1444_v23 = vor.u32 %v1603_v14, %v1443_v13  ;;  %v1575_v13 = vld [vmem:[%s1865_s18 + $0xd4] sm:$0xf0]  ;;  %v1459_v14 = vld [vmem:[%s1865_s18 + $0x1d0] sm:$0xf] }
  0xba   : > { %1127 = vst [vmem:[%s1960_s30 + $0x100] sm:$0xff] %v1656_v26  ;;  %v1448_v26 = vor.u32 %v1602_v17, %v1445_v18  ;;  %v1333_v17 = vld [vmem:[%s1865_s18 + $0xd8] sm:$0xf0]  ;;  %v1606_v18 = vld [vmem:[%s1865_s18 + $0x1d4] sm:$0xf] }
  0xbb   : > { %v1658_v30 = vpop.eup %1657  ;;  %1659 = vtanh.f32 %v954_v27  ;;  %v877_v31 = vadd.f32 %v876_v29, %v708_v28  ;;  %746 = vmatmul.bf16.gmra.mxu0 %v1300_v21  ;;  %826 = vmatmul.bf16.gmra.mxu2 %v1428_v22  ;;  %v1316_v22 = vor.u32 %v1571_v12, %v1315_v11  ;;  %v1331_v12 = vld [vmem:[%s1865_s18 + $0xd0] sm:$0xf] }
  0xbc   : > { %1096 = vst [vmem:[%s1960_s30 + $0x8] sm:$0xff] %v1658_v30  ;;  %915 = vmatmul.bf16.gmra.mxu1 %v1304_v24  ;;  %995 = vmatmul.bf16.gmra.mxu3 %v1432_v25  ;;  %v1320_v25 = vor.u32 %v1570_v15, %v1317_v16  ;;  %v1607_v15 = vld [vmem:[%s1865_s18 + $0x1d4] sm:$0xf0]  ;;  %v1574_v16 = vld [vmem:[%s1865_s18 + $0xd4] sm:$0xf] }
  0xbd   : > { %1661 = vtanh.f32 %v877_v31 }
  0xbe   : > { %v787_v32 = vpop.f32.mrf.mxu2 }
  0xbf   : > { %v788_v33 = vadd.f32 %v1943_v48, %v787_v32  ;;  %v956_v34 = vpop.f32.mrf.mxu3 }
  0xc0   : > { %v709_v35 = vpop.f32.mrf.mxu0 }
  0xc1   : > { %v1660_v36 = vpop.eup %1659  ;;  %v957_v37 = vadd.f32 %v956_v34, %v788_v33  ;;  %v710_v38 = vadd.f32 %v1943_v48, %v709_v35  ;;  %v878_v39 = vpop.f32.mrf.mxu1 }
  0xc2   : > { %1128 = vst [vmem:[%s1960_s30 + $0x108] sm:$0xff] %v1660_v36 }
  0xc3   : > { %v1662_v40 = vpop.eup %1661  ;;  %1663 = vtanh.f32 %v957_v37  ;;  %v879_v41 = vadd.f32 %v878_v39, %v710_v38 }
  0xc4   : > { %1097 = vst [vmem:[%s1960_s30 + $0x10] sm:$0xff] %v1662_v40 }
  0xc5   : > { %1665 = vtanh.f32 %v879_v41 }
  0xc6   : > { %v789_v51 = vpop.f32.mrf.mxu2 }
  0xc7   : > { %v790_v52 = vadd.f32 %v1943_v48, %v789_v51  ;;  %v958_v53 = vpop.f32.mrf.mxu3  ;;  %v1453_v51 = vld [vmem:[%s1865_s18 + $0x1c8] sm:$0xf0] }
  0xc8   : > { %v712_v56 = vpop.f32.mrf.mxu0 }
  0xc9   : > { %v1664_v59 = vpop.eup %1663  ;;  %v959_v60 = vadd.f32 %v958_v53, %v790_v52  ;;  %v713_v61 = vadd.f32 %v1943_v48, %v712_v56  ;;  %v881_v62 = vpop.f32.mrf.mxu1  ;;  %v1452_v56 = vor.u32 %v1605_v46, %v1451_v45  ;;  %v1577_v45 = vld [vmem:[%s1865_s18 + $0xe4] sm:$0xf0]  ;;  %v1467_v46 = vld [vmem:[%s1865_s18 + $0x1e0] sm:$0xf] }
  0xca   : > { %1129 = vst [vmem:[%s1960_s30 + $0x110] sm:$0xff] %v1664_v59  ;;  %v1456_v59 = vor.u32 %v1604_v50, %v1453_v51  ;;  %v1341_v50 = vld [vmem:[%s1865_s18 + $0xe8] sm:$0xf0]  ;;  %v1608_v51 = vld [vmem:[%s1865_s18 + $0x1e4] sm:$0xf] }
  0xcb   : > { %v1666_v63 = vpop.eup %1665  ;;  %1667 = vtanh.f32 %v959_v60  ;;  %v882_v0 = vadd.f32 %v881_v62, %v713_v61  ;;  %751 = vmatmul.bf16.gmra.mxu0 %v1308_v54  ;;  %831 = vmatmul.bf16.gmra.mxu2 %v1436_v55  ;;  %v1324_v55 = vor.u32 %v1573_v44, %v1323_v43  ;;  %v1339_v44 = vld [vmem:[%s1865_s18 + $0xe0] sm:$0xf] }
  0xcc   : > { %1098 = vst [vmem:[%s1960_s30 + $0x18] sm:$0xff] %v1666_v63  ;;  %920 = vmatmul.bf16.gmra.mxu1 %v1312_v57  ;;  %1000 = vmatmul.bf16.gmra.mxu3 %v1440_v58  ;;  %v1328_v58 = vor.u32 %v1572_v47, %v1325_v49  ;;  %v1609_v47 = vld [vmem:[%s1865_s18 + $0x1e4] sm:$0xf0]  ;;  %v1576_v49 = vld [vmem:[%s1865_s18 + $0xe4] sm:$0xf] }
  0xcd   : > { %1669 = vtanh.f32 %v882_v0 }
  0xce   : > { %v792_v1 = vpop.f32.mrf.mxu2 }
  0xcf   : > { %v793_v2 = vadd.f32 %v1943_v48, %v792_v1  ;;  %v961_v3 = vpop.f32.mrf.mxu3 }
  0xd0   : > { %v714_v4 = vpop.f32.mrf.mxu0 }
  0xd1   : > { %v1668_v5 = vpop.eup %1667  ;;  %v962_v6 = vadd.f32 %v961_v3, %v793_v2  ;;  %v715_v7 = vadd.f32 %v1943_v48, %v714_v4  ;;  %v883_v8 = vpop.f32.mrf.mxu1 }
  0xd2   : > { %1130 = vst [vmem:[%s1960_s30 + $0x118] sm:$0xff] %v1668_v5 }
  0xd3   : > { %v1670_v9 = vpop.eup %1669  ;;  %1671 = vtanh.f32 %v962_v6  ;;  %v884_v10 = vadd.f32 %v883_v8, %v715_v7 }
  0xd4   : > { %1099 = vst [vmem:[%s1960_s30 + $0x20] sm:$0xff] %v1670_v9 }
  0xd5   : > { %1673 = vtanh.f32 %v884_v10 }
  0xd6   : > { %v794_v19 = vpop.f32.mrf.mxu2 }
  0xd7   : > { %v795_v20 = vadd.f32 %v1943_v48, %v794_v19  ;;  %v963_v21 = vpop.f32.mrf.mxu3  ;;  %v1461_v19 = vld [vmem:[%s1865_s18 + $0x1d8] sm:$0xf0] }
  0xd8   : > { %v717_v24 = vpop.f32.mrf.mxu0 }
  0xd9   : > { %v1672_v27 = vpop.eup %1671  ;;  %v964_v28 = vadd.f32 %v963_v21, %v795_v20  ;;  %v718_v29 = vadd.f32 %v1943_v48, %v717_v24  ;;  %v886_v30 = vpop.f32.mrf.mxu1  ;;  %v1460_v24 = vor.u32 %v1607_v15, %v1459_v14  ;;  %v1579_v14 = vld [vmem:[%s1865_s18 + $0xf4] sm:$0xf0]  ;;  %v1475_v15 = vld [vmem:[%s1865_s18 + $0x1f0] sm:$0xf] }
  0xda   : > { %1131 = vst [vmem:[%s1960_s30 + $0x120] sm:$0xff] %v1672_v27  ;;  %v1464_v27 = vor.u32 %v1606_v18, %v1461_v19  ;;  %v1349_v18 = vld [vmem:[%s1865_s18 + $0xf8] sm:$0xf0]  ;;  %v1610_v19 = vld [vmem:[%s1865_s18 + $0x1f4] sm:$0xf] }
  0xdb   : > { %v1674_v31 = vpop.eup %1673  ;;  %1675 = vtanh.f32 %v964_v28  ;;  %v887_v32 = vadd.f32 %v886_v30, %v718_v29  ;;  %756 = vmatmul.bf16.gmra.mxu0 %v1316_v22  ;;  %836 = vmatmul.bf16.gmra.mxu2 %v1444_v23  ;;  %v1332_v23 = vor.u32 %v1575_v13, %v1331_v12  ;;  %v1347_v13 = vld [vmem:[%s1865_s18 + $0xf0] sm:$0xf] }
  0xdc   : > { %1100 = vst [vmem:[%s1960_s30 + $0x28] sm:$0xff] %v1674_v31  ;;  %925 = vmatmul.bf16.gmra.mxu1 %v1320_v25  ;;  %1005 = vmatmul.bf16.gmra.mxu3 %v1448_v26  ;;  %v1336_v26 = vor.u32 %v1574_v16, %v1333_v17  ;;  %v1611_v16 = vld [vmem:[%s1865_s18 + $0x1f4] sm:$0xf0]  ;;  %v1578_v17 = vld [vmem:[%s1865_s18 + $0xf4] sm:$0xf] }
  0xdd   : > { %1677 = vtanh.f32 %v887_v32 }
  0xde   : > { %v797_v33 = vpop.f32.mrf.mxu2 }
  0xdf   : > { %v798_v34 = vadd.f32 %v1943_v48, %v797_v33  ;;  %v966_v35 = vpop.f32.mrf.mxu3 }
  0xe0   : > { %v719_v36 = vpop.f32.mrf.mxu0 }
  0xe1   : > { %v1676_v37 = vpop.eup %1675  ;;  %v967_v38 = vadd.f32 %v966_v35, %v798_v34  ;;  %v720_v39 = vadd.f32 %v1943_v48, %v719_v36  ;;  %v888_v40 = vpop.f32.mrf.mxu1 }
  0xe2   : > { %1132 = vst [vmem:[%s1960_s30 + $0x128] sm:$0xff] %v1676_v37 }
  0xe3   : > { %v1678_v41 = vpop.eup %1677  ;;  %1679 = vtanh.f32 %v967_v38  ;;  %v889_v42 = vadd.f32 %v888_v40, %v720_v39 }
  0xe4   : > { %1101 = vst [vmem:[%s1960_s30 + $0x30] sm:$0xff] %v1678_v41 }
  0xe5   : > { %1681 = vtanh.f32 %v889_v42 }
  0xe6   : > { %v799_v52 = vpop.f32.mrf.mxu2 }
  0xe7   : > { %v800_v53 = vadd.f32 %v1943_v48, %v799_v52  ;;  %v968_v54 = vpop.f32.mrf.mxu3  ;;  %v1469_v52 = vld [vmem:[%s1865_s18 + $0x1e8] sm:$0xf0] }
  0xe8   : > { %v722_v57 = vpop.f32.mrf.mxu0 }
  0xe9   : > { %v1680_v60 = vpop.eup %1679  ;;  %v969_v61 = vadd.f32 %v968_v54, %v800_v53  ;;  %v723_v62 = vadd.f32 %v1943_v48, %v722_v57  ;;  %v891_v63 = vpop.f32.mrf.mxu1  ;;  %v1468_v57 = vor.u32 %v1609_v47, %v1467_v46 }
  0xea   : > { %1133 = vst [vmem:[%s1960_s30 + $0x130] sm:$0xff] %v1680_v60  ;;  %v1472_v60 = vor.u32 %v1608_v51, %v1469_v52 }
  0xeb   : > { %v1682_v0 = vpop.eup %1681  ;;  %1683 = vtanh.f32 %v969_v61  ;;  %v892_v1 = vadd.f32 %v891_v63, %v723_v62  ;;  %761 = vmatmul.bf16.gmra.mxu0 %v1324_v55  ;;  %841 = vmatmul.bf16.gmra.mxu2 %v1452_v56  ;;  %v1340_v56 = vor.u32 %v1577_v45, %v1339_v44 }
  0xec   : > { %1102 = vst [vmem:[%s1960_s30 + $0x38] sm:$0xff] %v1682_v0  ;;  %930 = vmatmul.bf16.gmra.mxu1 %v1328_v58  ;;  %1010 = vmatmul.bf16.gmra.mxu3 %v1456_v59  ;;  %v1344_v59 = vor.u32 %v1576_v49, %v1341_v50 }
  0xed   : > { %1685 = vtanh.f32 %v892_v1 }
  0xee   : > { %v802_v2 = vpop.f32.mrf.mxu2 }
  0xef   : > { %v803_v3 = vadd.f32 %v1943_v48, %v802_v2  ;;  %v971_v4 = vpop.f32.mrf.mxu3 }
  0xf0   : > { %v724_v5 = vpop.f32.mrf.mxu0 }
  0xf1   : > { %v1684_v6 = vpop.eup %1683  ;;  %v972_v7 = vadd.f32 %v971_v4, %v803_v3  ;;  %v725_v8 = vadd.f32 %v1943_v48, %v724_v5  ;;  %v893_v9 = vpop.f32.mrf.mxu1 }
  0xf2   : > { %1134 = vst [vmem:[%s1960_s30 + $0x138] sm:$0xff] %v1684_v6 }
  0xf3   : > { %v1686_v10 = vpop.eup %1685  ;;  %1687 = vtanh.f32 %v972_v7  ;;  %v894_v11 = vadd.f32 %v893_v9, %v725_v8 }
  0xf4   : > { %1103 = vst [vmem:[%s1960_s30 + $0x40] sm:$0xff] %v1686_v10 }
  0xf5   : > { %1689 = vtanh.f32 %v894_v11 }
  0xf6   : > { %v804_v20 = vpop.f32.mrf.mxu2 }
  0xf7   : > { %v805_v21 = vadd.f32 %v1943_v48, %v804_v20  ;;  %v973_v22 = vpop.f32.mrf.mxu3  ;;  %v1477_v20 = vld [vmem:[%s1865_s18 + $0x1f8] sm:$0xf0] }
  0xf8   : > { %v727_v25 = vpop.f32.mrf.mxu0 }
  0xf9   : > { %v1688_v28 = vpop.eup %1687  ;;  %v974_v29 = vadd.f32 %v973_v22, %v805_v21  ;;  %v728_v30 = vadd.f32 %v1943_v48, %v727_v25  ;;  %v896_v31 = vpop.f32.mrf.mxu1  ;;  %v1476_v25 = vor.u32 %v1611_v16, %v1475_v15 }
  0xfa   : > { %1135 = vst [vmem:[%s1960_s30 + $0x140] sm:$0xff] %v1688_v28  ;;  %v1480_v28 = vor.u32 %v1610_v19, %v1477_v20 }
  0xfb   : > { %v1690_v32 = vpop.eup %1689  ;;  %1691 = vtanh.f32 %v974_v29  ;;  %v897_v33 = vadd.f32 %v896_v31, %v728_v30  ;;  %766 = vmatmul.bf16.gmra.mxu0 %v1332_v23  ;;  %846 = vmatmul.bf16.gmra.mxu2 %v1460_v24  ;;  %v1348_v24 = vor.u32 %v1579_v14, %v1347_v13 }
  0xfc   : > { %1104 = vst [vmem:[%s1960_s30 + $0x48] sm:$0xff] %v1690_v32  ;;  %935 = vmatmul.bf16.gmra.mxu1 %v1336_v26  ;;  %1015 = vmatmul.bf16.gmra.mxu3 %v1464_v27  ;;  %v1352_v27 = vor.u32 %v1578_v17, %v1349_v18 }
  0xfd   : > { %1693 = vtanh.f32 %v897_v33 }
  0xfe   : > { %v807_v34 = vpop.f32.mrf.mxu2 }
  0xff   : > { %v808_v35 = vadd.f32 %v1943_v48, %v807_v34  ;;  %v976_v36 = vpop.f32.mrf.mxu3 }
 0x100   : > { %v729_v37 = vpop.f32.mrf.mxu0 }
 0x101   : > { %v1692_v38 = vpop.eup %1691  ;;  %v977_v39 = vadd.f32 %v976_v36, %v808_v35  ;;  %v730_v40 = vadd.f32 %v1943_v48, %v729_v37  ;;  %v898_v41 = vpop.f32.mrf.mxu1 }
 0x102   : > { %1136 = vst [vmem:[%s1960_s30 + $0x148] sm:$0xff] %v1692_v38 }
 0x103   : > { %v1694_v42 = vpop.eup %1693  ;;  %1695 = vtanh.f32 %v977_v39  ;;  %v899_v43 = vadd.f32 %v898_v41, %v730_v40 }
 0x104   : > { %1105 = vst [vmem:[%s1960_s30 + $0x50] sm:$0xff] %v1694_v42 }
 0x105   : > { %1697 = vtanh.f32 %v899_v43 }
 0x106   : > { %v809_v53 = vpop.f32.mrf.mxu2 }
 0x107   : > { %v810_v54 = vadd.f32 %v1943_v48, %v809_v53  ;;  %v978_v55 = vpop.f32.mrf.mxu3 }
 0x108   : > { %v732_v58 = vpop.f32.mrf.mxu0 }
 0x109   : > { %v1696_v61 = vpop.eup %1695  ;;  %v979_v62 = vadd.f32 %v978_v55, %v810_v54  ;;  %v733_v63 = vadd.f32 %v1943_v48, %v732_v58  ;;  %v901_v0 = vpop.f32.mrf.mxu1 }
 0x10a   : > { %1137 = vst [vmem:[%s1960_s30 + $0x150] sm:$0xff] %v1696_v61 }
 0x10b   : > { %v1698_v1 = vpop.eup %1697  ;;  %1699 = vtanh.f32 %v979_v62  ;;  %v902_v2 = vadd.f32 %v901_v0, %v733_v63  ;;  %771 = vmatmul.bf16.gmra.mxu0 %v1340_v56  ;;  %851 = vmatmul.bf16.gmra.mxu2 %v1468_v57 }
 0x10c   : > { %1106 = vst [vmem:[%s1960_s30 + $0x58] sm:$0xff] %v1698_v1  ;;  %940 = vmatmul.bf16.gmra.mxu1 %v1344_v59  ;;  %1020 = vmatmul.bf16.gmra.mxu3 %v1472_v60 }
 0x10d   : > { %1701 = vtanh.f32 %v902_v2 }
 0x10e   : > { %v812_v3 = vpop.f32.mrf.mxu2 }
 0x10f   : > { %v813_v4 = vadd.f32 %v1943_v48, %v812_v3  ;;  %v981_v5 = vpop.f32.mrf.mxu3 }
 0x110   : > { %v734_v6 = vpop.f32.mrf.mxu0 }
 0x111   : > { %v1700_v7 = vpop.eup %1699  ;;  %v982_v8 = vadd.f32 %v981_v5, %v813_v4  ;;  %v735_v9 = vadd.f32 %v1943_v48, %v734_v6  ;;  %v903_v10 = vpop.f32.mrf.mxu1 }
 0x112   : > { %1138 = vst [vmem:[%s1960_s30 + $0x158] sm:$0xff] %v1700_v7 }
 0x113   : > { %v1702_v11 = vpop.eup %1701  ;;  %1703 = vtanh.f32 %v982_v8  ;;  %v904_v12 = vadd.f32 %v903_v10, %v735_v9 }
 0x114   : > { %1107 = vst [vmem:[%s1960_s30 + $0x60] sm:$0xff] %v1702_v11 }
 0x115   : > { %1705 = vtanh.f32 %v904_v12 }
 0x116   : > { %v814_v21 = vpop.f32.mrf.mxu2 }
 0x117   : > { %v815_v22 = vadd.f32 %v1943_v48, %v814_v21  ;;  %v983_v23 = vpop.f32.mrf.mxu3 }
 0x118   : > { %v737_v26 = vpop.f32.mrf.mxu0 }
 0x119   : > { %v1704_v29 = vpop.eup %1703  ;;  %v984_v30 = vadd.f32 %v983_v23, %v815_v22  ;;  %v738_v31 = vadd.f32 %v1943_v48, %v737_v26  ;;  %v906_v32 = vpop.f32.mrf.mxu1 }
 0x11a   : > { %1139 = vst [vmem:[%s1960_s30 + $0x160] sm:$0xff] %v1704_v29 }
 0x11b   : > { %v1706_v33 = vpop.eup %1705  ;;  %1707 = vtanh.f32 %v984_v30  ;;  %v907_v34 = vadd.f32 %v906_v32, %v738_v31  ;;  %776 = vmatmul.bf16.gmra.mxu0 %v1348_v24  ;;  %856 = vmatmul.bf16.gmra.mxu2 %v1476_v25 }
 0x11c   : > { %1108 = vst [vmem:[%s1960_s30 + $0x68] sm:$0xff] %v1706_v33  ;;  %945 = vmatmul.bf16.gmra.mxu1 %v1352_v27  ;;  %1025 = vmatmul.bf16.gmra.mxu3 %v1480_v28 }
 0x11d   : > { %1709 = vtanh.f32 %v907_v34 }
 0x11e   : > { %v817_v35 = vpop.f32.mrf.mxu2 }
 0x11f   : > { %v818_v36 = vadd.f32 %v1943_v48, %v817_v35  ;;  %v986_v37 = vpop.f32.mrf.mxu3 }
 0x120   : > { %v739_v38 = vpop.f32.mrf.mxu0 }
 0x121   : > { %v1708_v39 = vpop.eup %1707  ;;  %v987_v40 = vadd.f32 %v986_v37, %v818_v36  ;;  %v740_v41 = vadd.f32 %v1943_v48, %v739_v38  ;;  %v908_v42 = vpop.f32.mrf.mxu1 }
 0x122   : > { %1140 = vst [vmem:[%s1960_s30 + $0x168] sm:$0xff] %v1708_v39 }
 0x123   : > { %v1710_v43 = vpop.eup %1709  ;;  %1711 = vtanh.f32 %v987_v40  ;;  %v909_v44 = vadd.f32 %v908_v42, %v740_v41 }
 0x124   : > { %1109 = vst [vmem:[%s1960_s30 + $0x70] sm:$0xff] %v1710_v43 }
 0x125   : > { %1713 = vtanh.f32 %v909_v44 }
 0x126   : > { %v819_v45 = vpop.f32.mrf.mxu2 }
 0x127   : > { %v820_v46 = vadd.f32 %v1943_v48, %v819_v45  ;;  %v988_v47 = vpop.f32.mrf.mxu3 }
 0x128   : > { %v742_v49 = vpop.f32.mrf.mxu0 }
 0x129   : > { %v1712_v50 = vpop.eup %1711  ;;  %v989_v51 = vadd.f32 %v988_v47, %v820_v46  ;;  %v743_v52 = vadd.f32 %v1943_v48, %v742_v49  ;;  %v911_v53 = vpop.f32.mrf.mxu1 }
 0x12a   : > { %1141 = vst [vmem:[%s1960_s30 + $0x170] sm:$0xff] %v1712_v50 }
 0x12b   : > { %v1714_v54 = vpop.eup %1713  ;;  %1715 = vtanh.f32 %v989_v51  ;;  %v912_v55 = vadd.f32 %v911_v53, %v743_v52 }
 0x12c   : > { %1110 = vst [vmem:[%s1960_s30 + $0x78] sm:$0xff] %v1714_v54 }
 0x12d   : > { %1717 = vtanh.f32 %v912_v55 }
 0x12e   : > { %v822_v56 = vpop.f32.mrf.mxu2 }
 0x12f   : > { %v823_v57 = vadd.f32 %v1943_v48, %v822_v56  ;;  %v991_v58 = vpop.f32.mrf.mxu3 }
 0x130   : > { %v744_v59 = vpop.f32.mrf.mxu0 }
 0x131   : > { %v1716_v60 = vpop.eup %1715  ;;  %v992_v61 = vadd.f32 %v991_v58, %v823_v57  ;;  %v745_v62 = vadd.f32 %v1943_v48, %v744_v59  ;;  %v913_v63 = vpop.f32.mrf.mxu1 }
 0x132   : > { %1142 = vst [vmem:[%s1960_s30 + $0x178] sm:$0xff] %v1716_v60 }
 0x133   : > { %v1718_v0 = vpop.eup %1717  ;;  %1719 = vtanh.f32 %v992_v61  ;;  %v914_v1 = vadd.f32 %v913_v63, %v745_v62 }
 0x134   : > { %1111 = vst [vmem:[%s1960_s30 + $0x80] sm:$0xff] %v1718_v0 }
 0x135   : > { %1721 = vtanh.f32 %v914_v1 }
 0x136   : > { %v824_v2 = vpop.f32.mrf.mxu2 }
 0x137   : > { %v825_v3 = vadd.f32 %v1943_v48, %v824_v2  ;;  %v993_v4 = vpop.f32.mrf.mxu3 }
 0x138   : > { %v747_v5 = vpop.f32.mrf.mxu0 }
 0x139   : > { %v1720_v6 = vpop.eup %1719  ;;  %v994_v7 = vadd.f32 %v993_v4, %v825_v3  ;;  %v748_v8 = vadd.f32 %v1943_v48, %v747_v5  ;;  %v916_v9 = vpop.f32.mrf.mxu1 }
 0x13a   : > { %1143 = vst [vmem:[%s1960_s30 + $0x180] sm:$0xff] %v1720_v6 }
 0x13b   : > { %v1722_v10 = vpop.eup %1721  ;;  %1723 = vtanh.f32 %v994_v7  ;;  %v917_v11 = vadd.f32 %v916_v9, %v748_v8 }
 0x13c   : > { %1112 = vst [vmem:[%s1960_s30 + $0x88] sm:$0xff] %v1722_v10 }
 0x13d   : > { %1725 = vtanh.f32 %v917_v11 }
 0x13e   : > { %v827_v12 = vpop.f32.mrf.mxu2 }
 0x13f   : > { %v828_v13 = vadd.f32 %v1943_v48, %v827_v12  ;;  %v996_v14 = vpop.f32.mrf.mxu3 }
 0x140   : > { %v749_v15 = vpop.f32.mrf.mxu0 }
 0x141   : > { %v1724_v16 = vpop.eup %1723  ;;  %v997_v17 = vadd.f32 %v996_v14, %v828_v13  ;;  %v750_v18 = vadd.f32 %v1943_v48, %v749_v15  ;;  %v918_v19 = vpop.f32.mrf.mxu1 }
 0x142   : > { %1144 = vst [vmem:[%s1960_s30 + $0x188] sm:$0xff] %v1724_v16 }
 0x143   : > { %v1726_v20 = vpop.eup %1725  ;;  %1727 = vtanh.f32 %v997_v17  ;;  %v919_v21 = vadd.f32 %v918_v19, %v750_v18 }
 0x144   : > { %1113 = vst [vmem:[%s1960_s30 + $0x90] sm:$0xff] %v1726_v20 }
 0x145   : > { %1729 = vtanh.f32 %v919_v21 }
 0x146   : > { %v829_v22 = vpop.f32.mrf.mxu2 }
 0x147   : > { %v830_v23 = vadd.f32 %v1943_v48, %v829_v22  ;;  %v998_v24 = vpop.f32.mrf.mxu3 }
 0x148   : > { %v752_v25 = vpop.f32.mrf.mxu0 }
 0x149   : > { %v1728_v26 = vpop.eup %1727  ;;  %v999_v27 = vadd.f32 %v998_v24, %v830_v23  ;;  %v753_v28 = vadd.f32 %v1943_v48, %v752_v25  ;;  %v921_v29 = vpop.f32.mrf.mxu1 }
 0x14a   : > { %1145 = vst [vmem:[%s1960_s30 + $0x190] sm:$0xff] %v1728_v26 }
 0x14b   : > { %v1730_v30 = vpop.eup %1729  ;;  %1731 = vtanh.f32 %v999_v27  ;;  %v922_v31 = vadd.f32 %v921_v29, %v753_v28 }
 0x14c   : > { %1114 = vst [vmem:[%s1960_s30 + $0x98] sm:$0xff] %v1730_v30 }
 0x14d   : > { %1733 = vtanh.f32 %v922_v31 }
 0x14e   : > { %v832_v32 = vpop.f32.mrf.mxu2 }
 0x14f   : > { %v833_v33 = vadd.f32 %v1943_v48, %v832_v32  ;;  %v1001_v34 = vpop.f32.mrf.mxu3 }
 0x150   : > { %v754_v35 = vpop.f32.mrf.mxu0 }
 0x151   : > { %v1732_v36 = vpop.eup %1731  ;;  %v1002_v37 = vadd.f32 %v1001_v34, %v833_v33  ;;  %v755_v38 = vadd.f32 %v1943_v48, %v754_v35  ;;  %v923_v39 = vpop.f32.mrf.mxu1 }
 0x152   : > { %1146 = vst [vmem:[%s1960_s30 + $0x198] sm:$0xff] %v1732_v36 }
 0x153   : > { %v1734_v40 = vpop.eup %1733  ;;  %1735 = vtanh.f32 %v1002_v37  ;;  %v924_v41 = vadd.f32 %v923_v39, %v755_v38 }
 0x154   : > { %1115 = vst [vmem:[%s1960_s30 + $0xa0] sm:$0xff] %v1734_v40  ;;  %v1781_v40 = vld [vmem:[%s2143_s2] ss:$0 sm:$0xff] }
 0x155   : > { %1737 = vtanh.f32 %v924_v41 }
 0x156   : > { %v834_v42 = vpop.f32.mrf.mxu2 }
 0x157   : > { %v835_v43 = vadd.f32 %v1943_v48, %v834_v42  ;;  %v1003_v44 = vpop.f32.mrf.mxu3 }
 0x158   : > { %v757_v45 = vpop.f32.mrf.mxu0 }
 0x159   : > { %v1736_v46 = vpop.eup %1735  ;;  %v1004_v47 = vadd.f32 %v1003_v44, %v835_v43  ;;  %v758_v49 = vadd.f32 %v1943_v48, %v757_v45  ;;  %v926_v50 = vpop.f32.mrf.mxu1 }
 0x15a   : > { %1147 = vst [vmem:[%s1960_s30 + $0x1a0] sm:$0xff] %v1736_v46 }
 0x15b   : > { %v1738_v51 = vpop.eup %1737  ;;  %1739 = vtanh.f32 %v1004_v47  ;;  %v927_v52 = vadd.f32 %v926_v50, %v758_v49 }
 0x15c   : > { %1116 = vst [vmem:[%s1960_s30 + $0xa8] sm:$0xff] %v1738_v51 }
 0x15d   : > { %1741 = vtanh.f32 %v927_v52 }
 0x15e   : > { %v837_v53 = vpop.f32.mrf.mxu2 }
 0x15f   : > { %v838_v54 = vadd.f32 %v1943_v48, %v837_v53  ;;  %v1006_v55 = vpop.f32.mrf.mxu3 }
 0x160   : > { %v759_v56 = vpop.f32.mrf.mxu0 }
 0x161   : > { %v1740_v57 = vpop.eup %1739  ;;  %v1007_v58 = vadd.f32 %v1006_v55, %v838_v54  ;;  %v760_v59 = vadd.f32 %v1943_v48, %v759_v56  ;;  %v928_v60 = vpop.f32.mrf.mxu1 }
 0x162   : > { %1148 = vst [vmem:[%s1960_s30 + $0x1a8] sm:$0xff] %v1740_v57 }
 0x163   : > { %v1742_v61 = vpop.eup %1741  ;;  %1743 = vtanh.f32 %v1007_v58  ;;  %v929_v62 = vadd.f32 %v928_v60, %v760_v59 }
 0x164   : > { %1117 = vst [vmem:[%s1960_s30 + $0xb0] sm:$0xff] %v1742_v61 }
 0x165   : > { %1745 = vtanh.f32 %v929_v62 }
 0x166   : > { %v839_v63 = vpop.f32.mrf.mxu2 }
 0x167   : > { %v840_v0 = vadd.f32 %v1943_v48, %v839_v63  ;;  %v1008_v1 = vpop.f32.mrf.mxu3 }
 0x168   : > { %v762_v2 = vpop.f32.mrf.mxu0 }
 0x169   : > { %v1744_v3 = vpop.eup %1743  ;;  %v1009_v4 = vadd.f32 %v1008_v1, %v840_v0  ;;  %v763_v5 = vadd.f32 %v1943_v48, %v762_v2  ;;  %v931_v6 = vpop.f32.mrf.mxu1 }
 0x16a   : > { %1149 = vst [vmem:[%s1960_s30 + $0x1b0] sm:$0xff] %v1744_v3 }
 0x16b   : > { %v1746_v7 = vpop.eup %1745  ;;  %1747 = vtanh.f32 %v1009_v4  ;;  %v932_v8 = vadd.f32 %v931_v6, %v763_v5 }
 0x16c   : > { %1118 = vst [vmem:[%s1960_s30 + $0xb8] sm:$0xff] %v1746_v7 }
 0x16d   : > { %1749 = vtanh.f32 %v932_v8 }
 0x16e   : > { %v842_v9 = vpop.f32.mrf.mxu2 }
 0x16f   : > { %v843_v10 = vadd.f32 %v1943_v48, %v842_v9  ;;  %v1011_v11 = vpop.f32.mrf.mxu3 }
 0x170   : > { %v764_v12 = vpop.f32.mrf.mxu0 }
 0x171   : > { %v1748_v13 = vpop.eup %1747  ;;  %v1012_v14 = vadd.f32 %v1011_v11, %v843_v10  ;;  %v765_v15 = vadd.f32 %v1943_v48, %v764_v12  ;;  %v933_v16 = vpop.f32.mrf.mxu1 }
 0x172   : > { %1150 = vst [vmem:[%s1960_s30 + $0x1b8] sm:$0xff] %v1748_v13 }
 0x173   : > { %v1750_v17 = vpop.eup %1749  ;;  %1751 = vtanh.f32 %v1012_v14  ;;  %v934_v18 = vadd.f32 %v933_v16, %v765_v15 }
 0x174   : > { %1119 = vst [vmem:[%s1960_s30 + $0xc0] sm:$0xff] %v1750_v17 }
 0x175   : > { %1753 = vtanh.f32 %v934_v18 }
 0x176   : > { %v844_v19 = vpop.f32.mrf.mxu2 }
 0x177   : > { %v845_v20 = vadd.f32 %v1943_v48, %v844_v19  ;;  %v1013_v21 = vpop.f32.mrf.mxu3 }
 0x178   : > { %v767_v22 = vpop.f32.mrf.mxu0 }
 0x179   : > { %v1752_v23 = vpop.eup %1751  ;;  %v1014_v24 = vadd.f32 %v1013_v21, %v845_v20  ;;  %v768_v25 = vadd.f32 %v1943_v48, %v767_v22  ;;  %v936_v26 = vpop.f32.mrf.mxu1 }
 0x17a   : > { %1151 = vst [vmem:[%s1960_s30 + $0x1c0] sm:$0xff] %v1752_v23 }
 0x17b   : > { %v1754_v27 = vpop.eup %1753  ;;  %1755 = vtanh.f32 %v1014_v24  ;;  %v937_v28 = vadd.f32 %v936_v26, %v768_v25 }
 0x17c   : > { %1120 = vst [vmem:[%s1960_s30 + $0xc8] sm:$0xff] %v1754_v27 }
 0x17d   : > { %1757 = vtanh.f32 %v937_v28 }
 0x17e   : > { %v847_v29 = vpop.f32.mrf.mxu2 }
 0x17f   : > { %v848_v30 = vadd.f32 %v1943_v48, %v847_v29  ;;  %v1016_v31 = vpop.f32.mrf.mxu3 }
 0x180   : > { %v769_v32 = vpop.f32.mrf.mxu0 }
 0x181   : > { %v1756_v33 = vpop.eup %1755  ;;  %v1017_v34 = vadd.f32 %v1016_v31, %v848_v30  ;;  %v770_v35 = vadd.f32 %v1943_v48, %v769_v32  ;;  %v938_v36 = vpop.f32.mrf.mxu1 }
 0x182   : > { %1152 = vst [vmem:[%s1960_s30 + $0x1c8] sm:$0xff] %v1756_v33 }
 0x183   : > { %v1758_v37 = vpop.eup %1757  ;;  %1759 = vtanh.f32 %v1017_v34  ;;  %v939_v38 = vadd.f32 %v938_v36, %v770_v35 }
 0x184   : > { %1121 = vst [vmem:[%s1960_s30 + $0xd0] sm:$0xff] %v1758_v37 }
 0x185   : > { %1761 = vtanh.f32 %v939_v38 }
 0x186   : > { %v849_v39 = vpop.f32.mrf.mxu2 }
 0x187   : > { %v850_v41 = vadd.f32 %v1781_v40, %v849_v39  ;;  %v1018_v42 = vpop.f32.mrf.mxu3 }
 0x188   : > { %v772_v43 = vpop.f32.mrf.mxu0 }
 0x189   : > { %v1760_v44 = vpop.eup %1759  ;;  %v1019_v45 = vadd.f32 %v1018_v42, %v850_v41  ;;  %v773_v48 = vadd.f32 %v1781_v40, %v772_v43  ;;  %v941_v46 = vpop.f32.mrf.mxu1 }
 0x18a   : > { %1153 = vst [vmem:[%s1960_s30 + $0x1d0] sm:$0xff] %v1760_v44 }
 0x18b   : > { %v1762_v47 = vpop.eup %1761  ;;  %1763 = vtanh.f32 %v1019_v45  ;;  %v942_v49 = vadd.f32 %v941_v46, %v773_v48 }
 0x18c   : > { %1122 = vst [vmem:[%s1960_s30 + $0xd8] sm:$0xff] %v1762_v47 }
 0x18d   : > { %1765 = vtanh.f32 %v942_v49 }
 0x18e   : > { %v852_v50 = vpop.f32.mrf.mxu2 }
 0x18f   : > { %v853_v51 = vadd.f32 %v1781_v40, %v852_v50  ;;  %v1021_v52 = vpop.f32.mrf.mxu3 }
 0x190   : > { %v774_v53 = vpop.f32.mrf.mxu0 }
 0x191   : > { %v1764_v54 = vpop.eup %1763  ;;  %v1022_v55 = vadd.f32 %v1021_v52, %v853_v51  ;;  %v775_v56 = vadd.f32 %v1781_v40, %v774_v53  ;;  %v943_v57 = vpop.f32.mrf.mxu1 }
 0x192   : > { %1154 = vst [vmem:[%s1960_s30 + $0x1d8] sm:$0xff] %v1764_v54 }
 0x193   : > { %v1766_v58 = vpop.eup %1765  ;;  %1767 = vtanh.f32 %v1022_v55  ;;  %v944_v59 = vadd.f32 %v943_v57, %v775_v56 }
 0x194   : > { %1123 = vst [vmem:[%s1960_s30 + $0xe0] sm:$0xff] %v1766_v58 }
 0x195   : > { %1769 = vtanh.f32 %v944_v59 }
 0x196   : > { %v854_v60 = vpop.f32.mrf.mxu2 }
 0x197   : > { %v855_v61 = vadd.f32 %v1781_v40, %v854_v60  ;;  %v1023_v62 = vpop.f32.mrf.mxu3 }
 0x198   : > { %v777_v63 = vpop.f32.mrf.mxu0 }
 0x199   : > { %v1768_v0 = vpop.eup %1767  ;;  %v1024_v1 = vadd.f32 %v1023_v62, %v855_v61  ;;  %v778_v2 = vadd.f32 %v1781_v40, %v777_v63  ;;  %v946_v3 = vpop.f32.mrf.mxu1 }
 0x19a   : > { %1155 = vst [vmem:[%s1960_s30 + $0x1e0] sm:$0xff] %v1768_v0 }
 0x19b   : > { %v1770_v4 = vpop.eup %1769  ;;  %1771 = vtanh.f32 %v1024_v1  ;;  %v947_v5 = vadd.f32 %v946_v3, %v778_v2 }
 0x19c   : > { %1124 = vst [vmem:[%s1960_s30 + $0xe8] sm:$0xff] %v1770_v4 }
 0x19d   : > { %1773 = vtanh.f32 %v947_v5 }
 0x19e   : > { %v857_v6 = vpop.f32.mrf.mxu2 }
 0x19f   : > { %v858_v7 = vadd.f32 %v1781_v40, %v857_v6  ;;  %v1026_v8 = vpop.f32.mrf.mxu3 }
 0x1a0   : > { %v779_v9 = vpop.f32.mrf.mxu0 }
 0x1a1   : > { %v1772_v10 = vpop.eup %1771  ;;  %v1027_v11 = vadd.f32 %v1026_v8, %v858_v7  ;;  %v780_v12 = vadd.f32 %v1781_v40, %v779_v9  ;;  %v948_v13 = vpop.f32.mrf.mxu1 }
 0x1a2   : > { %1156 = vst [vmem:[%s1960_s30 + $0x1e8] sm:$0xff] %v1772_v10 }
 0x1a3   : > { %v1774_v14 = vpop.eup %1773  ;;  %1775 = vtanh.f32 %v1027_v11  ;;  %v949_v15 = vadd.f32 %v948_v13, %v780_v12 }
 0x1a4   : > { %1125 = vst [vmem:[%s1960_s30 + $0xf0] sm:$0xff] %v1774_v14 }
 0x1a5   : > { %1777 = vtanh.f32 %v949_v15 }
 0x1a6   : > { %v859_v16 = vpop.f32.mrf.mxu2 }
 0x1a7   : > { %v860_v17 = vadd.f32 %v1781_v40, %v859_v16  ;;  %v1028_v18 = vpop.f32.mrf.mxu3 }
 0x1a9   : > { %v1776_v19 = vpop.eup %1775  ;;  %v1029_v20 = vadd.f32 %v1028_v18, %v860_v17 }
 0x1aa   : > { %1157 = vst [vmem:[%s1960_s30 + $0x1f0] sm:$0xff] %v1776_v19 }
 0x1ab   : > { %v1778_v21 = vpop.eup %1777  ;;  %1779 = vtanh.f32 %v1029_v20 }
 0x1ac   : > { %1126 = vst [vmem:[%s1960_s30 + $0xf8] sm:$0xff] %v1778_v21 }
 0x1b1   : > { %v1780_v22 = vpop.eup %1779 }
 0x1b2   : > { %1158 = vst [vmem:[%s1960_s30 + $0x1f8] sm:$0xff] %v1780_v22 }
 0x1b3 PF: > { %s13_s12 = sadd.s32 1, %s1788_s12  }
 0x1b4   : > { %p10_p4 = scmp.ge.s32.totalorder %s13_s12, 6  }
 0x1b6   :  { %12 = sbr.rel (!%p10_p4) target bundleno = 1 (0x1), region = 62 }

</bundles_post_ra>
